<compile_context>
chip_gen: v7x
topology: tpu7x:2x2x1
jax: 0.10.0
libtpu: 0.0.40
codegen_flags: <defaults>
</compile_context>

<pallas_src>
import numpy as np
import jax
import jax.numpy as jnp
from jax import lax
from jax.experimental import pallas as pl
from jax.experimental.pallas import tpu as pltpu


UNROLL_T_MAX = 16   # fully unroll the recurrence below this static T


def gru_bidir_kernel(emb_ref, lens_ref, wih_ref, bih_ref,
                     whh_f_ref, bhhn_f_ref, whh_b_ref, bhhn_b_ref,
                     out_ref, hid_ref, gi_ref):
    """Fused bidirectional GRU over one batch tile.

    emb_ref   : (T, Bt, Hp)      bf16   embedded inputs (padded)
    lens_ref  : (Bt, Hp)         int32  per-row sequence length, broadcast over lanes
    wih_ref   : (Hp, 6*Hp)       bf16   [W_ih_fwd | W_ih_bwd], gate blocks padded to Hp
    bih_ref   : (1, 6*Hp)        f32    b_ih with b_hh r/z thirds pre-folded in
    whh_*     : (Hp, 3*Hp)       bf16
    bhhn_*    : (1, Hp)          f32    n-slice of b_hh (must stay inside r*(...))
    out_ref   : (T, Bt, 2*Hp)    f32    [:, :, :Hp]=fwd, [:, :, Hp:]=bwd
    hid_ref   : (Bt, 2*Hp)       f32    final [h_fwd | h_bwd]
    gi_ref    : (T, Bt, 6*Hp)    bf16   VMEM scratch: precomputed input projection
    """
    T, B, Hp = emb_ref.shape
    G = 3 * Hp

    # ---- Phase 1: input projection for all timesteps / both directions --------
    # One big MXU matmul (M = T*B fills the MXU rows); biases added in f32, then
    # quantized to bf16 for the resident gi scratch.
    x2d = emb_ref[...].reshape(T * B, Hp)                                      # bf16
    gi_all = jnp.dot(x2d, wih_ref[...], preferred_element_type=jnp.float32)    # (T*B, 6Hp) f32
    gi_ref[...] = (gi_all + bih_ref[...]).reshape(T, B, 2 * G).astype(jnp.bfloat16)

    # Hoisted (loop-invariant) loads.
    whh_f = whh_f_ref[...]
    whh_b = whh_b_ref[...]
    bhhn_f = bhhn_f_ref[...]
    bhhn_b = bhhn_b_ref[...]
    lens_v = lens_ref[...]                                                     # (B, Hp) int32

    def gru_cell(gi_t, h, whh, bhh_n):
        # PyTorch GRU cell, gate order (r, z, n). bf16 MXU inputs, f32 accum + f32 gates.
        # r/z biases of b_hh were folded into gi at weight-prep time.
        gh = jnp.dot(h.astype(whh.dtype), whh,
                     preferred_element_type=jnp.float32)                        # (B, 3Hp)
        r = jax.nn.sigmoid(gi_t[:, 0:Hp] + gh[:, 0:Hp])
        z = jax.nn.sigmoid(gi_t[:, Hp:2 * Hp] + gh[:, Hp:2 * Hp])
        n = jnp.tanh(gi_t[:, 2 * Hp:G] + r * (gh[:, 2 * Hp:G] + bhh_n))
        return (1.0 - z) * n + z * h

    def step(i, h_f, h_b):
        # Two independent direction chains per iteration (ILP).
        t_f = i
        t_b = T - 1 - i
        hn_f = gru_cell(gi_ref[t_f, :, 0:G], h_f, whh_f, bhhn_f)
        hn_b = gru_cell(gi_ref[t_b, :, G:2 * G], h_b, whh_b, bhhn_b)
        # Packed-sequence semantics: freeze h past each element's length, zero padding.
        # Lane-dense int compares on the VPU; single vselect per blend.
        valid_f = t_f < lens_v
        valid_b = t_b < lens_v
        h_f = jnp.where(valid_f, hn_f, h_f)
        h_b = jnp.where(valid_b, hn_b, h_b)
        out_ref[t_f, :, 0:Hp] = jnp.where(valid_f, hn_f, 0.0)
        out_ref[t_b, :, Hp:2 * Hp] = jnp.where(valid_b, hn_b, 0.0)
        return h_f, h_b

    h_f = jnp.zeros((B, Hp), jnp.float32)
    h_b = jnp.zeros((B, Hp), jnp.float32)

    if T <= UNROLL_T_MAX:
        # Fully unrolled: static indices, max LLO scheduling visibility.
        for i in range(T):
            h_f, h_b = step(i, h_f, h_b)
    else:
        # Bounded unroll: keeps vreg pressure sane at large B_TILE.
        def body(i, carry):
            return step(i, *carry)
        h_f, h_b = lax.fori_loop(0, T, body, (h_f, h_b), unroll=4)

    # _cat_directions for n_layers = 1: [h_fwd ; h_bwd] along features.
    hid_ref[:, 0:Hp] = h_f
    hid_ref[:, Hp:2 * Hp] = h_b


# ------------------------------ wrapper ------------------------------------
def _round_up(x, m):
    return (x + m - 1) // m * m


def _pad_gates_T(w, H, Hp, dtype):
    """(3H, H) PyTorch weight -> (Hp, 3*Hp), each gate block padded to Hp columns."""
    wp = jnp.zeros((3 * Hp, Hp), jnp.float32)
    for g in range(3):
        wp = wp.at[g * Hp:g * Hp + H, :H].set(w[g * H:(g + 1) * H, :])
    return wp.T.astype(dtype)


def _fold_bias(bih, bhh, H, Hp):
    """b_ih with the r/z thirds of b_hh folded in; gate blocks padded to Hp -> (1, 3Hp)."""
    out = jnp.zeros((3 * Hp,), jnp.float32)
    for g in range(3):
        b = bih[g * H:(g + 1) * H]
        if g < 2:                       # r, z: b_hh can be folded (outside the r*() term)
            b = b + bhh[g * H:(g + 1) * H]
        out = out.at[g * Hp:g * Hp + H].set(b)
    return out.reshape(1, 3 * Hp)


def _pad_n_bias(bhh, H, Hp):
    """n-slice of b_hh, padded to Hp lanes -> (1, Hp)."""
    out = jnp.zeros((Hp,), jnp.float32)
    out = out.at[:H].set(bhh[2 * H:3 * H])
    return out.reshape(1, Hp)


def _vmem_budget_bytes(T, Bt, Hp):
    """Rough per-tile VMEM footprint (streamed blocks double-buffered)."""
    streamed = (T * Bt * Hp * 2          # emb (bf16)
                + Bt * Hp * 4            # lens (int32)
                + T * Bt * 2 * Hp * 4    # out (f32)
                + Bt * 2 * Hp * 4)       # hid (f32)
    weights = (Hp * 6 * Hp * 2 + 6 * Hp * 4            # wih, bih
               + 2 * (Hp * 3 * Hp * 2 + Hp * 4))       # whh_*, bhhn_*
    scratch = T * Bt * 6 * Hp * 2        # gi (bf16)
    # Streamed blocks double-buffered; weights conservatively counted twice as well
    # since their BlockSpecs are not single-buffered (see TODO on pl.Buffered(1)).
    return 2 * streamed + 2 * weights + scratch


def _choose_b_tile(T, B, Hp, vmem_cap):
    bt = min(128, max(16, _round_up(B, 16)))
    while bt > 16 and _vmem_budget_bytes(T, bt, Hp) + (4 << 20) > vmem_cap:
        bt -= 16
    return bt


def encoder_rnn_forward(input_seqs, input_lengths, params):
    """JAX/Pallas equivalent of EncoderRNN.forward (n_layers=1, hidden=None)."""
    # TODO(synk): optional initial-hidden argument not supported (module is called with None).
    H = params["embedding"].shape[1]
    T, B = input_seqs.shape
    Hp = _round_up(H, 128)                       # lane-aligned hidden
    bf16 = jnp.bfloat16

    try:
        vmem_cap = int(pltpu.get_tpu_info().vmem_capacity_bytes)
    except Exception:
        vmem_cap = 64 << 20                      # conservative (v7x per-TC)

    B_TILE = _choose_b_tile(T, B, Hp, vmem_cap)
    Bp = _round_up(max(B, B_TILE), B_TILE)       # sublane/bf16-pack aligned batch
    n_btiles = Bp // B_TILE

    # Embedding gather (glue) + pad to (8,128)-aligned tiles, bf16 for the MXU.
    emb = params["embedding"][input_seqs].astype(jnp.float32)        # (T, B, H)
    emb_p = jnp.pad(emb, ((0, 0), (0, Bp - B), (0, Hp - H))).astype(bf16)

    # Per-row lengths, broadcast over Hp lanes (loaded once per tile; padded rows get 0
    # so they never update and stay zero).
    lens = input_lengths.astype(jnp.int32)
    lens_p = jnp.zeros((Bp,), jnp.int32).at[:B].set(lens)
    lens_bcast = jnp.broadcast_to(lens_p[:, None], (Bp, Hp))          # (Bp, Hp) int32

    # Weights: gate-block-padded, pre-transposed, fwd|bwd input weights concatenated,
    # r/z thirds of b_hh folded into b_ih.
    wih = jnp.concatenate([_pad_gates_T(params["wih_f"], H, Hp, bf16),
                           _pad_gates_T(params["wih_b"], H, Hp, bf16)], axis=1)   # (Hp, 6Hp)
    bih = jnp.concatenate([_fold_bias(params["bih_f"], params["bhh_f"], H, Hp),
                           _fold_bias(params["bih_b"], params["bhh_b"], H, Hp)], axis=1)
    whh_f = _pad_gates_T(params["whh_f"], H, Hp, bf16)
    whh_b = _pad_gates_T(params["whh_b"], H, Hp, bf16)
    bhhn_f = _pad_n_bias(params["bhh_f"], H, Hp)
    bhhn_b = _pad_n_bias(params["bhh_b"], H, Hp)

    vmem_need = _vmem_budget_bytes(T, B_TILE, Hp) + (4 << 20)
    vmem_limit = int(min(vmem_cap, max(vmem_need, 32 << 20)))

    # Advisory cost estimate for the XLA scheduler.
    flops = int(2 * T * Bp * Hp * 6 * Hp + 2 * 2 * T * Bp * Hp * 3 * Hp)
    transcendentals = int(2 * 3 * T * Bp * Hp)
    bytes_accessed = int(emb_p.size * 2 + lens_bcast.size * 4
                         + wih.size * 2 + bih.size * 4
                         + 2 * (whh_f.size * 2 + bhhn_f.size * 4)
                         + T * Bp * 2 * Hp * 4 + Bp * 2 * Hp * 4)
    cost = pl.CostEstimate(flops=flops, transcendentals=transcendentals,
                           bytes_accessed=bytes_accessed)

    pinned2d = lambda b: (0, 0)
    out_p, hid_p = pl.pallas_call(
        gru_bidir_kernel,
        grid=(n_btiles,),
        in_specs=[
            pl.BlockSpec((T, B_TILE, Hp), lambda b: (0, b, 0)),      # emb
            pl.BlockSpec((B_TILE, Hp), lambda b: (b, 0)),            # lens (lane-dense)
            pl.BlockSpec((Hp, 6 * Hp), pinned2d),                    # wih (fwd|bwd)
            pl.BlockSpec((1, 6 * Hp), pinned2d),                     # bih (folded)
            pl.BlockSpec((Hp, 3 * Hp), pinned2d),                    # whh_f
            pl.BlockSpec((1, Hp), pinned2d),                         # bhh_n fwd
            pl.BlockSpec((Hp, 3 * Hp), pinned2d),                    # whh_b
            pl.BlockSpec((1, Hp), pinned2d),                         # bhh_n bwd
        ],
        out_specs=(
            pl.BlockSpec((T, B_TILE, 2 * Hp), lambda b: (0, b, 0)),  # outputs
            pl.BlockSpec((B_TILE, 2 * Hp), lambda b: (b, 0)),        # hidden
        ),
        out_shape=(jax.ShapeDtypeStruct((T, Bp, 2 * Hp), jnp.float32),
                   jax.ShapeDtypeStruct((Bp, 2 * Hp), jnp.float32)),
        scratch_shapes=[pltpu.VMEM((T, B_TILE, 6 * Hp), jnp.bfloat16)],
        compiler_params=pltpu.CompilerParams(
            dimension_semantics=("parallel",),      # batch tiles -> megacore / v7x 2nd TC
            vmem_limit_bytes=vmem_limit),
        cost_estimate=cost,
    )(emb_p, lens_bcast, wih, bih, whh_f, bhhn_f, whh_b, bhhn_b)

    if Hp == H and Bp == B:
        outputs = out_p                              # already lane-dense [fwd|bwd]
        hid = hid_p
    else:
        outputs = jnp.concatenate([out_p[:, :B, :H], out_p[:, :B, Hp:Hp + H]], axis=2)
        hid = jnp.concatenate([hid_p[:B, :H], hid_p[:B, Hp:Hp + H]], axis=1)
    return outputs, hid[None, :, :]


# -------------------- pure-JAX reference (sanity check) ---------------------
# Mirrors the kernel's numerics policy (bf16 matmul inputs, f32 accumulation, bf16 gi
# quantization, r/z bhh folded before the gi quantization) so the comparison isolates
# kernel correctness from quantization policy.
def encoder_rnn_reference(input_seqs, input_lengths, params):
    emb = params["embedding"][input_seqs].astype(jnp.float32)
    T, B = input_seqs.shape
    H = params["embedding"].shape[1]
    lens = input_lengths.astype(jnp.int32).reshape(B, 1)
    bf16 = jnp.bfloat16

    def cell(x, h, wih, whh, bih, bhh):
        b_fold = bih + jnp.concatenate([bhh[:2 * H], jnp.zeros((H,), jnp.float32)])
        gi = (jnp.dot(x.astype(bf16), wih.T.astype(bf16),
                      preferred_element_type=jnp.float32) + b_fold).astype(bf16)
        gh = jnp.dot(h.astype(bf16), whh.T.astype(bf16),
                     preferred_element_type=jnp.float32)
        r = jax.nn.sigmoid(gi[:, :H].astype(jnp.float32) + gh[:, :H])
        z = jax.nn.sigmoid(gi[:, H:2 * H].astype(jnp.float32) + gh[:, H:2 * H])
        n = jnp.tanh(gi[:, 2 * H:].astype(jnp.float32) + r * (gh[:, 2 * H:] + bhh[2 * H:]))
        return (1.0 - z) * n + z * h

    out_f = []
    h = jnp.zeros((B, H), jnp.float32)
    for t in range(T):
        h_new = cell(emb[t], h, params["wih_f"], params["whh_f"],
                     params["bih_f"], params["bhh_f"])
        valid = t < lens
        h = jnp.where(valid, h_new, h)
        out_f.append(jnp.where(valid, h, 0.0))
    h_f = h

    out_b = [None] * T
    h = jnp.zeros((B, H), jnp.float32)
    for t in range(T - 1, -1, -1):
        h_new = cell(emb[t], h, params["wih_b"], params["whh_b"],
                     params["bih_b"], params["bhh_b"])
        valid = t < lens
        h = jnp.where(valid, h_new, h)
        out_b[t] = jnp.where(valid, h, 0.0)
    h_b = h

    outputs = jnp.concatenate([jnp.stack(out_f), jnp.stack(out_b)], axis=2)
    hidden = jnp.concatenate([h_f, h_b], axis=1)[None]
    return outputs, hidden


def init_params(key, vocab_size, hidden_size):
    H = hidden_size
    ks = jax.random.split(key, 9)
    scale = 1.0 / np.sqrt(H)
    u = lambda k, shape: jax.random.uniform(k, shape, jnp.float32, -scale, scale)
    # PyTorch layouts: weight_ih/weight_hh are (3H, H); biases (3H,).
    return {
        "embedding": jax.random.normal(ks[0], (vocab_size, H), jnp.float32),
        "wih_f": u(ks[1], (3 * H, H)),
        "whh_f": u(ks[2], (3 * H, H)),
        "bih_f": u(ks[3], (3 * H,)),
        "bhh_f": u(ks[4], (3 * H,)),
        "wih_b": u(ks[5], (3 * H, H)),
        "whh_b": u(ks[6], (3 * H, H)),
        "bih_b": u(ks[7], (3 * H,)),
        "bhh_b": u(ks[8], (3 * H,)),
    }


if __name__ == "__main__":
    INPUT_SIZE = 16   # vocab
    HIDDEN = 32
    T, B = 8, 2

    key = jax.random.PRNGKey(0)
    k_par, k_seq = jax.random.split(key)
    params = init_params(k_par, INPUT_SIZE, HIDDEN)

    input_seqs = jax.random.randint(k_seq, (T, B), 0, INPUT_SIZE, dtype=jnp.int32)
    input_lengths = jnp.array([8, 5], dtype=jnp.int32)  # sorted descending

    outputs, hidden = jax.jit(encoder_rnn_forward)(input_seqs, input_lengths, params)
    outputs = jax.block_until_ready(outputs)
    hidden = jax.block_until_ready(hidden)

    assert outputs.shape == (T, B, 2 * HIDDEN)
    assert hidden.shape == (1, B, 2 * HIDDEN)

    ref_out, ref_hid = encoder_rnn_reference(input_seqs, input_lengths, params)
    np.testing.assert_allclose(np.asarray(outputs), np.asarray(ref_out),
                               rtol=5e-3, atol=5e-3)
    np.testing.assert_allclose(np.asarray(hidden), np.asarray(ref_hid),
                               rtol=5e-3, atol=5e-3)

    print("KERNEL_OK")
</pallas_src>

<mosaic_0001>
module attributes {stable_mosaic.version = 11 : i64} {
  func.func @gru_bidir_kernel(%arg0: i32, %arg1: memref<8x16x128xbf16, #tpu.memory_space<vmem>>, %arg2: memref<16x128xi32, #tpu.memory_space<vmem>>, %arg3: memref<128x768xbf16, #tpu.memory_space<vmem>>, %arg4: memref<1x768xf32, #tpu.memory_space<vmem>>, %arg5: memref<128x384xbf16, #tpu.memory_space<vmem>>, %arg6: memref<1x128xf32, #tpu.memory_space<vmem>>, %arg7: memref<128x384xbf16, #tpu.memory_space<vmem>>, %arg8: memref<1x128xf32, #tpu.memory_space<vmem>>, %arg9: memref<8x16x256xf32, #tpu.memory_space<vmem>>, %arg10: memref<16x256xf32, #tpu.memory_space<vmem>>, %arg11: memref<8x16x768xbf16, #tpu.memory_space<vmem>>) attributes {dimension_semantics = [#tpu.dimension_semantics<parallel>], iteration_bounds = array<i64: 1>, scalar_prefetch = 0 : i64, scratch_operands = 1 : i64, tpu.core_type = #tpu.core_type<tc>, window_params = [{transform_indices = @transform_0, window_bounds = array<i64: 8, 16, 128>}, {transform_indices = @transform_1, window_bounds = array<i64: 16, 128>}, {pipeline_mode = #tpu.pipeline_mode<synchronous>, transform_indices = @transform_2, window_bounds = array<i64: 128, 768>}, {pipeline_mode = #tpu.pipeline_mode<synchronous>, transform_indices = @transform_3, window_bounds = array<i64: 1, 768>}, {pipeline_mode = #tpu.pipeline_mode<synchronous>, transform_indices = @transform_4, window_bounds = array<i64: 128, 384>}, {pipeline_mode = #tpu.pipeline_mode<synchronous>, transform_indices = @transform_5, window_bounds = array<i64: 1, 128>}, {pipeline_mode = #tpu.pipeline_mode<synchronous>, transform_indices = @transform_6, window_bounds = array<i64: 128, 384>}, {pipeline_mode = #tpu.pipeline_mode<synchronous>, transform_indices = @transform_7, window_bounds = array<i64: 1, 128>}, {transform_indices = @transform_8, window_bounds = array<i64: 8, 16, 256>}, {transform_indices = @transform_9, window_bounds = array<i64: 16, 256>}]} {
    %c0 = arith.constant 0 : index
    %c0_0 = arith.constant 0 : index
    %c0_1 = arith.constant 0 : index
    %0 = vector.load %arg1[%c0, %c0_0, %c0_1] : memref<8x16x128xbf16, #tpu.memory_space<vmem>>, vector<8x16x128xbf16>
    %1 = vector.shape_cast %0 : vector<8x16x128xbf16> to vector<128x128xbf16>
    %c0_2 = arith.constant 0 : index
    %c0_3 = arith.constant 0 : index
    %2 = vector.load %arg3[%c0_2, %c0_3] : memref<128x768xbf16, #tpu.memory_space<vmem>>, vector<128x768xbf16>
    %cst = arith.constant dense<0.000000e+00> : vector<128x768xf32>
    %3 = tpu.matmul %1, %2, %cst {dimension_numbers = #tpu.dot_dimension_numbers<[1], [0], [0], [1], [0, 0, 1, 1], [], []>} : vector<128x128xbf16>, vector<128x768xbf16>, vector<128x768xf32> -> vector<128x768xf32>
    %c0_4 = arith.constant 0 : index
    %c0_5 = arith.constant 0 : index
    %4 = vector.load %arg4[%c0_4, %c0_5] : memref<1x768xf32, #tpu.memory_space<vmem>>, vector<1x768xf32>
    %5 = vector.broadcast %4 : vector<1x768xf32> to vector<128x768xf32>
    %6 = arith.addf %3, %5 : vector<128x768xf32>
    %7 = vector.shape_cast %6 : vector<128x768xf32> to vector<8x16x768xf32>
    %8 = arith.truncf %7 : vector<8x16x768xf32> to vector<8x16x768xbf16>
    %c0_6 = arith.constant 0 : index
    %c0_7 = arith.constant 0 : index
    %c0_8 = arith.constant 0 : index
    %9 = vector.load %arg11[%c0_6, %c0_7, %c0_8] : memref<8x16x768xbf16, #tpu.memory_space<vmem>>, vector<8x16x768xbf16>
    tpu.vector_store %arg11[%c0_6, %c0_7, %c0_8], %8 {strides = array<i32>} : memref<8x16x768xbf16, #tpu.memory_space<vmem>>, vector<8x16x768xbf16>,
    %c0_9 = arith.constant 0 : index
    %c0_10 = arith.constant 0 : index
    %10 = vector.load %arg5[%c0_9, %c0_10] : memref<128x384xbf16, #tpu.memory_space<vmem>>, vector<128x384xbf16>
    %c0_11 = arith.constant 0 : index
    %c0_12 = arith.constant 0 : index
    %11 = vector.load %arg7[%c0_11, %c0_12] : memref<128x384xbf16, #tpu.memory_space<vmem>>, vector<128x384xbf16>
    %c0_13 = arith.constant 0 : index
    %c0_14 = arith.constant 0 : index
    %12 = vector.load %arg6[%c0_13, %c0_14] : memref<1x128xf32, #tpu.memory_space<vmem>>, vector<1x128xf32>
    %c0_15 = arith.constant 0 : index
    %c0_16 = arith.constant 0 : index
    %13 = vector.load %arg8[%c0_15, %c0_16] : memref<1x128xf32, #tpu.memory_space<vmem>>, vector<1x128xf32>
    %c0_17 = arith.constant 0 : index
    %c0_18 = arith.constant 0 : index
    %14 = vector.load %arg2[%c0_17, %c0_18] : memref<16x128xi32, #tpu.memory_space<vmem>>, vector<16x128xi32>
    %cst_19 = arith.constant 0.000000e+00 : f32
    %15 = vector.broadcast %cst_19 : f32 to vector<16x128xf32>
    %cst_20 = arith.constant 0.000000e+00 : f32
    %16 = vector.broadcast %cst_20 : f32 to vector<16x128xf32>
    %c0_21 = arith.constant 0 : index
    %c0_22 = arith.constant 0 : index
    %c0_23 = arith.constant 0 : index
    %17 = vector.load %arg11[%c0_21, %c0_22, %c0_23] : memref<8x16x768xbf16, #tpu.memory_space<vmem>>, vector<1x16x384xbf16>
    %18 = vector.shape_cast %17 : vector<1x16x384xbf16> to vector<16x384xbf16>
    %19 = arith.truncf %15 : vector<16x128xf32> to vector<16x128xbf16>
    %cst_24 = arith.constant dense<0.000000e+00> : vector<16x384xf32>
    %20 = tpu.matmul %19, %10, %cst_24 {dimension_numbers = #tpu.dot_dimension_numbers<[1], [0], [0], [1], [0, 0, 1, 1], [], []>} : vector<16x128xbf16>, vector<128x384xbf16>, vector<16x384xf32> -> vector<16x384xf32>
    %21 = vector.extract_strided_slice %18 {offsets = [0, 0], sizes = [16, 128], strides = [1, 1]} : vector<16x384xbf16> to vector<16x128xbf16>
    %22 = vector.extract_strided_slice %20 {offsets = [0, 0], sizes = [16, 128], strides = [1, 1]} : vector<16x384xf32> to vector<16x128xf32>
    %23 = arith.extf %21 : vector<16x128xbf16> to vector<16x128xf32>
    %24 = arith.addf %23, %22 : vector<16x128xf32>
    %25 = arith.negf %24 : vector<16x128xf32>
    %26 = math.exp %25 : vector<16x128xf32>
    %cst_25 = arith.constant 1.000000e+00 : f32
    %27 = vector.broadcast %cst_25 : f32 to vector<16x128xf32>
    %28 = arith.addf %27, %26 : vector<16x128xf32>
    %29 = arith.divf %27, %28 : vector<16x128xf32>
    %30 = vector.extract_strided_slice %18 {offsets = [0, 128], sizes = [16, 128], strides = [1, 1]} : vector<16x384xbf16> to vector<16x128xbf16>
    %31 = vector.extract_strided_slice %20 {offsets = [0, 128], sizes = [16, 128], strides = [1, 1]} : vector<16x384xf32> to vector<16x128xf32>
    %32 = arith.extf %30 : vector<16x128xbf16> to vector<16x128xf32>
    %33 = arith.addf %32, %31 : vector<16x128xf32>
    %34 = arith.negf %33 : vector<16x128xf32>
    %35 = math.exp %34 : vector<16x128xf32>
    %cst_26 = arith.constant 1.000000e+00 : f32
    %36 = vector.broadcast %cst_26 : f32 to vector<16x128xf32>
    %37 = arith.addf %36, %35 : vector<16x128xf32>
    %38 = arith.divf %36, %37 : vector<16x128xf32>
    %39 = vector.extract_strided_slice %18 {offsets = [0, 256], sizes = [16, 128], strides = [1, 1]} : vector<16x384xbf16> to vector<16x128xbf16>
    %40 = vector.extract_strided_slice %20 {offsets = [0, 256], sizes = [16, 128], strides = [1, 1]} : vector<16x384xf32> to vector<16x128xf32>
    %41 = vector.broadcast %12 : vector<1x128xf32> to vector<16x128xf32>
    %42 = arith.addf %40, %41 : vector<16x128xf32>
    %43 = arith.mulf %29, %42 : vector<16x128xf32>
    %44 = arith.extf %39 : vector<16x128xbf16> to vector<16x128xf32>
    %45 = arith.addf %44, %43 : vector<16x128xf32>
    %46 = math.tanh %45 : vector<16x128xf32>
    %cst_27 = arith.constant 1.000000e+00 : f32
    %47 = vector.broadcast %cst_27 : f32 to vector<16x128xf32>
    %48 = arith.subf %47, %38 : vector<16x128xf32>
    %49 = arith.mulf %48, %46 : vector<16x128xf32>
    %50 = arith.mulf %38, %15 : vector<16x128xf32>
    %51 = arith.addf %49, %50 : vector<16x128xf32>
    %c7 = arith.constant 7 : index
    %c0_28 = arith.constant 0 : index
    %c384 = arith.constant 384 : index
    %52 = vector.load %arg11[%c7, %c0_28, %c384] : memref<8x16x768xbf16, #tpu.memory_space<vmem>>, vector<1x16x384xbf16>
    %53 = vector.shape_cast %52 : vector<1x16x384xbf16> to vector<16x384xbf16>
    %54 = arith.truncf %16 : vector<16x128xf32> to vector<16x128xbf16>
    %cst_29 = arith.constant dense<0.000000e+00> : vector<16x384xf32>
    %55 = tpu.matmul %54, %11, %cst_29 {dimension_numbers = #tpu.dot_dimension_numbers<[1], [0], [0], [1], [0, 0, 1, 1], [], []>} : vector<16x128xbf16>, vector<128x384xbf16>, vector<16x384xf32> -> vector<16x384xf32>
    %56 = vector.extract_strided_slice %53 {offsets = [0, 0], sizes = [16, 128], strides = [1, 1]} : vector<16x384xbf16> to vector<16x128xbf16>
    %57 = vector.extract_strided_slice %55 {offsets = [0, 0], sizes = [16, 128], strides = [1, 1]} : vector<16x384xf32> to vector<16x128xf32>
    %58 = arith.extf %56 : vector<16x128xbf16> to vector<16x128xf32>
    %59 = arith.addf %58, %57 : vector<16x128xf32>
    %60 = arith.negf %59 : vector<16x128xf32>
    %61 = math.exp %60 : vector<16x128xf32>
    %cst_30 = arith.constant 1.000000e+00 : f32
    %62 = vector.broadcast %cst_30 : f32 to vector<16x128xf32>
    %63 = arith.addf %62, %61 : vector<16x128xf32>
    %64 = arith.divf %62, %63 : vector<16x128xf32>
    %65 = vector.extract_strided_slice %53 {offsets = [0, 128], sizes = [16, 128], strides = [1, 1]} : vector<16x384xbf16> to vector<16x128xbf16>
    %66 = vector.extract_strided_slice %55 {offsets = [0, 128], sizes = [16, 128], strides = [1, 1]} : vector<16x384xf32> to vector<16x128xf32>
    %67 = arith.extf %65 : vector<16x128xbf16> to vector<16x128xf32>
    %68 = arith.addf %67, %66 : vector<16x128xf32>
    %69 = arith.negf %68 : vector<16x128xf32>
    %70 = math.exp %69 : vector<16x128xf32>
    %cst_31 = arith.constant 1.000000e+00 : f32
    %71 = vector.broadcast %cst_31 : f32 to vector<16x128xf32>
    %72 = arith.addf %71, %70 : vector<16x128xf32>
    %73 = arith.divf %71, %72 : vector<16x128xf32>
    %74 = vector.extract_strided_slice %53 {offsets = [0, 256], sizes = [16, 128], strides = [1, 1]} : vector<16x384xbf16> to vector<16x128xbf16>
    %75 = vector.extract_strided_slice %55 {offsets = [0, 256], sizes = [16, 128], strides = [1, 1]} : vector<16x384xf32> to vector<16x128xf32>
    %76 = vector.broadcast %13 : vector<1x128xf32> to vector<16x128xf32>
    %77 = arith.addf %75, %76 : vector<16x128xf32>
    %78 = arith.mulf %64, %77 : vector<16x128xf32>
    %79 = arith.extf %74 : vector<16x128xbf16> to vector<16x128xf32>
    %80 = arith.addf %79, %78 : vector<16x128xf32>
    %81 = math.tanh %80 : vector<16x128xf32>
    %cst_32 = arith.constant 1.000000e+00 : f32
    %82 = vector.broadcast %cst_32 : f32 to vector<16x128xf32>
    %83 = arith.subf %82, %73 : vector<16x128xf32>
    %84 = arith.mulf %83, %81 : vector<16x128xf32>
    %85 = arith.mulf %73, %16 : vector<16x128xf32>
    %86 = arith.addf %84, %85 : vector<16x128xf32>
    %c0_i32 = arith.constant 0 : i32
    %87 = vector.broadcast %c0_i32 : i32 to vector<16x128xi32>
    %88 = arith.cmpi sgt, %14, %87 : vector<16x128xi32>
    %c7_i32 = arith.constant 7 : i32
    %89 = vector.broadcast %c7_i32 : i32 to vector<16x128xi32>
    %90 = arith.cmpi sgt, %14, %89 : vector<16x128xi32>
    %91 = arith.select %88, %51, %15 : vector<16x128xi1>, vector<16x128xf32>
    %92 = arith.select %90, %86, %16 : vector<16x128xi1>, vector<16x128xf32>
    %cst_33 = arith.constant 0.000000e+00 : f32
    %93 = vector.broadcast %cst_33 : f32 to vector<16x128xf32>
    %94 = arith.select %88, %51, %93 : vector<16x128xi1>, vector<16x128xf32>
    %c0_34 = arith.constant 0 : index
    %c0_35 = arith.constant 0 : index
    %c0_36 = arith.constant 0 : index
    %95 = vector.load %arg9[%c0_34, %c0_35, %c0_36] : memref<8x16x256xf32, #tpu.memory_space<vmem>>, vector<1x16x128xf32>
    %96 = vector.shape_cast %95 : vector<1x16x128xf32> to vector<16x128xf32>
    %97 = vector.shape_cast %94 : vector<16x128xf32> to vector<1x16x128xf32>
    tpu.vector_store %arg9[%c0_34, %c0_35, %c0_36], %97 {strides = array<i32>} : memref<8x16x256xf32, #tpu.memory_space<vmem>>, vector<1x16x128xf32>,
    %cst_37 = arith.constant 0.000000e+00 : f32
    %98 = vector.broadcast %cst_37 : f32 to vector<16x128xf32>
    %99 = arith.select %90, %86, %98 : vector<16x128xi1>, vector<16x128xf32>
    %c7_38 = arith.constant 7 : index
    %c0_39 = arith.constant 0 : index
    %c128 = arith.constant 128 : index
    %100 = vector.load %arg9[%c7_38, %c0_39, %c128] : memref<8x16x256xf32, #tpu.memory_space<vmem>>, vector<1x16x128xf32>
    %101 = vector.shape_cast %100 : vector<1x16x128xf32> to vector<16x128xf32>
    %102 = vector.shape_cast %99 : vector<16x128xf32> to vector<1x16x128xf32>
    tpu.vector_store %arg9[%c7_38, %c0_39, %c128], %102 {strides = array<i32>} : memref<8x16x256xf32, #tpu.memory_space<vmem>>, vector<1x16x128xf32>,
    %c1 = arith.constant 1 : index
    %c0_40 = arith.constant 0 : index
    %c0_41 = arith.constant 0 : index
    %103 = vector.load %arg11[%c1, %c0_40, %c0_41] : memref<8x16x768xbf16, #tpu.memory_space<vmem>>, vector<1x16x384xbf16>
    %104 = vector.shape_cast %103 : vector<1x16x384xbf16> to vector<16x384xbf16>
    %105 = arith.truncf %91 : vector<16x128xf32> to vector<16x128xbf16>
    %cst_42 = arith.constant dense<0.000000e+00> : vector<16x384xf32>
    %106 = tpu.matmul %105, %10, %cst_42 {dimension_numbers = #tpu.dot_dimension_numbers<[1], [0], [0], [1], [0, 0, 1, 1], [], []>} : vector<16x128xbf16>, vector<128x384xbf16>, vector<16x384xf32> -> vector<16x384xf32>
    %107 = vector.extract_strided_slice %104 {offsets = [0, 0], sizes = [16, 128], strides = [1, 1]} : vector<16x384xbf16> to vector<16x128xbf16>
    %108 = vector.extract_strided_slice %106 {offsets = [0, 0], sizes = [16, 128], strides = [1, 1]} : vector<16x384xf32> to vector<16x128xf32>
    %109 = arith.extf %107 : vector<16x128xbf16> to vector<16x128xf32>
    %110 = arith.addf %109, %108 : vector<16x128xf32>
    %111 = arith.negf %110 : vector<16x128xf32>
    %112 = math.exp %111 : vector<16x128xf32>
    %cst_43 = arith.constant 1.000000e+00 : f32
    %113 = vector.broadcast %cst_43 : f32 to vector<16x128xf32>
    %114 = arith.addf %113, %112 : vector<16x128xf32>
    %115 = arith.divf %113, %114 : vector<16x128xf32>
    %116 = vector.extract_strided_slice %104 {offsets = [0, 128], sizes = [16, 128], strides = [1, 1]} : vector<16x384xbf16> to vector<16x128xbf16>
    %117 = vector.extract_strided_slice %106 {offsets = [0, 128], sizes = [16, 128], strides = [1, 1]} : vector<16x384xf32> to vector<16x128xf32>
    %118 = arith.extf %116 : vector<16x128xbf16> to vector<16x128xf32>
    %119 = arith.addf %118, %117 : vector<16x128xf32>
    %120 = arith.negf %119 : vector<16x128xf32>
    %121 = math.exp %120 : vector<16x128xf32>
    %cst_44 = arith.constant 1.000000e+00 : f32
    %122 = vector.broadcast %cst_44 : f32 to vector<16x128xf32>
    %123 = arith.addf %122, %121 : vector<16x128xf32>
    %124 = arith.divf %122, %123 : vector<16x128xf32>
    %125 = vector.extract_strided_slice %104 {offsets = [0, 256], sizes = [16, 128], strides = [1, 1]} : vector<16x384xbf16> to vector<16x128xbf16>
    %126 = vector.extract_strided_slice %106 {offsets = [0, 256], sizes = [16, 128], strides = [1, 1]} : vector<16x384xf32> to vector<16x128xf32>
    %127 = vector.broadcast %12 : vector<1x128xf32> to vector<16x128xf32>
    %128 = arith.addf %126, %127 : vector<16x128xf32>
    %129 = arith.mulf %115, %128 : vector<16x128xf32>
    %130 = arith.extf %125 : vector<16x128xbf16> to vector<16x128xf32>
    %131 = arith.addf %130, %129 : vector<16x128xf32>
    %132 = math.tanh %131 : vector<16x128xf32>
    %cst_45 = arith.constant 1.000000e+00 : f32
    %133 = vector.broadcast %cst_45 : f32 to vector<16x128xf32>
    %134 = arith.subf %133, %124 : vector<16x128xf32>
    %135 = arith.mulf %134, %132 : vector<16x128xf32>
    %136 = arith.mulf %124, %91 : vector<16x128xf32>
    %137 = arith.addf %135, %136 : vector<16x128xf32>
    %c6 = arith.constant 6 : index
    %c0_46 = arith.constant 0 : index
    %c384_47 = arith.constant 384 : index
    %138 = vector.load %arg11[%c6, %c0_46, %c384_47] : memref<8x16x768xbf16, #tpu.memory_space<vmem>>, vector<1x16x384xbf16>
    %139 = vector.shape_cast %138 : vector<1x16x384xbf16> to vector<16x384xbf16>
    %140 = arith.truncf %92 : vector<16x128xf32> to vector<16x128xbf16>
    %cst_48 = arith.constant dense<0.000000e+00> : vector<16x384xf32>
    %141 = tpu.matmul %140, %11, %cst_48 {dimension_numbers = #tpu.dot_dimension_numbers<[1], [0], [0], [1], [0, 0, 1, 1], [], []>} : vector<16x128xbf16>, vector<128x384xbf16>, vector<16x384xf32> -> vector<16x384xf32>
    %142 = vector.extract_strided_slice %139 {offsets = [0, 0], sizes = [16, 128], strides = [1, 1]} : vector<16x384xbf16> to vector<16x128xbf16>
    %143 = vector.extract_strided_slice %141 {offsets = [0, 0], sizes = [16, 128], strides = [1, 1]} : vector<16x384xf32> to vector<16x128xf32>
    %144 = arith.extf %142 : vector<16x128xbf16> to vector<16x128xf32>
    %145 = arith.addf %144, %143 : vector<16x128xf32>
    %146 = arith.negf %145 : vector<16x128xf32>
    %147 = math.exp %146 : vector<16x128xf32>
    %cst_49 = arith.constant 1.000000e+00 : f32
    %148 = vector.broadcast %cst_49 : f32 to vector<16x128xf32>
    %149 = arith.addf %148, %147 : vector<16x128xf32>
    %150 = arith.divf %148, %149 : vector<16x128xf32>
    %151 = vector.extract_strided_slice %139 {offsets = [0, 128], sizes = [16, 128], strides = [1, 1]} : vector<16x384xbf16> to vector<16x128xbf16>
    %152 = vector.extract_strided_slice %141 {offsets = [0, 128], sizes = [16, 128], strides = [1, 1]} : vector<16x384xf32> to vector<16x128xf32>
    %153 = arith.extf %151 : vector<16x128xbf16> to vector<16x128xf32>
    %154 = arith.addf %153, %152 : vector<16x128xf32>
    %155 = arith.negf %154 : vector<16x128xf32>
    %156 = math.exp %155 : vector<16x128xf32>
    %cst_50 = arith.constant 1.000000e+00 : f32
    %157 = vector.broadcast %cst_50 : f32 to vector<16x128xf32>
    %158 = arith.addf %157, %156 : vector<16x128xf32>
    %159 = arith.divf %157, %158 : vector<16x128xf32>
    %160 = vector.extract_strided_slice %139 {offsets = [0, 256], sizes = [16, 128], strides = [1, 1]} : vector<16x384xbf16> to vector<16x128xbf16>
    %161 = vector.extract_strided_slice %141 {offsets = [0, 256], sizes = [16, 128], strides = [1, 1]} : vector<16x384xf32> to vector<16x128xf32>
    %162 = vector.broadcast %13 : vector<1x128xf32> to vector<16x128xf32>
    %163 = arith.addf %161, %162 : vector<16x128xf32>
    %164 = arith.mulf %150, %163 : vector<16x128xf32>
    %165 = arith.extf %160 : vector<16x128xbf16> to vector<16x128xf32>
    %166 = arith.addf %165, %164 : vector<16x128xf32>
    %167 = math.tanh %166 : vector<16x128xf32>
    %cst_51 = arith.constant 1.000000e+00 : f32
    %168 = vector.broadcast %cst_51 : f32 to vector<16x128xf32>
    %169 = arith.subf %168, %159 : vector<16x128xf32>
    %170 = arith.mulf %169, %167 : vector<16x128xf32>
    %171 = arith.mulf %159, %92 : vector<16x128xf32>
    %172 = arith.addf %170, %171 : vector<16x128xf32>
    %c1_i32 = arith.constant 1 : i32
    %173 = vector.broadcast %c1_i32 : i32 to vector<16x128xi32>
    %174 = arith.cmpi sgt, %14, %173 : vector<16x128xi32>
    %c6_i32 = arith.constant 6 : i32
    %175 = vector.broadcast %c6_i32 : i32 to vector<16x128xi32>
    %176 = arith.cmpi sgt, %14, %175 : vector<16x128xi32>
    %177 = arith.select %174, %137, %91 : vector<16x128xi1>, vector<16x128xf32>
    %178 = arith.select %176, %172, %92 : vector<16x128xi1>, vector<16x128xf32>
    %cst_52 = arith.constant 0.000000e+00 : f32
    %179 = vector.broadcast %cst_52 : f32 to vector<16x128xf32>
    %180 = arith.select %174, %137, %179 : vector<16x128xi1>, vector<16x128xf32>
    %c1_53 = arith.constant 1 : index
    %c0_54 = arith.constant 0 : index
    %c0_55 = arith.constant 0 : index
    %181 = vector.load %arg9[%c1_53, %c0_54, %c0_55] : memref<8x16x256xf32, #tpu.memory_space<vmem>>, vector<1x16x128xf32>
    %182 = vector.shape_cast %181 : vector<1x16x128xf32> to vector<16x128xf32>
    %183 = vector.shape_cast %180 : vector<16x128xf32> to vector<1x16x128xf32>
    tpu.vector_store %arg9[%c1_53, %c0_54, %c0_55], %183 {strides = array<i32>} : memref<8x16x256xf32, #tpu.memory_space<vmem>>, vector<1x16x128xf32>,
    %cst_56 = arith.constant 0.000000e+00 : f32
    %184 = vector.broadcast %cst_56 : f32 to vector<16x128xf32>
    %185 = arith.select %176, %172, %184 : vector<16x128xi1>, vector<16x128xf32>
    %c6_57 = arith.constant 6 : index
    %c0_58 = arith.constant 0 : index
    %c128_59 = arith.constant 128 : index
    %186 = vector.load %arg9[%c6_57, %c0_58, %c128_59] : memref<8x16x256xf32, #tpu.memory_space<vmem>>, vector<1x16x128xf32>
    %187 = vector.shape_cast %186 : vector<1x16x128xf32> to vector<16x128xf32>
    %188 = vector.shape_cast %185 : vector<16x128xf32> to vector<1x16x128xf32>
    tpu.vector_store %arg9[%c6_57, %c0_58, %c128_59], %188 {strides = array<i32>} : memref<8x16x256xf32, #tpu.memory_space<vmem>>, vector<1x16x128xf32>,
    %c2 = arith.constant 2 : index
    %c0_60 = arith.constant 0 : index
    %c0_61 = arith.constant 0 : index
    %189 = vector.load %arg11[%c2, %c0_60, %c0_61] : memref<8x16x768xbf16, #tpu.memory_space<vmem>>, vector<1x16x384xbf16>
    %190 = vector.shape_cast %189 : vector<1x16x384xbf16> to vector<16x384xbf16>
    %191 = arith.truncf %177 : vector<16x128xf32> to vector<16x128xbf16>
    %cst_62 = arith.constant dense<0.000000e+00> : vector<16x384xf32>
    %192 = tpu.matmul %191, %10, %cst_62 {dimension_numbers = #tpu.dot_dimension_numbers<[1], [0], [0], [1], [0, 0, 1, 1], [], []>} : vector<16x128xbf16>, vector<128x384xbf16>, vector<16x384xf32> -> vector<16x384xf32>
    %193 = vector.extract_strided_slice %190 {offsets = [0, 0], sizes = [16, 128], strides = [1, 1]} : vector<16x384xbf16> to vector<16x128xbf16>
    %194 = vector.extract_strided_slice %192 {offsets = [0, 0], sizes = [16, 128], strides = [1, 1]} : vector<16x384xf32> to vector<16x128xf32>
    %195 = arith.extf %193 : vector<16x128xbf16> to vector<16x128xf32>
    %196 = arith.addf %195, %194 : vector<16x128xf32>
    %197 = arith.negf %196 : vector<16x128xf32>
    %198 = math.exp %197 : vector<16x128xf32>
    %cst_63 = arith.constant 1.000000e+00 : f32
    %199 = vector.broadcast %cst_63 : f32 to vector<16x128xf32>
    %200 = arith.addf %199, %198 : vector<16x128xf32>
    %201 = arith.divf %199, %200 : vector<16x128xf32>
    %202 = vector.extract_strided_slice %190 {offsets = [0, 128], sizes = [16, 128], strides = [1, 1]} : vector<16x384xbf16> to vector<16x128xbf16>
    %203 = vector.extract_strided_slice %192 {offsets = [0, 128], sizes = [16, 128], strides = [1, 1]} : vector<16x384xf32> to vector<16x128xf32>
    %204 = arith.extf %202 : vector<16x128xbf16> to vector<16x128xf32>
    %205 = arith.addf %204, %203 : vector<16x128xf32>
    %206 = arith.negf %205 : vector<16x128xf32>
    %207 = math.exp %206 : vector<16x128xf32>
    %cst_64 = arith.constant 1.000000e+00 : f32
    %208 = vector.broadcast %cst_64 : f32 to vector<16x128xf32>
    %209 = arith.addf %208, %207 : vector<16x128xf32>
    %210 = arith.divf %208, %209 : vector<16x128xf32>
    %211 = vector.extract_strided_slice %190 {offsets = [0, 256], sizes = [16, 128], strides = [1, 1]} : vector<16x384xbf16> to vector<16x128xbf16>
    %212 = vector.extract_strided_slice %192 {offsets = [0, 256], sizes = [16, 128], strides = [1, 1]} : vector<16x384xf32> to vector<16x128xf32>
    %213 = vector.broadcast %12 : vector<1x128xf32> to vector<16x128xf32>
    %214 = arith.addf %212, %213 : vector<16x128xf32>
    %215 = arith.mulf %201, %214 : vector<16x128xf32>
    %216 = arith.extf %211 : vector<16x128xbf16> to vector<16x128xf32>
    %217 = arith.addf %216, %215 : vector<16x128xf32>
    %218 = math.tanh %217 : vector<16x128xf32>
    %cst_65 = arith.constant 1.000000e+00 : f32
    %219 = vector.broadcast %cst_65 : f32 to vector<16x128xf32>
    %220 = arith.subf %219, %210 : vector<16x128xf32>
    %221 = arith.mulf %220, %218 : vector<16x128xf32>
    %222 = arith.mulf %210, %177 : vector<16x128xf32>
    %223 = arith.addf %221, %222 : vector<16x128xf32>
    %c5 = arith.constant 5 : index
    %c0_66 = arith.constant 0 : index
    %c384_67 = arith.constant 384 : index
    %224 = vector.load %arg11[%c5, %c0_66, %c384_67] : memref<8x16x768xbf16, #tpu.memory_space<vmem>>, vector<1x16x384xbf16>
    %225 = vector.shape_cast %224 : vector<1x16x384xbf16> to vector<16x384xbf16>
    %226 = arith.truncf %178 : vector<16x128xf32> to vector<16x128xbf16>
    %cst_68 = arith.constant dense<0.000000e+00> : vector<16x384xf32>
    %227 = tpu.matmul %226, %11, %cst_68 {dimension_numbers = #tpu.dot_dimension_numbers<[1], [0], [0], [1], [0, 0, 1, 1], [], []>} : vector<16x128xbf16>, vector<128x384xbf16>, vector<16x384xf32> -> vector<16x384xf32>
    %228 = vector.extract_strided_slice %225 {offsets = [0, 0], sizes = [16, 128], strides = [1, 1]} : vector<16x384xbf16> to vector<16x128xbf16>
    %229 = vector.extract_strided_slice %227 {offsets = [0, 0], sizes = [16, 128], strides = [1, 1]} : vector<16x384xf32> to vector<16x128xf32>
    %230 = arith.extf %228 : vector<16x128xbf16> to vector<16x128xf32>
    %231 = arith.addf %230, %229 : vector<16x128xf32>
    %232 = arith.negf %231 : vector<16x128xf32>
    %233 = math.exp %232 : vector<16x128xf32>
    %cst_69 = arith.constant 1.000000e+00 : f32
    %234 = vector.broadcast %cst_69 : f32 to vector<16x128xf32>
    %235 = arith.addf %234, %233 : vector<16x128xf32>
    %236 = arith.divf %234, %235 : vector<16x128xf32>
    %237 = vector.extract_strided_slice %225 {offsets = [0, 128], sizes = [16, 128], strides = [1, 1]} : vector<16x384xbf16> to vector<16x128xbf16>
    %238 = vector.extract_strided_slice %227 {offsets = [0, 128], sizes = [16, 128], strides = [1, 1]} : vector<16x384xf32> to vector<16x128xf32>
    %239 = arith.extf %237 : vector<16x128xbf16> to vector<16x128xf32>
    %240 = arith.addf %239, %238 : vector<16x128xf32>
    %241 = arith.negf %240 : vector<16x128xf32>
    %242 = math.exp %241 : vector<16x128xf32>
    %cst_70 = arith.constant 1.000000e+00 : f32
    %243 = vector.broadcast %cst_70 : f32 to vector<16x128xf32>
    %244 = arith.addf %243, %242 : vector<16x128xf32>
    %245 = arith.divf %243, %244 : vector<16x128xf32>
    %246 = vector.extract_strided_slice %225 {offsets = [0, 256], sizes = [16, 128], strides = [1, 1]} : vector<16x384xbf16> to vector<16x128xbf16>
    %247 = vector.extract_strided_slice %227 {offsets = [0, 256], sizes = [16, 128], strides = [1, 1]} : vector<16x384xf32> to vector<16x128xf32>
    %248 = vector.broadcast %13 : vector<1x128xf32> to vector<16x128xf32>
    %249 = arith.addf %247, %248 : vector<16x128xf32>
    %250 = arith.mulf %236, %249 : vector<16x128xf32>
    %251 = arith.extf %246 : vector<16x128xbf16> to vector<16x128xf32>
    %252 = arith.addf %251, %250 : vector<16x128xf32>
    %253 = math.tanh %252 : vector<16x128xf32>
    %cst_71 = arith.constant 1.000000e+00 : f32
    %254 = vector.broadcast %cst_71 : f32 to vector<16x128xf32>
    %255 = arith.subf %254, %245 : vector<16x128xf32>
    %256 = arith.mulf %255, %253 : vector<16x128xf32>
    %257 = arith.mulf %245, %178 : vector<16x128xf32>
    %258 = arith.addf %256, %257 : vector<16x128xf32>
    %c2_i32 = arith.constant 2 : i32
    %259 = vector.broadcast %c2_i32 : i32 to vector<16x128xi32>
    %260 = arith.cmpi sgt, %14, %259 : vector<16x128xi32>
    %c5_i32 = arith.constant 5 : i32
    %261 = vector.broadcast %c5_i32 : i32 to vector<16x128xi32>
    %262 = arith.cmpi sgt, %14, %261 : vector<16x128xi32>
    %263 = arith.select %260, %223, %177 : vector<16x128xi1>, vector<16x128xf32>
    %264 = arith.select %262, %258, %178 : vector<16x128xi1>, vector<16x128xf32>
    %cst_72 = arith.constant 0.000000e+00 : f32
    %265 = vector.broadcast %cst_72 : f32 to vector<16x128xf32>
    %266 = arith.select %260, %223, %265 : vector<16x128xi1>, vector<16x128xf32>
    %c2_73 = arith.constant 2 : index
    %c0_74 = arith.constant 0 : index
    %c0_75 = arith.constant 0 : index
    %267 = vector.load %arg9[%c2_73, %c0_74, %c0_75] : memref<8x16x256xf32, #tpu.memory_space<vmem>>, vector<1x16x128xf32>
    %268 = vector.shape_cast %267 : vector<1x16x128xf32> to vector<16x128xf32>
    %269 = vector.shape_cast %266 : vector<16x128xf32> to vector<1x16x128xf32>
    tpu.vector_store %arg9[%c2_73, %c0_74, %c0_75], %269 {strides = array<i32>} : memref<8x16x256xf32, #tpu.memory_space<vmem>>, vector<1x16x128xf32>,
    %cst_76 = arith.constant 0.000000e+00 : f32
    %270 = vector.broadcast %cst_76 : f32 to vector<16x128xf32>
    %271 = arith.select %262, %258, %270 : vector<16x128xi1>, vector<16x128xf32>
    %c5_77 = arith.constant 5 : index
    %c0_78 = arith.constant 0 : index
    %c128_79 = arith.constant 128 : index
    %272 = vector.load %arg9[%c5_77, %c0_78, %c128_79] : memref<8x16x256xf32, #tpu.memory_space<vmem>>, vector<1x16x128xf32>
    %273 = vector.shape_cast %272 : vector<1x16x128xf32> to vector<16x128xf32>
    %274 = vector.shape_cast %271 : vector<16x128xf32> to vector<1x16x128xf32>
    tpu.vector_store %arg9[%c5_77, %c0_78, %c128_79], %274 {strides = array<i32>} : memref<8x16x256xf32, #tpu.memory_space<vmem>>, vector<1x16x128xf32>,
    %c3 = arith.constant 3 : index
    %c0_80 = arith.constant 0 : index
    %c0_81 = arith.constant 0 : index
    %275 = vector.load %arg11[%c3, %c0_80, %c0_81] : memref<8x16x768xbf16, #tpu.memory_space<vmem>>, vector<1x16x384xbf16>
    %276 = vector.shape_cast %275 : vector<1x16x384xbf16> to vector<16x384xbf16>
    %277 = arith.truncf %263 : vector<16x128xf32> to vector<16x128xbf16>
    %cst_82 = arith.constant dense<0.000000e+00> : vector<16x384xf32>
    %278 = tpu.matmul %277, %10, %cst_82 {dimension_numbers = #tpu.dot_dimension_numbers<[1], [0], [0], [1], [0, 0, 1, 1], [], []>} : vector<16x128xbf16>, vector<128x384xbf16>, vector<16x384xf32> -> vector<16x384xf32>
    %279 = vector.extract_strided_slice %276 {offsets = [0, 0], sizes = [16, 128], strides = [1, 1]} : vector<16x384xbf16> to vector<16x128xbf16>
    %280 = vector.extract_strided_slice %278 {offsets = [0, 0], sizes = [16, 128], strides = [1, 1]} : vector<16x384xf32> to vector<16x128xf32>
    %281 = arith.extf %279 : vector<16x128xbf16> to vector<16x128xf32>
    %282 = arith.addf %281, %280 : vector<16x128xf32>
    %283 = arith.negf %282 : vector<16x128xf32>
    %284 = math.exp %283 : vector<16x128xf32>
    %cst_83 = arith.constant 1.000000e+00 : f32
    %285 = vector.broadcast %cst_83 : f32 to vector<16x128xf32>
    %286 = arith.addf %285, %284 : vector<16x128xf32>
    %287 = arith.divf %285, %286 : vector<16x128xf32>
    %288 = vector.extract_strided_slice %276 {offsets = [0, 128], sizes = [16, 128], strides = [1, 1]} : vector<16x384xbf16> to vector<16x128xbf16>
    %289 = vector.extract_strided_slice %278 {offsets = [0, 128], sizes = [16, 128], strides = [1, 1]} : vector<16x384xf32> to vector<16x128xf32>
    %290 = arith.extf %288 : vector<16x128xbf16> to vector<16x128xf32>
    %291 = arith.addf %290, %289 : vector<16x128xf32>
    %292 = arith.negf %291 : vector<16x128xf32>
    %293 = math.exp %292 : vector<16x128xf32>
    %cst_84 = arith.constant 1.000000e+00 : f32
    %294 = vector.broadcast %cst_84 : f32 to vector<16x128xf32>
    %295 = arith.addf %294, %293 : vector<16x128xf32>
    %296 = arith.divf %294, %295 : vector<16x128xf32>
    %297 = vector.extract_strided_slice %276 {offsets = [0, 256], sizes = [16, 128], strides = [1, 1]} : vector<16x384xbf16> to vector<16x128xbf16>
    %298 = vector.extract_strided_slice %278 {offsets = [0, 256], sizes = [16, 128], strides = [1, 1]} : vector<16x384xf32> to vector<16x128xf32>
    %299 = vector.broadcast %12 : vector<1x128xf32> to vector<16x128xf32>
    %300 = arith.addf %298, %299 : vector<16x128xf32>
    %301 = arith.mulf %287, %300 : vector<16x128xf32>
    %302 = arith.extf %297 : vector<16x128xbf16> to vector<16x128xf32>
    %303 = arith.addf %302, %301 : vector<16x128xf32>
    %304 = math.tanh %303 : vector<16x128xf32>
    %cst_85 = arith.constant 1.000000e+00 : f32
    %305 = vector.broadcast %cst_85 : f32 to vector<16x128xf32>
    %306 = arith.subf %305, %296 : vector<16x128xf32>
    %307 = arith.mulf %306, %304 : vector<16x128xf32>
    %308 = arith.mulf %296, %263 : vector<16x128xf32>
    %309 = arith.addf %307, %308 : vector<16x128xf32>
    %c4 = arith.constant 4 : index
    %c0_86 = arith.constant 0 : index
    %c384_87 = arith.constant 384 : index
    %310 = vector.load %arg11[%c4, %c0_86, %c384_87] : memref<8x16x768xbf16, #tpu.memory_space<vmem>>, vector<1x16x384xbf16>
    %311 = vector.shape_cast %310 : vector<1x16x384xbf16> to vector<16x384xbf16>
    %312 = arith.truncf %264 : vector<16x128xf32> to vector<16x128xbf16>
    %cst_88 = arith.constant dense<0.000000e+00> : vector<16x384xf32>
    %313 = tpu.matmul %312, %11, %cst_88 {dimension_numbers = #tpu.dot_dimension_numbers<[1], [0], [0], [1], [0, 0, 1, 1], [], []>} : vector<16x128xbf16>, vector<128x384xbf16>, vector<16x384xf32> -> vector<16x384xf32>
    %314 = vector.extract_strided_slice %311 {offsets = [0, 0], sizes = [16, 128], strides = [1, 1]} : vector<16x384xbf16> to vector<16x128xbf16>
    %315 = vector.extract_strided_slice %313 {offsets = [0, 0], sizes = [16, 128], strides = [1, 1]} : vector<16x384xf32> to vector<16x128xf32>
    %316 = arith.extf %314 : vector<16x128xbf16> to vector<16x128xf32>
    %317 = arith.addf %316, %315 : vector<16x128xf32>
    %318 = arith.negf %317 : vector<16x128xf32>
    %319 = math.exp %318 : vector<16x128xf32>
    %cst_89 = arith.constant 1.000000e+00 : f32
    %320 = vector.broadcast %cst_89 : f32 to vector<16x128xf32>
    %321 = arith.addf %320, %319 : vector<16x128xf32>
    %322 = arith.divf %320, %321 : vector<16x128xf32>
    %323 = vector.extract_strided_slice %311 {offsets = [0, 128], sizes = [16, 128], strides = [1, 1]} : vector<16x384xbf16> to vector<16x128xbf16>
    %324 = vector.extract_strided_slice %313 {offsets = [0, 128], sizes = [16, 128], strides = [1, 1]} : vector<16x384xf32> to vector<16x128xf32>
    %325 = arith.extf %323 : vector<16x128xbf16> to vector<16x128xf32>
    %326 = arith.addf %325, %324 : vector<16x128xf32>
    %327 = arith.negf %326 : vector<16x128xf32>
    %328 = math.exp %327 : vector<16x128xf32>
    %cst_90 = arith.constant 1.000000e+00 : f32
    %329 = vector.broadcast %cst_90 : f32 to vector<16x128xf32>
    %330 = arith.addf %329, %328 : vector<16x128xf32>
    %331 = arith.divf %329, %330 : vector<16x128xf32>
    %332 = vector.extract_strided_slice %311 {offsets = [0, 256], sizes = [16, 128], strides = [1, 1]} : vector<16x384xbf16> to vector<16x128xbf16>
    %333 = vector.extract_strided_slice %313 {offsets = [0, 256], sizes = [16, 128], strides = [1, 1]} : vector<16x384xf32> to vector<16x128xf32>
    %334 = vector.broadcast %13 : vector<1x128xf32> to vector<16x128xf32>
    %335 = arith.addf %333, %334 : vector<16x128xf32>
    %336 = arith.mulf %322, %335 : vector<16x128xf32>
    %337 = arith.extf %332 : vector<16x128xbf16> to vector<16x128xf32>
    %338 = arith.addf %337, %336 : vector<16x128xf32>
    %339 = math.tanh %338 : vector<16x128xf32>
    %cst_91 = arith.constant 1.000000e+00 : f32
    %340 = vector.broadcast %cst_91 : f32 to vector<16x128xf32>
    %341 = arith.subf %340, %331 : vector<16x128xf32>
    %342 = arith.mulf %341, %339 : vector<16x128xf32>
    %343 = arith.mulf %331, %264 : vector<16x128xf32>
    %344 = arith.addf %342, %343 : vector<16x128xf32>
    %c3_i32 = arith.constant 3 : i32
    %345 = vector.broadcast %c3_i32 : i32 to vector<16x128xi32>
    %346 = arith.cmpi sgt, %14, %345 : vector<16x128xi32>
    %c4_i32 = arith.constant 4 : i32
    %347 = vector.broadcast %c4_i32 : i32 to vector<16x128xi32>
    %348 = arith.cmpi sgt, %14, %347 : vector<16x128xi32>
    %349 = arith.select %346, %309, %263 : vector<16x128xi1>, vector<16x128xf32>
    %350 = arith.select %348, %344, %264 : vector<16x128xi1>, vector<16x128xf32>
    %cst_92 = arith.constant 0.000000e+00 : f32
    %351 = vector.broadcast %cst_92 : f32 to vector<16x128xf32>
    %352 = arith.select %346, %309, %351 : vector<16x128xi1>, vector<16x128xf32>
    %c3_93 = arith.constant 3 : index
    %c0_94 = arith.constant 0 : index
    %c0_95 = arith.constant 0 : index
    %353 = vector.load %arg9[%c3_93, %c0_94, %c0_95] : memref<8x16x256xf32, #tpu.memory_space<vmem>>, vector<1x16x128xf32>
    %354 = vector.shape_cast %353 : vector<1x16x128xf32> to vector<16x128xf32>
    %355 = vector.shape_cast %352 : vector<16x128xf32> to vector<1x16x128xf32>
    tpu.vector_store %arg9[%c3_93, %c0_94, %c0_95], %355 {strides = array<i32>} : memref<8x16x256xf32, #tpu.memory_space<vmem>>, vector<1x16x128xf32>,
    %cst_96 = arith.constant 0.000000e+00 : f32
    %356 = vector.broadcast %cst_96 : f32 to vector<16x128xf32>
    %357 = arith.select %348, %344, %356 : vector<16x128xi1>, vector<16x128xf32>
    %c4_97 = arith.constant 4 : index
    %c0_98 = arith.constant 0 : index
    %c128_99 = arith.constant 128 : index
    %358 = vector.load %arg9[%c4_97, %c0_98, %c128_99] : memref<8x16x256xf32, #tpu.memory_space<vmem>>, vector<1x16x128xf32>
    %359 = vector.shape_cast %358 : vector<1x16x128xf32> to vector<16x128xf32>
    %360 = vector.shape_cast %357 : vector<16x128xf32> to vector<1x16x128xf32>
    tpu.vector_store %arg9[%c4_97, %c0_98, %c128_99], %360 {strides = array<i32>} : memref<8x16x256xf32, #tpu.memory_space<vmem>>, vector<1x16x128xf32>,
    %c4_100 = arith.constant 4 : index
    %c0_101 = arith.constant 0 : index
    %c0_102 = arith.constant 0 : index
    %361 = vector.load %arg11[%c4_100, %c0_101, %c0_102] : memref<8x16x768xbf16, #tpu.memory_space<vmem>>, vector<1x16x384xbf16>
    %362 = vector.shape_cast %361 : vector<1x16x384xbf16> to vector<16x384xbf16>
    %363 = arith.truncf %349 : vector<16x128xf32> to vector<16x128xbf16>
    %cst_103 = arith.constant dense<0.000000e+00> : vector<16x384xf32>
    %364 = tpu.matmul %363, %10, %cst_103 {dimension_numbers = #tpu.dot_dimension_numbers<[1], [0], [0], [1], [0, 0, 1, 1], [], []>} : vector<16x128xbf16>, vector<128x384xbf16>, vector<16x384xf32> -> vector<16x384xf32>
    %365 = vector.extract_strided_slice %362 {offsets = [0, 0], sizes = [16, 128], strides = [1, 1]} : vector<16x384xbf16> to vector<16x128xbf16>
    %366 = vector.extract_strided_slice %364 {offsets = [0, 0], sizes = [16, 128], strides = [1, 1]} : vector<16x384xf32> to vector<16x128xf32>
    %367 = arith.extf %365 : vector<16x128xbf16> to vector<16x128xf32>
    %368 = arith.addf %367, %366 : vector<16x128xf32>
    %369 = arith.negf %368 : vector<16x128xf32>
    %370 = math.exp %369 : vector<16x128xf32>
    %cst_104 = arith.constant 1.000000e+00 : f32
    %371 = vector.broadcast %cst_104 : f32 to vector<16x128xf32>
    %372 = arith.addf %371, %370 : vector<16x128xf32>
    %373 = arith.divf %371, %372 : vector<16x128xf32>
    %374 = vector.extract_strided_slice %362 {offsets = [0, 128], sizes = [16, 128], strides = [1, 1]} : vector<16x384xbf16> to vector<16x128xbf16>
    %375 = vector.extract_strided_slice %364 {offsets = [0, 128], sizes = [16, 128], strides = [1, 1]} : vector<16x384xf32> to vector<16x128xf32>
    %376 = arith.extf %374 : vector<16x128xbf16> to vector<16x128xf32>
    %377 = arith.addf %376, %375 : vector<16x128xf32>
    %378 = arith.negf %377 : vector<16x128xf32>
    %379 = math.exp %378 : vector<16x128xf32>
    %cst_105 = arith.constant 1.000000e+00 : f32
    %380 = vector.broadcast %cst_105 : f32 to vector<16x128xf32>
    %381 = arith.addf %380, %379 : vector<16x128xf32>
    %382 = arith.divf %380, %381 : vector<16x128xf32>
    %383 = vector.extract_strided_slice %362 {offsets = [0, 256], sizes = [16, 128], strides = [1, 1]} : vector<16x384xbf16> to vector<16x128xbf16>
    %384 = vector.extract_strided_slice %364 {offsets = [0, 256], sizes = [16, 128], strides = [1, 1]} : vector<16x384xf32> to vector<16x128xf32>
    %385 = vector.broadcast %12 : vector<1x128xf32> to vector<16x128xf32>
    %386 = arith.addf %384, %385 : vector<16x128xf32>
    %387 = arith.mulf %373, %386 : vector<16x128xf32>
    %388 = arith.extf %383 : vector<16x128xbf16> to vector<16x128xf32>
    %389 = arith.addf %388, %387 : vector<16x128xf32>
    %390 = math.tanh %389 : vector<16x128xf32>
    %cst_106 = arith.constant 1.000000e+00 : f32
    %391 = vector.broadcast %cst_106 : f32 to vector<16x128xf32>
    %392 = arith.subf %391, %382 : vector<16x128xf32>
    %393 = arith.mulf %392, %390 : vector<16x128xf32>
    %394 = arith.mulf %382, %349 : vector<16x128xf32>
    %395 = arith.addf %393, %394 : vector<16x128xf32>
    %c3_107 = arith.constant 3 : index
    %c0_108 = arith.constant 0 : index
    %c384_109 = arith.constant 384 : index
    %396 = vector.load %arg11[%c3_107, %c0_108, %c384_109] : memref<8x16x768xbf16, #tpu.memory_space<vmem>>, vector<1x16x384xbf16>
    %397 = vector.shape_cast %396 : vector<1x16x384xbf16> to vector<16x384xbf16>
    %398 = arith.truncf %350 : vector<16x128xf32> to vector<16x128xbf16>
    %cst_110 = arith.constant dense<0.000000e+00> : vector<16x384xf32>
    %399 = tpu.matmul %398, %11, %cst_110 {dimension_numbers = #tpu.dot_dimension_numbers<[1], [0], [0], [1], [0, 0, 1, 1], [], []>} : vector<16x128xbf16>, vector<128x384xbf16>, vector<16x384xf32> -> vector<16x384xf32>
    %400 = vector.extract_strided_slice %397 {offsets = [0, 0], sizes = [16, 128], strides = [1, 1]} : vector<16x384xbf16> to vector<16x128xbf16>
    %401 = vector.extract_strided_slice %399 {offsets = [0, 0], sizes = [16, 128], strides = [1, 1]} : vector<16x384xf32> to vector<16x128xf32>
    %402 = arith.extf %400 : vector<16x128xbf16> to vector<16x128xf32>
    %403 = arith.addf %402, %401 : vector<16x128xf32>
    %404 = arith.negf %403 : vector<16x128xf32>
    %405 = math.exp %404 : vector<16x128xf32>
    %cst_111 = arith.constant 1.000000e+00 : f32
    %406 = vector.broadcast %cst_111 : f32 to vector<16x128xf32>
    %407 = arith.addf %406, %405 : vector<16x128xf32>
    %408 = arith.divf %406, %407 : vector<16x128xf32>
    %409 = vector.extract_strided_slice %397 {offsets = [0, 128], sizes = [16, 128], strides = [1, 1]} : vector<16x384xbf16> to vector<16x128xbf16>
    %410 = vector.extract_strided_slice %399 {offsets = [0, 128], sizes = [16, 128], strides = [1, 1]} : vector<16x384xf32> to vector<16x128xf32>
    %411 = arith.extf %409 : vector<16x128xbf16> to vector<16x128xf32>
    %412 = arith.addf %411, %410 : vector<16x128xf32>
    %413 = arith.negf %412 : vector<16x128xf32>
    %414 = math.exp %413 : vector<16x128xf32>
    %cst_112 = arith.constant 1.000000e+00 : f32
    %415 = vector.broadcast %cst_112 : f32 to vector<16x128xf32>
    %416 = arith.addf %415, %414 : vector<16x128xf32>
    %417 = arith.divf %415, %416 : vector<16x128xf32>
    %418 = vector.extract_strided_slice %397 {offsets = [0, 256], sizes = [16, 128], strides = [1, 1]} : vector<16x384xbf16> to vector<16x128xbf16>
    %419 = vector.extract_strided_slice %399 {offsets = [0, 256], sizes = [16, 128], strides = [1, 1]} : vector<16x384xf32> to vector<16x128xf32>
    %420 = vector.broadcast %13 : vector<1x128xf32> to vector<16x128xf32>
    %421 = arith.addf %419, %420 : vector<16x128xf32>
    %422 = arith.mulf %408, %421 : vector<16x128xf32>
    %423 = arith.extf %418 : vector<16x128xbf16> to vector<16x128xf32>
    %424 = arith.addf %423, %422 : vector<16x128xf32>
    %425 = math.tanh %424 : vector<16x128xf32>
    %cst_113 = arith.constant 1.000000e+00 : f32
    %426 = vector.broadcast %cst_113 : f32 to vector<16x128xf32>
    %427 = arith.subf %426, %417 : vector<16x128xf32>
    %428 = arith.mulf %427, %425 : vector<16x128xf32>
    %429 = arith.mulf %417, %350 : vector<16x128xf32>
    %430 = arith.addf %428, %429 : vector<16x128xf32>
    %c4_i32_114 = arith.constant 4 : i32
    %431 = vector.broadcast %c4_i32_114 : i32 to vector<16x128xi32>
    %432 = arith.cmpi sgt, %14, %431 : vector<16x128xi32>
    %c3_i32_115 = arith.constant 3 : i32
    %433 = vector.broadcast %c3_i32_115 : i32 to vector<16x128xi32>
    %434 = arith.cmpi sgt, %14, %433 : vector<16x128xi32>
    %435 = arith.select %432, %395, %349 : vector<16x128xi1>, vector<16x128xf32>
    %436 = arith.select %434, %430, %350 : vector<16x128xi1>, vector<16x128xf32>
    %cst_116 = arith.constant 0.000000e+00 : f32
    %437 = vector.broadcast %cst_116 : f32 to vector<16x128xf32>
    %438 = arith.select %432, %395, %437 : vector<16x128xi1>, vector<16x128xf32>
    %c4_117 = arith.constant 4 : index
    %c0_118 = arith.constant 0 : index
    %c0_119 = arith.constant 0 : index
    %439 = vector.load %arg9[%c4_117, %c0_118, %c0_119] : memref<8x16x256xf32, #tpu.memory_space<vmem>>, vector<1x16x128xf32>
    %440 = vector.shape_cast %439 : vector<1x16x128xf32> to vector<16x128xf32>
    %441 = vector.shape_cast %438 : vector<16x128xf32> to vector<1x16x128xf32>
    tpu.vector_store %arg9[%c4_117, %c0_118, %c0_119], %441 {strides = array<i32>} : memref<8x16x256xf32, #tpu.memory_space<vmem>>, vector<1x16x128xf32>,
    %cst_120 = arith.constant 0.000000e+00 : f32
    %442 = vector.broadcast %cst_120 : f32 to vector<16x128xf32>
    %443 = arith.select %434, %430, %442 : vector<16x128xi1>, vector<16x128xf32>
    %c3_121 = arith.constant 3 : index
    %c0_122 = arith.constant 0 : index
    %c128_123 = arith.constant 128 : index
    %444 = vector.load %arg9[%c3_121, %c0_122, %c128_123] : memref<8x16x256xf32, #tpu.memory_space<vmem>>, vector<1x16x128xf32>
    %445 = vector.shape_cast %444 : vector<1x16x128xf32> to vector<16x128xf32>
    %446 = vector.shape_cast %443 : vector<16x128xf32> to vector<1x16x128xf32>
    tpu.vector_store %arg9[%c3_121, %c0_122, %c128_123], %446 {strides = array<i32>} : memref<8x16x256xf32, #tpu.memory_space<vmem>>, vector<1x16x128xf32>,
    %c5_124 = arith.constant 5 : index
    %c0_125 = arith.constant 0 : index
    %c0_126 = arith.constant 0 : index
    %447 = vector.load %arg11[%c5_124, %c0_125, %c0_126] : memref<8x16x768xbf16, #tpu.memory_space<vmem>>, vector<1x16x384xbf16>
    %448 = vector.shape_cast %447 : vector<1x16x384xbf16> to vector<16x384xbf16>
    %449 = arith.truncf %435 : vector<16x128xf32> to vector<16x128xbf16>
    %cst_127 = arith.constant dense<0.000000e+00> : vector<16x384xf32>
    %450 = tpu.matmul %449, %10, %cst_127 {dimension_numbers = #tpu.dot_dimension_numbers<[1], [0], [0], [1], [0, 0, 1, 1], [], []>} : vector<16x128xbf16>, vector<128x384xbf16>, vector<16x384xf32> -> vector<16x384xf32>
    %451 = vector.extract_strided_slice %448 {offsets = [0, 0], sizes = [16, 128], strides = [1, 1]} : vector<16x384xbf16> to vector<16x128xbf16>
    %452 = vector.extract_strided_slice %450 {offsets = [0, 0], sizes = [16, 128], strides = [1, 1]} : vector<16x384xf32> to vector<16x128xf32>
    %453 = arith.extf %451 : vector<16x128xbf16> to vector<16x128xf32>
    %454 = arith.addf %453, %452 : vector<16x128xf32>
    %455 = arith.negf %454 : vector<16x128xf32>
    %456 = math.exp %455 : vector<16x128xf32>
    %cst_128 = arith.constant 1.000000e+00 : f32
    %457 = vector.broadcast %cst_128 : f32 to vector<16x128xf32>
    %458 = arith.addf %457, %456 : vector<16x128xf32>
    %459 = arith.divf %457, %458 : vector<16x128xf32>
    %460 = vector.extract_strided_slice %448 {offsets = [0, 128], sizes = [16, 128], strides = [1, 1]} : vector<16x384xbf16> to vector<16x128xbf16>
    %461 = vector.extract_strided_slice %450 {offsets = [0, 128], sizes = [16, 128], strides = [1, 1]} : vector<16x384xf32> to vector<16x128xf32>
    %462 = arith.extf %460 : vector<16x128xbf16> to vector<16x128xf32>
    %463 = arith.addf %462, %461 : vector<16x128xf32>
    %464 = arith.negf %463 : vector<16x128xf32>
    %465 = math.exp %464 : vector<16x128xf32>
    %cst_129 = arith.constant 1.000000e+00 : f32
    %466 = vector.broadcast %cst_129 : f32 to vector<16x128xf32>
    %467 = arith.addf %466, %465 : vector<16x128xf32>
    %468 = arith.divf %466, %467 : vector<16x128xf32>
    %469 = vector.extract_strided_slice %448 {offsets = [0, 256], sizes = [16, 128], strides = [1, 1]} : vector<16x384xbf16> to vector<16x128xbf16>
    %470 = vector.extract_strided_slice %450 {offsets = [0, 256], sizes = [16, 128], strides = [1, 1]} : vector<16x384xf32> to vector<16x128xf32>
    %471 = vector.broadcast %12 : vector<1x128xf32> to vector<16x128xf32>
    %472 = arith.addf %470, %471 : vector<16x128xf32>
    %473 = arith.mulf %459, %472 : vector<16x128xf32>
    %474 = arith.extf %469 : vector<16x128xbf16> to vector<16x128xf32>
    %475 = arith.addf %474, %473 : vector<16x128xf32>
    %476 = math.tanh %475 : vector<16x128xf32>
    %cst_130 = arith.constant 1.000000e+00 : f32
    %477 = vector.broadcast %cst_130 : f32 to vector<16x128xf32>
    %478 = arith.subf %477, %468 : vector<16x128xf32>
    %479 = arith.mulf %478, %476 : vector<16x128xf32>
    %480 = arith.mulf %468, %435 : vector<16x128xf32>
    %481 = arith.addf %479, %480 : vector<16x128xf32>
    %c2_131 = arith.constant 2 : index
    %c0_132 = arith.constant 0 : index
    %c384_133 = arith.constant 384 : index
    %482 = vector.load %arg11[%c2_131, %c0_132, %c384_133] : memref<8x16x768xbf16, #tpu.memory_space<vmem>>, vector<1x16x384xbf16>
    %483 = vector.shape_cast %482 : vector<1x16x384xbf16> to vector<16x384xbf16>
    %484 = arith.truncf %436 : vector<16x128xf32> to vector<16x128xbf16>
    %cst_134 = arith.constant dense<0.000000e+00> : vector<16x384xf32>
    %485 = tpu.matmul %484, %11, %cst_134 {dimension_numbers = #tpu.dot_dimension_numbers<[1], [0], [0], [1], [0, 0, 1, 1], [], []>} : vector<16x128xbf16>, vector<128x384xbf16>, vector<16x384xf32> -> vector<16x384xf32>
    %486 = vector.extract_strided_slice %483 {offsets = [0, 0], sizes = [16, 128], strides = [1, 1]} : vector<16x384xbf16> to vector<16x128xbf16>
    %487 = vector.extract_strided_slice %485 {offsets = [0, 0], sizes = [16, 128], strides = [1, 1]} : vector<16x384xf32> to vector<16x128xf32>
    %488 = arith.extf %486 : vector<16x128xbf16> to vector<16x128xf32>
    %489 = arith.addf %488, %487 : vector<16x128xf32>
    %490 = arith.negf %489 : vector<16x128xf32>
    %491 = math.exp %490 : vector<16x128xf32>
    %cst_135 = arith.constant 1.000000e+00 : f32
    %492 = vector.broadcast %cst_135 : f32 to vector<16x128xf32>
    %493 = arith.addf %492, %491 : vector<16x128xf32>
    %494 = arith.divf %492, %493 : vector<16x128xf32>
    %495 = vector.extract_strided_slice %483 {offsets = [0, 128], sizes = [16, 128], strides = [1, 1]} : vector<16x384xbf16> to vector<16x128xbf16>
    %496 = vector.extract_strided_slice %485 {offsets = [0, 128], sizes = [16, 128], strides = [1, 1]} : vector<16x384xf32> to vector<16x128xf32>
    %497 = arith.extf %495 : vector<16x128xbf16> to vector<16x128xf32>
    %498 = arith.addf %497, %496 : vector<16x128xf32>
    %499 = arith.negf %498 : vector<16x128xf32>
    %500 = math.exp %499 : vector<16x128xf32>
    %cst_136 = arith.constant 1.000000e+00 : f32
    %501 = vector.broadcast %cst_136 : f32 to vector<16x128xf32>
    %502 = arith.addf %501, %500 : vector<16x128xf32>
    %503 = arith.divf %501, %502 : vector<16x128xf32>
    %504 = vector.extract_strided_slice %483 {offsets = [0, 256], sizes = [16, 128], strides = [1, 1]} : vector<16x384xbf16> to vector<16x128xbf16>
    %505 = vector.extract_strided_slice %485 {offsets = [0, 256], sizes = [16, 128], strides = [1, 1]} : vector<16x384xf32> to vector<16x128xf32>
    %506 = vector.broadcast %13 : vector<1x128xf32> to vector<16x128xf32>
    %507 = arith.addf %505, %506 : vector<16x128xf32>
    %508 = arith.mulf %494, %507 : vector<16x128xf32>
    %509 = arith.extf %504 : vector<16x128xbf16> to vector<16x128xf32>
    %510 = arith.addf %509, %508 : vector<16x128xf32>
    %511 = math.tanh %510 : vector<16x128xf32>
    %cst_137 = arith.constant 1.000000e+00 : f32
    %512 = vector.broadcast %cst_137 : f32 to vector<16x128xf32>
    %513 = arith.subf %512, %503 : vector<16x128xf32>
    %514 = arith.mulf %513, %511 : vector<16x128xf32>
    %515 = arith.mulf %503, %436 : vector<16x128xf32>
    %516 = arith.addf %514, %515 : vector<16x128xf32>
    %c5_i32_138 = arith.constant 5 : i32
    %517 = vector.broadcast %c5_i32_138 : i32 to vector<16x128xi32>
    %518 = arith.cmpi sgt, %14, %517 : vector<16x128xi32>
    %c2_i32_139 = arith.constant 2 : i32
    %519 = vector.broadcast %c2_i32_139 : i32 to vector<16x128xi32>
    %520 = arith.cmpi sgt, %14, %519 : vector<16x128xi32>
    %521 = arith.select %518, %481, %435 : vector<16x128xi1>, vector<16x128xf32>
    %522 = arith.select %520, %516, %436 : vector<16x128xi1>, vector<16x128xf32>
    %cst_140 = arith.constant 0.000000e+00 : f32
    %523 = vector.broadcast %cst_140 : f32 to vector<16x128xf32>
    %524 = arith.select %518, %481, %523 : vector<16x128xi1>, vector<16x128xf32>
    %c5_141 = arith.constant 5 : index
    %c0_142 = arith.constant 0 : index
    %c0_143 = arith.constant 0 : index
    %525 = vector.load %arg9[%c5_141, %c0_142, %c0_143] : memref<8x16x256xf32, #tpu.memory_space<vmem>>, vector<1x16x128xf32>
    %526 = vector.shape_cast %525 : vector<1x16x128xf32> to vector<16x128xf32>
    %527 = vector.shape_cast %524 : vector<16x128xf32> to vector<1x16x128xf32>
    tpu.vector_store %arg9[%c5_141, %c0_142, %c0_143], %527 {strides = array<i32>} : memref<8x16x256xf32, #tpu.memory_space<vmem>>, vector<1x16x128xf32>,
    %cst_144 = arith.constant 0.000000e+00 : f32
    %528 = vector.broadcast %cst_144 : f32 to vector<16x128xf32>
    %529 = arith.select %520, %516, %528 : vector<16x128xi1>, vector<16x128xf32>
    %c2_145 = arith.constant 2 : index
    %c0_146 = arith.constant 0 : index
    %c128_147 = arith.constant 128 : index
    %530 = vector.load %arg9[%c2_145, %c0_146, %c128_147] : memref<8x16x256xf32, #tpu.memory_space<vmem>>, vector<1x16x128xf32>
    %531 = vector.shape_cast %530 : vector<1x16x128xf32> to vector<16x128xf32>
    %532 = vector.shape_cast %529 : vector<16x128xf32> to vector<1x16x128xf32>
    tpu.vector_store %arg9[%c2_145, %c0_146, %c128_147], %532 {strides = array<i32>} : memref<8x16x256xf32, #tpu.memory_space<vmem>>, vector<1x16x128xf32>,
    %c6_148 = arith.constant 6 : index
    %c0_149 = arith.constant 0 : index
    %c0_150 = arith.constant 0 : index
    %533 = vector.load %arg11[%c6_148, %c0_149, %c0_150] : memref<8x16x768xbf16, #tpu.memory_space<vmem>>, vector<1x16x384xbf16>
    %534 = vector.shape_cast %533 : vector<1x16x384xbf16> to vector<16x384xbf16>
    %535 = arith.truncf %521 : vector<16x128xf32> to vector<16x128xbf16>
    %cst_151 = arith.constant dense<0.000000e+00> : vector<16x384xf32>
    %536 = tpu.matmul %535, %10, %cst_151 {dimension_numbers = #tpu.dot_dimension_numbers<[1], [0], [0], [1], [0, 0, 1, 1], [], []>} : vector<16x128xbf16>, vector<128x384xbf16>, vector<16x384xf32> -> vector<16x384xf32>
    %537 = vector.extract_strided_slice %534 {offsets = [0, 0], sizes = [16, 128], strides = [1, 1]} : vector<16x384xbf16> to vector<16x128xbf16>
    %538 = vector.extract_strided_slice %536 {offsets = [0, 0], sizes = [16, 128], strides = [1, 1]} : vector<16x384xf32> to vector<16x128xf32>
    %539 = arith.extf %537 : vector<16x128xbf16> to vector<16x128xf32>
    %540 = arith.addf %539, %538 : vector<16x128xf32>
    %541 = arith.negf %540 : vector<16x128xf32>
    %542 = math.exp %541 : vector<16x128xf32>
    %cst_152 = arith.constant 1.000000e+00 : f32
    %543 = vector.broadcast %cst_152 : f32 to vector<16x128xf32>
    %544 = arith.addf %543, %542 : vector<16x128xf32>
    %545 = arith.divf %543, %544 : vector<16x128xf32>
    %546 = vector.extract_strided_slice %534 {offsets = [0, 128], sizes = [16, 128], strides = [1, 1]} : vector<16x384xbf16> to vector<16x128xbf16>
    %547 = vector.extract_strided_slice %536 {offsets = [0, 128], sizes = [16, 128], strides = [1, 1]} : vector<16x384xf32> to vector<16x128xf32>
    %548 = arith.extf %546 : vector<16x128xbf16> to vector<16x128xf32>
    %549 = arith.addf %548, %547 : vector<16x128xf32>
    %550 = arith.negf %549 : vector<16x128xf32>
    %551 = math.exp %550 : vector<16x128xf32>
    %cst_153 = arith.constant 1.000000e+00 : f32
    %552 = vector.broadcast %cst_153 : f32 to vector<16x128xf32>
    %553 = arith.addf %552, %551 : vector<16x128xf32>
    %554 = arith.divf %552, %553 : vector<16x128xf32>
    %555 = vector.extract_strided_slice %534 {offsets = [0, 256], sizes = [16, 128], strides = [1, 1]} : vector<16x384xbf16> to vector<16x128xbf16>
    %556 = vector.extract_strided_slice %536 {offsets = [0, 256], sizes = [16, 128], strides = [1, 1]} : vector<16x384xf32> to vector<16x128xf32>
    %557 = vector.broadcast %12 : vector<1x128xf32> to vector<16x128xf32>
    %558 = arith.addf %556, %557 : vector<16x128xf32>
    %559 = arith.mulf %545, %558 : vector<16x128xf32>
    %560 = arith.extf %555 : vector<16x128xbf16> to vector<16x128xf32>
    %561 = arith.addf %560, %559 : vector<16x128xf32>
    %562 = math.tanh %561 : vector<16x128xf32>
    %cst_154 = arith.constant 1.000000e+00 : f32
    %563 = vector.broadcast %cst_154 : f32 to vector<16x128xf32>
    %564 = arith.subf %563, %554 : vector<16x128xf32>
    %565 = arith.mulf %564, %562 : vector<16x128xf32>
    %566 = arith.mulf %554, %521 : vector<16x128xf32>
    %567 = arith.addf %565, %566 : vector<16x128xf32>
    %c1_155 = arith.constant 1 : index
    %c0_156 = arith.constant 0 : index
    %c384_157 = arith.constant 384 : index
    %568 = vector.load %arg11[%c1_155, %c0_156, %c384_157] : memref<8x16x768xbf16, #tpu.memory_space<vmem>>, vector<1x16x384xbf16>
    %569 = vector.shape_cast %568 : vector<1x16x384xbf16> to vector<16x384xbf16>
    %570 = arith.truncf %522 : vector<16x128xf32> to vector<16x128xbf16>
    %cst_158 = arith.constant dense<0.000000e+00> : vector<16x384xf32>
    %571 = tpu.matmul %570, %11, %cst_158 {dimension_numbers = #tpu.dot_dimension_numbers<[1], [0], [0], [1], [0, 0, 1, 1], [], []>} : vector<16x128xbf16>, vector<128x384xbf16>, vector<16x384xf32> -> vector<16x384xf32>
    %572 = vector.extract_strided_slice %569 {offsets = [0, 0], sizes = [16, 128], strides = [1, 1]} : vector<16x384xbf16> to vector<16x128xbf16>
    %573 = vector.extract_strided_slice %571 {offsets = [0, 0], sizes = [16, 128], strides = [1, 1]} : vector<16x384xf32> to vector<16x128xf32>
    %574 = arith.extf %572 : vector<16x128xbf16> to vector<16x128xf32>
    %575 = arith.addf %574, %573 : vector<16x128xf32>
    %576 = arith.negf %575 : vector<16x128xf32>
    %577 = math.exp %576 : vector<16x128xf32>
    %cst_159 = arith.constant 1.000000e+00 : f32
    %578 = vector.broadcast %cst_159 : f32 to vector<16x128xf32>
    %579 = arith.addf %578, %577 : vector<16x128xf32>
    %580 = arith.divf %578, %579 : vector<16x128xf32>
    %581 = vector.extract_strided_slice %569 {offsets = [0, 128], sizes = [16, 128], strides = [1, 1]} : vector<16x384xbf16> to vector<16x128xbf16>
    %582 = vector.extract_strided_slice %571 {offsets = [0, 128], sizes = [16, 128], strides = [1, 1]} : vector<16x384xf32> to vector<16x128xf32>
    %583 = arith.extf %581 : vector<16x128xbf16> to vector<16x128xf32>
    %584 = arith.addf %583, %582 : vector<16x128xf32>
    %585 = arith.negf %584 : vector<16x128xf32>
    %586 = math.exp %585 : vector<16x128xf32>
    %cst_160 = arith.constant 1.000000e+00 : f32
    %587 = vector.broadcast %cst_160 : f32 to vector<16x128xf32>
    %588 = arith.addf %587, %586 : vector<16x128xf32>
    %589 = arith.divf %587, %588 : vector<16x128xf32>
    %590 = vector.extract_strided_slice %569 {offsets = [0, 256], sizes = [16, 128], strides = [1, 1]} : vector<16x384xbf16> to vector<16x128xbf16>
    %591 = vector.extract_strided_slice %571 {offsets = [0, 256], sizes = [16, 128], strides = [1, 1]} : vector<16x384xf32> to vector<16x128xf32>
    %592 = vector.broadcast %13 : vector<1x128xf32> to vector<16x128xf32>
    %593 = arith.addf %591, %592 : vector<16x128xf32>
    %594 = arith.mulf %580, %593 : vector<16x128xf32>
    %595 = arith.extf %590 : vector<16x128xbf16> to vector<16x128xf32>
    %596 = arith.addf %595, %594 : vector<16x128xf32>
    %597 = math.tanh %596 : vector<16x128xf32>
    %cst_161 = arith.constant 1.000000e+00 : f32
    %598 = vector.broadcast %cst_161 : f32 to vector<16x128xf32>
    %599 = arith.subf %598, %589 : vector<16x128xf32>
    %600 = arith.mulf %599, %597 : vector<16x128xf32>
    %601 = arith.mulf %589, %522 : vector<16x128xf32>
    %602 = arith.addf %600, %601 : vector<16x128xf32>
    %c6_i32_162 = arith.constant 6 : i32
    %603 = vector.broadcast %c6_i32_162 : i32 to vector<16x128xi32>
    %604 = arith.cmpi sgt, %14, %603 : vector<16x128xi32>
    %c1_i32_163 = arith.constant 1 : i32
    %605 = vector.broadcast %c1_i32_163 : i32 to vector<16x128xi32>
    %606 = arith.cmpi sgt, %14, %605 : vector<16x128xi32>
    %607 = arith.select %604, %567, %521 : vector<16x128xi1>, vector<16x128xf32>
    %608 = arith.select %606, %602, %522 : vector<16x128xi1>, vector<16x128xf32>
    %cst_164 = arith.constant 0.000000e+00 : f32
    %609 = vector.broadcast %cst_164 : f32 to vector<16x128xf32>
    %610 = arith.select %604, %567, %609 : vector<16x128xi1>, vector<16x128xf32>
    %c6_165 = arith.constant 6 : index
    %c0_166 = arith.constant 0 : index
    %c0_167 = arith.constant 0 : index
    %611 = vector.load %arg9[%c6_165, %c0_166, %c0_167] : memref<8x16x256xf32, #tpu.memory_space<vmem>>, vector<1x16x128xf32>
    %612 = vector.shape_cast %611 : vector<1x16x128xf32> to vector<16x128xf32>
    %613 = vector.shape_cast %610 : vector<16x128xf32> to vector<1x16x128xf32>
    tpu.vector_store %arg9[%c6_165, %c0_166, %c0_167], %613 {strides = array<i32>} : memref<8x16x256xf32, #tpu.memory_space<vmem>>, vector<1x16x128xf32>,
    %cst_168 = arith.constant 0.000000e+00 : f32
    %614 = vector.broadcast %cst_168 : f32 to vector<16x128xf32>
    %615 = arith.select %606, %602, %614 : vector<16x128xi1>, vector<16x128xf32>
    %c1_169 = arith.constant 1 : index
    %c0_170 = arith.constant 0 : index
    %c128_171 = arith.constant 128 : index
    %616 = vector.load %arg9[%c1_169, %c0_170, %c128_171] : memref<8x16x256xf32, #tpu.memory_space<vmem>>, vector<1x16x128xf32>
    %617 = vector.shape_cast %616 : vector<1x16x128xf32> to vector<16x128xf32>
    %618 = vector.shape_cast %615 : vector<16x128xf32> to vector<1x16x128xf32>
    tpu.vector_store %arg9[%c1_169, %c0_170, %c128_171], %618 {strides = array<i32>} : memref<8x16x256xf32, #tpu.memory_space<vmem>>, vector<1x16x128xf32>,
    %c7_172 = arith.constant 7 : index
    %c0_173 = arith.constant 0 : index
    %c0_174 = arith.constant 0 : index
    %619 = vector.load %arg11[%c7_172, %c0_173, %c0_174] : memref<8x16x768xbf16, #tpu.memory_space<vmem>>, vector<1x16x384xbf16>
    %620 = vector.shape_cast %619 : vector<1x16x384xbf16> to vector<16x384xbf16>
    %621 = arith.truncf %607 : vector<16x128xf32> to vector<16x128xbf16>
    %cst_175 = arith.constant dense<0.000000e+00> : vector<16x384xf32>
    %622 = tpu.matmul %621, %10, %cst_175 {dimension_numbers = #tpu.dot_dimension_numbers<[1], [0], [0], [1], [0, 0, 1, 1], [], []>} : vector<16x128xbf16>, vector<128x384xbf16>, vector<16x384xf32> -> vector<16x384xf32>
    %623 = vector.extract_strided_slice %620 {offsets = [0, 0], sizes = [16, 128], strides = [1, 1]} : vector<16x384xbf16> to vector<16x128xbf16>
    %624 = vector.extract_strided_slice %622 {offsets = [0, 0], sizes = [16, 128], strides = [1, 1]} : vector<16x384xf32> to vector<16x128xf32>
    %625 = arith.extf %623 : vector<16x128xbf16> to vector<16x128xf32>
    %626 = arith.addf %625, %624 : vector<16x128xf32>
    %627 = arith.negf %626 : vector<16x128xf32>
    %628 = math.exp %627 : vector<16x128xf32>
    %cst_176 = arith.constant 1.000000e+00 : f32
    %629 = vector.broadcast %cst_176 : f32 to vector<16x128xf32>
    %630 = arith.addf %629, %628 : vector<16x128xf32>
    %631 = arith.divf %629, %630 : vector<16x128xf32>
    %632 = vector.extract_strided_slice %620 {offsets = [0, 128], sizes = [16, 128], strides = [1, 1]} : vector<16x384xbf16> to vector<16x128xbf16>
    %633 = vector.extract_strided_slice %622 {offsets = [0, 128], sizes = [16, 128], strides = [1, 1]} : vector<16x384xf32> to vector<16x128xf32>
    %634 = arith.extf %632 : vector<16x128xbf16> to vector<16x128xf32>
    %635 = arith.addf %634, %633 : vector<16x128xf32>
    %636 = arith.negf %635 : vector<16x128xf32>
    %637 = math.exp %636 : vector<16x128xf32>
    %cst_177 = arith.constant 1.000000e+00 : f32
    %638 = vector.broadcast %cst_177 : f32 to vector<16x128xf32>
    %639 = arith.addf %638, %637 : vector<16x128xf32>
    %640 = arith.divf %638, %639 : vector<16x128xf32>
    %641 = vector.extract_strided_slice %620 {offsets = [0, 256], sizes = [16, 128], strides = [1, 1]} : vector<16x384xbf16> to vector<16x128xbf16>
    %642 = vector.extract_strided_slice %622 {offsets = [0, 256], sizes = [16, 128], strides = [1, 1]} : vector<16x384xf32> to vector<16x128xf32>
    %643 = vector.broadcast %12 : vector<1x128xf32> to vector<16x128xf32>
    %644 = arith.addf %642, %643 : vector<16x128xf32>
    %645 = arith.mulf %631, %644 : vector<16x128xf32>
    %646 = arith.extf %641 : vector<16x128xbf16> to vector<16x128xf32>
    %647 = arith.addf %646, %645 : vector<16x128xf32>
    %648 = math.tanh %647 : vector<16x128xf32>
    %cst_178 = arith.constant 1.000000e+00 : f32
    %649 = vector.broadcast %cst_178 : f32 to vector<16x128xf32>
    %650 = arith.subf %649, %640 : vector<16x128xf32>
    %651 = arith.mulf %650, %648 : vector<16x128xf32>
    %652 = arith.mulf %640, %607 : vector<16x128xf32>
    %653 = arith.addf %651, %652 : vector<16x128xf32>
    %c0_179 = arith.constant 0 : index
    %c0_180 = arith.constant 0 : index
    %c384_181 = arith.constant 384 : index
    %654 = vector.load %arg11[%c0_179, %c0_180, %c384_181] : memref<8x16x768xbf16, #tpu.memory_space<vmem>>, vector<1x16x384xbf16>
    %655 = vector.shape_cast %654 : vector<1x16x384xbf16> to vector<16x384xbf16>
    %656 = arith.truncf %608 : vector<16x128xf32> to vector<16x128xbf16>
    %cst_182 = arith.constant dense<0.000000e+00> : vector<16x384xf32>
    %657 = tpu.matmul %656, %11, %cst_182 {dimension_numbers = #tpu.dot_dimension_numbers<[1], [0], [0], [1], [0, 0, 1, 1], [], []>} : vector<16x128xbf16>, vector<128x384xbf16>, vector<16x384xf32> -> vector<16x384xf32>
    %658 = vector.extract_strided_slice %655 {offsets = [0, 0], sizes = [16, 128], strides = [1, 1]} : vector<16x384xbf16> to vector<16x128xbf16>
    %659 = vector.extract_strided_slice %657 {offsets = [0, 0], sizes = [16, 128], strides = [1, 1]} : vector<16x384xf32> to vector<16x128xf32>
    %660 = arith.extf %658 : vector<16x128xbf16> to vector<16x128xf32>
    %661 = arith.addf %660, %659 : vector<16x128xf32>
    %662 = arith.negf %661 : vector<16x128xf32>
    %663 = math.exp %662 : vector<16x128xf32>
    %cst_183 = arith.constant 1.000000e+00 : f32
    %664 = vector.broadcast %cst_183 : f32 to vector<16x128xf32>
    %665 = arith.addf %664, %663 : vector<16x128xf32>
    %666 = arith.divf %664, %665 : vector<16x128xf32>
    %667 = vector.extract_strided_slice %655 {offsets = [0, 128], sizes = [16, 128], strides = [1, 1]} : vector<16x384xbf16> to vector<16x128xbf16>
    %668 = vector.extract_strided_slice %657 {offsets = [0, 128], sizes = [16, 128], strides = [1, 1]} : vector<16x384xf32> to vector<16x128xf32>
    %669 = arith.extf %667 : vector<16x128xbf16> to vector<16x128xf32>
    %670 = arith.addf %669, %668 : vector<16x128xf32>
    %671 = arith.negf %670 : vector<16x128xf32>
    %672 = math.exp %671 : vector<16x128xf32>
    %cst_184 = arith.constant 1.000000e+00 : f32
    %673 = vector.broadcast %cst_184 : f32 to vector<16x128xf32>
    %674 = arith.addf %673, %672 : vector<16x128xf32>
    %675 = arith.divf %673, %674 : vector<16x128xf32>
    %676 = vector.extract_strided_slice %655 {offsets = [0, 256], sizes = [16, 128], strides = [1, 1]} : vector<16x384xbf16> to vector<16x128xbf16>
    %677 = vector.extract_strided_slice %657 {offsets = [0, 256], sizes = [16, 128], strides = [1, 1]} : vector<16x384xf32> to vector<16x128xf32>
    %678 = vector.broadcast %13 : vector<1x128xf32> to vector<16x128xf32>
    %679 = arith.addf %677, %678 : vector<16x128xf32>
    %680 = arith.mulf %666, %679 : vector<16x128xf32>
    %681 = arith.extf %676 : vector<16x128xbf16> to vector<16x128xf32>
    %682 = arith.addf %681, %680 : vector<16x128xf32>
    %683 = math.tanh %682 : vector<16x128xf32>
    %cst_185 = arith.constant 1.000000e+00 : f32
    %684 = vector.broadcast %cst_185 : f32 to vector<16x128xf32>
    %685 = arith.subf %684, %675 : vector<16x128xf32>
    %686 = arith.mulf %685, %683 : vector<16x128xf32>
    %687 = arith.mulf %675, %608 : vector<16x128xf32>
    %688 = arith.addf %686, %687 : vector<16x128xf32>
    %c7_i32_186 = arith.constant 7 : i32
    %689 = vector.broadcast %c7_i32_186 : i32 to vector<16x128xi32>
    %690 = arith.cmpi sgt, %14, %689 : vector<16x128xi32>
    %c0_i32_187 = arith.constant 0 : i32
    %691 = vector.broadcast %c0_i32_187 : i32 to vector<16x128xi32>
    %692 = arith.cmpi sgt, %14, %691 : vector<16x128xi32>
    %693 = arith.select %690, %653, %607 : vector<16x128xi1>, vector<16x128xf32>
    %694 = arith.select %692, %688, %608 : vector<16x128xi1>, vector<16x128xf32>
    %cst_188 = arith.constant 0.000000e+00 : f32
    %695 = vector.broadcast %cst_188 : f32 to vector<16x128xf32>
    %696 = arith.select %690, %653, %695 : vector<16x128xi1>, vector<16x128xf32>
    %c7_189 = arith.constant 7 : index
    %c0_190 = arith.constant 0 : index
    %c0_191 = arith.constant 0 : index
    %697 = vector.load %arg9[%c7_189, %c0_190, %c0_191] : memref<8x16x256xf32, #tpu.memory_space<vmem>>, vector<1x16x128xf32>
    %698 = vector.shape_cast %697 : vector<1x16x128xf32> to vector<16x128xf32>
    %699 = vector.shape_cast %696 : vector<16x128xf32> to vector<1x16x128xf32>
    tpu.vector_store %arg9[%c7_189, %c0_190, %c0_191], %699 {strides = array<i32>} : memref<8x16x256xf32, #tpu.memory_space<vmem>>, vector<1x16x128xf32>,
    %cst_192 = arith.constant 0.000000e+00 : f32
    %700 = vector.broadcast %cst_192 : f32 to vector<16x128xf32>
    %701 = arith.select %692, %688, %700 : vector<16x128xi1>, vector<16x128xf32>
    %c0_193 = arith.constant 0 : index
    %c0_194 = arith.constant 0 : index
    %c128_195 = arith.constant 128 : index
    %702 = vector.load %arg9[%c0_193, %c0_194, %c128_195] : memref<8x16x256xf32, #tpu.memory_space<vmem>>, vector<1x16x128xf32>
    %703 = vector.shape_cast %702 : vector<1x16x128xf32> to vector<16x128xf32>
    %704 = vector.shape_cast %701 : vector<16x128xf32> to vector<1x16x128xf32>
    tpu.vector_store %arg9[%c0_193, %c0_194, %c128_195], %704 {strides = array<i32>} : memref<8x16x256xf32, #tpu.memory_space<vmem>>, vector<1x16x128xf32>,
    %c0_196 = arith.constant 0 : index
    %c0_197 = arith.constant 0 : index
    %705 = vector.load %arg10[%c0_196, %c0_197] : memref<16x256xf32, #tpu.memory_space<vmem>>, vector<16x128xf32>
    tpu.vector_store %arg10[%c0_196, %c0_197], %693 {strides = array<i32>} : memref<16x256xf32, #tpu.memory_space<vmem>>, vector<16x128xf32>,
    %c0_198 = arith.constant 0 : index
    %c128_199 = arith.constant 128 : index
    %706 = vector.load %arg10[%c0_198, %c128_199] : memref<16x256xf32, #tpu.memory_space<vmem>>, vector<16x128xf32>
    tpu.vector_store %arg10[%c0_198, %c128_199], %694 {strides = array<i32>} : memref<16x256xf32, #tpu.memory_space<vmem>>, vector<16x128xf32>,
    return
  }
  func.func @transform_0(%arg0: i32) -> (i32, i32, i32) {
    %c0_i32 = arith.constant 0 : i32
    %c0_i32_0 = arith.constant 0 : i32
    %c0_i32_1 = arith.constant 0 : i32
    return %c0_i32, %arg0, %c0_i32_0 : i32, i32, i32
  }
  func.func @transform_1(%arg0: i32) -> (i32, i32) {
    %c0_i32 = arith.constant 0 : i32
    %c0_i32_0 = arith.constant 0 : i32
    return %arg0, %c0_i32 : i32, i32
  }
  func.func @transform_2(%arg0: i32) -> (i32, i32) {
    %c0_i32 = arith.constant 0 : i32
    %c0_i32_0 = arith.constant 0 : i32
    %c0_i32_1 = arith.constant 0 : i32
    return %c0_i32, %c0_i32_0 : i32, i32
  }
  func.func @transform_3(%arg0: i32) -> (i32, i32) {
    %c0_i32 = arith.constant 0 : i32
    %c0_i32_0 = arith.constant 0 : i32
    %c0_i32_1 = arith.constant 0 : i32
    return %c0_i32, %c0_i32_0 : i32, i32
  }
  func.func @transform_4(%arg0: i32) -> (i32, i32) {
    %c0_i32 = arith.constant 0 : i32
    %c0_i32_0 = arith.constant 0 : i32
    %c0_i32_1 = arith.constant 0 : i32
    return %c0_i32, %c0_i32_0 : i32, i32
  }
  func.func @transform_5(%arg0: i32) -> (i32, i32) {
    %c0_i32 = arith.constant 0 : i32
    %c0_i32_0 = arith.constant 0 : i32
    %c0_i32_1 = arith.constant 0 : i32
    return %c0_i32, %c0_i32_0 : i32, i32
  }
  func.func @transform_6(%arg0: i32) -> (i32, i32) {
    %c0_i32 = arith.constant 0 : i32
    %c0_i32_0 = arith.constant 0 : i32
    %c0_i32_1 = arith.constant 0 : i32
    return %c0_i32, %c0_i32_0 : i32, i32
  }
  func.func @transform_7(%arg0: i32) -> (i32, i32) {
    %c0_i32 = arith.constant 0 : i32
    %c0_i32_0 = arith.constant 0 : i32
    %c0_i32_1 = arith.constant 0 : i32
    return %c0_i32, %c0_i32_0 : i32, i32
  }
  func.func @transform_8(%arg0: i32) -> (i32, i32, i32) {
    %c0_i32 = arith.constant 0 : i32
    %c0_i32_0 = arith.constant 0 : i32
    %c0_i32_1 = arith.constant 0 : i32
    return %c0_i32, %arg0, %c0_i32_0 : i32, i32, i32
  }
  func.func @transform_9(%arg0: i32) -> (i32, i32) {
    %c0_i32 = arith.constant 0 : i32
    %c0_i32_0 = arith.constant 0 : i32
    return %arg0, %c0_i32 : i32, i32
  }
}

</mosaic_0001>

<bundles_post_ra>
// kernel: encoder_rnn_forward.1
= control target key start
LH: loop header
LB: loop body
LE: loop exit
PB: predicated region body
PF: predicated region fallthrough
CT: control target
= control target key end

     0   :  { %v7150_v1 = vmov 0   ;;  %vm4772_vm0 = vmmov 0   ;;  %s7140_s2 = inlined_call_operand.vmem [shape: bf16[128,768], index: 2, kind: input, shape index: {}]   ;;  %s7141_s0 = inlined_call_operand.vmem [shape: bf16[8,16,128], index: 0, kind: input, shape index: {}]   ;;  %s7142_s4 = inlined_call_operand.vmem [shape: bf16[128,384], index: 4, kind: input, shape index: {}]   ;;  %s7143_s6 = inlined_call_operand.vmem [shape: bf16[128,384], index: 6, kind: input, shape index: {}]   ;;  %s7144_s3 = inlined_call_operand.vmem [shape: f32[1,768], index: 3, kind: input, shape index: {}]   ;;  %s7145_s5 = inlined_call_operand.vmem [shape: f32[1,128], index: 5, kind: input, shape index: {}]   ;;  %s7146_s1 = inlined_call_operand.vmem [shape: s32[16,128], index: 1, kind: input, shape index: {}]   ;;  %s7147_s8 = inlined_call_operand.vmem [shape: f32[8,16,256], index: 8, kind: output, shape index: {0}]   ;;  %s7148_s7 = inlined_call_operand.vmem [shape: f32[1,128], index: 7, kind: input, shape index: {}]   ;;  %s7149_s9 = inlined_call_operand.vmem [shape: f32[16,256], index: 9, kind: output, shape index: {1}]  }
   0x1   :  { %v4204_v0 = vld [vmem:[%s7140_s2 + $0x4] ss:$24 sps:$4 sm:$0xff]   ;;  %448 = vmatprep.mubr.bf16.mxu0 %v7150_v1  ;;  %561 = vmatprep.mubr.bf16.mxu1 %v7150_v1  ;;  %v4208_v3 = vld [vmem:[%s7140_s2] ss:$24 sps:$4 sm:$0xff]   ;;  %v4210_v5 = vld [vmem:[%s7140_s2 + $0x34] ss:$24 sps:$4 sm:$0xff]  }
   0x2   :  { %v4206_v2 = vld [vmem:[%s7140_s2 + $0xc] ss:$24 sps:$4 sm:$0xff]   ;;  %416 = vmatprep.subr.bf16.mxu0 %v4204_v0  ;;  %v4209_v4 = vld [vmem:[%s7140_s2 + $0x8] ss:$24 sps:$4 sm:$0xff]   ;;  %v4212_v6 = vld [vmem:[%s7140_s2 + $0x3c] ss:$24 sps:$4 sm:$0xff]  }
   0x3   :  { %529 = vmatprep.subr.bf16.mxu1 %v4206_v2  ;;  %417 = vmatpush1.bf16.msra.mxu0 %v4208_v3  ;;  %v4214_v7 = vld [vmem:[%s7140_s2 + $0x30] ss:$24 sps:$4 sm:$0xff]   ;;  %v4216_v9 = vld [vmem:[%s7140_s2 + $0x64] ss:$24 sps:$4 sm:$0xff]   ;;  %v4220_v11 = vld [vmem:[%s7140_s2 + $0x60] ss:$24 sps:$4 sm:$0xff]  }
   0x4   :  { %530 = vmatpush1.bf16.msra.mxu1 %v4209_v4  ;;  %418 = vmatprep.subr.bf16.mxu0 %v4210_v5  ;;  %v4215_v8 = vld [vmem:[%s7140_s2 + $0x38] ss:$24 sps:$4 sm:$0xff]   ;;  %v4218_v10 = vld [vmem:[%s7140_s2 + $0x6c] ss:$24 sps:$4 sm:$0xff]   ;;  %v4221_v12 = vld [vmem:[%s7140_s2 + $0x68] ss:$24 sps:$4 sm:$0xff]  }
   0x5   :  { %531 = vmatprep.subr.bf16.mxu1 %v4212_v6  ;;  %v4222_v13 = vld [vmem:[%s7140_s2 + $0x94] ss:$24 sps:$4 sm:$0xff]   ;;  %v4226_v15 = vld [vmem:[%s7140_s2 + $0x90] ss:$24 sps:$4 sm:$0xff]   ;;  %v4228_v17 = vld [vmem:[%s7140_s2 + $0xc4] ss:$24 sps:$4 sm:$0xff]  }
   0x6   :  { %v4224_v14 = vld [vmem:[%s7140_s2 + $0x9c] ss:$24 sps:$4 sm:$0xff]   ;;  %v4227_v16 = vld [vmem:[%s7140_s2 + $0x98] ss:$24 sps:$4 sm:$0xff]   ;;  %v4230_v18 = vld [vmem:[%s7140_s2 + $0xcc] ss:$24 sps:$4 sm:$0xff]  }
   0x7   :  { %419 = vmatpush1.bf16.msra.mxu0 %v4214_v7  ;;  %v4232_v19 = vld [vmem:[%s7140_s2 + $0xc0] ss:$24 sps:$4 sm:$0xff]   ;;  %v4234_v21 = vld [vmem:[%s7140_s2 + $0xf4] ss:$24 sps:$4 sm:$0xff]   ;;  %v4238_v23 = vld [vmem:[%s7140_s2 + $0xf0] ss:$24 sps:$4 sm:$0xff]  }
   0x8   :  { %532 = vmatpush1.bf16.msra.mxu1 %v4215_v8  ;;  %420 = vmatprep.subr.bf16.mxu0 %v4216_v9  ;;  %v4233_v20 = vld [vmem:[%s7140_s2 + $0xc8] ss:$24 sps:$4 sm:$0xff]   ;;  %v4236_v22 = vld [vmem:[%s7140_s2 + $0xfc] ss:$24 sps:$4 sm:$0xff]   ;;  %v4239_v24 = vld [vmem:[%s7140_s2 + $0xf8] ss:$24 sps:$4 sm:$0xff]  }
   0x9   :  { %533 = vmatprep.subr.bf16.mxu1 %v4218_v10  ;;  %v4240_v25 = vld [vmem:[%s7140_s2 + $0x124] ss:$24 sps:$4 sm:$0xff]   ;;  %v4244_v27 = vld [vmem:[%s7140_s2 + $0x120] ss:$24 sps:$4 sm:$0xff]   ;;  %v4246_v29 = vld [vmem:[%s7140_s2 + $0x154] ss:$24 sps:$4 sm:$0xff]  }
   0xa   :  { %v4242_v26 = vld [vmem:[%s7140_s2 + $0x12c] ss:$24 sps:$4 sm:$0xff]   ;;  %v4245_v28 = vld [vmem:[%s7140_s2 + $0x128] ss:$24 sps:$4 sm:$0xff]   ;;  %v4248_v30 = vld [vmem:[%s7140_s2 + $0x15c] ss:$24 sps:$4 sm:$0xff]  }
   0xb   :  { %421 = vmatpush1.bf16.msra.mxu0 %v4220_v11  ;;  %v4250_v31 = vld [vmem:[%s7140_s2 + $0x150] ss:$24 sps:$4 sm:$0xff]   ;;  %v4255_v33 = vld [vmem:[%s7140_s2 + $0x14] ss:$24 sps:$4 sm:$0xff]   ;;  %v4927_v34 = vld [vmem:[%s7141_s0] sm:$0xff]   ;;  %v7152_v8 = vmov 0.0  }
   0xc   :  { %534 = vmatpush1.bf16.msra.mxu1 %v4221_v12  ;;  %422 = vmatprep.subr.bf16.mxu0 %v4222_v13  ;;  %v4251_v32 = vld [vmem:[%s7140_s2 + $0x158] ss:$24 sps:$4 sm:$0xff]   ;;  %v4259_v37 = vld [vmem:[%s7140_s2 + $0x44] ss:$24 sps:$4 sm:$0xff]   ;;  %v4944_v38 = vld [vmem:[%s7142_s4] ss:$12 sps:$4 sm:$0xff]  }
   0xd   :  { %535 = vmatprep.subr.bf16.mxu1 %v4224_v14  ;;  %v4932_v35 = vld [vmem:[%s7142_s4 + $0x4] ss:$12 sps:$4 sm:$0xff]   ;;  %v4951_v39 = vld [vmem:[%s7142_s4 + $0x1c] ss:$12 sps:$4 sm:$0xff]   ;;  %v4257_v40 = vld [vmem:[%s7140_s2 + $0x40] ss:$24 sps:$4 sm:$0xff]  }
   0xe   :  { %v4253_v36 = vld [vmem:[%s7140_s2 + $0x10] ss:$24 sps:$4 sm:$0xff]   ;;  %v4263_v41 = vld [vmem:[%s7140_s2 + $0x74] ss:$24 sps:$4 sm:$0xff]   ;;  %v4965_v42 = vld [vmem:[%s7142_s4 + $0x18] ss:$12 sps:$4 sm:$0xff]  }
   0xf   :  { %423 = vmatpush1.bf16.msra.mxu0 %v4226_v15  ;;  %v4970_v43 = vld [vmem:[%s7141_s0 + $0x8] sm:$0xff]   ;;  %v4267_v45 = vld [vmem:[%s7140_s2 + $0xa4] ss:$24 sps:$4 sm:$0xff]   ;;  %v4982_v46 = vld [vmem:[%s7142_s4 + $0x34] ss:$12 sps:$4 sm:$0xff]  }
  0x10   :  { %536 = vmatpush1.bf16.msra.mxu1 %v4227_v16  ;;  %424 = vmatprep.subr.bf16.mxu0 %v4228_v17  ;;  %v4261_v44 = vld [vmem:[%s7140_s2 + $0x70] ss:$24 sps:$4 sm:$0xff]   ;;  %v4995_v48 = vld [vmem:[%s7142_s4 + $0x4c] ss:$12 sps:$4 sm:$0xff]   ;;  %v4283_v55 = vld [vmem:[%s7140_s2 + $0x104] ss:$24 sps:$4 sm:$0xff]  }
  0x11   :  { %537 = vmatprep.subr.bf16.mxu1 %v4230_v18  ;;  %v4988_v47 = vld [vmem:[%s7142_s4 + $0x30] ss:$12 sps:$4 sm:$0xff]   ;;  %v4265_v49 = vld [vmem:[%s7140_s2 + $0xa0] ss:$24 sps:$4 sm:$0xff]   ;;  %v4274_v50 = vld [vmem:[%s7140_s2 + $0xd4] ss:$24 sps:$4 sm:$0xff]  }
  0x12   :  { %v5010_v51 = vld [vmem:[%s7142_s4 + $0x48] ss:$12 sps:$4 sm:$0xff]   ;;  %v5024_v54 = vld [vmem:[%s7142_s4 + $0x64] ss:$12 sps:$4 sm:$0xff]   ;;  %v5033_v56 = vld [vmem:[%s7142_s4 + $0x60] ss:$12 sps:$4 sm:$0xff]  }
  0x13   :  { %425 = vmatpush1.bf16.msra.mxu0 %v4232_v19  ;;  %v5015_v52 = vld [vmem:[%s7141_s0 + $0x10] sm:$0xff]   ;;  %v5040_v57 = vld [vmem:[%s7142_s4 + $0x7c] ss:$12 sps:$4 sm:$0xff]   ;;  %v4281_v58 = vld [vmem:[%s7140_s2 + $0x100] ss:$24 sps:$4 sm:$0xff]  }
  0x14   :  { %538 = vmatpush1.bf16.msra.mxu1 %v4233_v20  ;;  %426 = vmatprep.subr.bf16.mxu0 %v4234_v21  ;;  %v4272_v53 = vld [vmem:[%s7140_s2 + $0xd0] ss:$24 sps:$4 sm:$0xff]   ;;  %v5050_v59 = vld [vmem:[%s7141_s0 + $0x18] sm:$0xff]   ;;  %v4293_v60 = vld [vmem:[%s7140_s2 + $0x134] ss:$24 sps:$4 sm:$0xff]  }
  0x15   :  { %539 = vmatprep.subr.bf16.mxu1 %v4236_v22  ;;  %v5060_v61 = vld [vmem:[%s7142_s4 + $0x78] ss:$12 sps:$4 sm:$0xff]   ;;  %v4291_v62 = vld [vmem:[%s7140_s2 + $0x130] ss:$24 sps:$4 sm:$0xff]   ;;  %v5069_v63 = vld [vmem:[%s7142_s4 + $0x94] ss:$12 sps:$4 sm:$0xff]  }
  0x16   :  { %v4303_v0 = vld [vmem:[%s7140_s2 + $0x164] ss:$24 sps:$4 sm:$0xff]   ;;  %v5085_v3 = vld [vmem:[%s7142_s4 + $0xac] ss:$12 sps:$4 sm:$0xff]   ;;  %v5097_v5 = vld [vmem:[%s7142_s4 + $0xa8] ss:$12 sps:$4 sm:$0xff]  }
  0x17   :  { %427 = vmatpush1.bf16.msra.mxu0 %v4238_v23  ;;  %v5078_v2 = vld [vmem:[%s7142_s4 + $0x90] ss:$12 sps:$4 sm:$0xff]   ;;  %v4301_v4 = vld [vmem:[%s7140_s2 + $0x160] ss:$24 sps:$4 sm:$0xff]   ;;  %v5120_v9 = vld [vmem:[%s7141_s0 + $0x28] sm:$0xff]  }
  0x18   :  { %540 = vmatpush1.bf16.msra.mxu1 %v4239_v24  ;;  %428 = vmatprep.subr.bf16.mxu0 %v4240_v25  ;;  %v5102_v6 = vld [vmem:[%s7143_s6 + $0x4] ss:$12 sps:$4 sm:$0xff]   ;;  %v5138_v11 = vld [vmem:[%s7141_s0 + $0x38] sm:$0xff]   ;;  %v5147_v12 = vld [vmem:[%s7142_s4 + $0x8] ss:$12 sps:$4 sm:$0xff]  }
  0x19   :  { %541 = vmatprep.subr.bf16.mxu1 %v4242_v26  ;;  %v5107_v7 = vld [vmem:[%s7141_s0 + $0x20] sm:$0xff]   ;;  %v5129_v10 = vld [vmem:[%s7141_s0 + $0x30] sm:$0xff]   ;;  %v5157_v14 = vld [vmem:[%s7143_s6 + $0x1c] ss:$12 sps:$4 sm:$0xff]  }
  0x1a   :  { %v5152_v13 = vld [vmem:[%s7143_s6] ss:$12 sps:$4 sm:$0xff]   ;;  %v5171_v16 = vld [vmem:[%s7143_s6 + $0x18] ss:$12 sps:$4 sm:$0xff]   ;;  %v5195_v19 = vld [vmem:[%s7143_s6 + $0x30] ss:$12 sps:$4 sm:$0xff]  }
  0x1b   :  { %429 = vmatpush1.bf16.msra.mxu0 %v4244_v27  ;;  %v5166_v15 = vld [vmem:[%s7142_s4 + $0x20] ss:$12 sps:$4 sm:$0xff]   ;;  %v5187_v18 = vld [vmem:[%s7142_s4 + $0x38] ss:$12 sps:$4 sm:$0xff]   ;;  %v5207_v21 = vld [vmem:[%s7142_s4 + $0x50] ss:$12 sps:$4 sm:$0xff]  }
  0x1c   :  { %542 = vmatpush1.bf16.msra.mxu1 %v4245_v28  ;;  %430 = vmatprep.subr.bf16.mxu0 %v4246_v29  ;;  %v5178_v17 = vld [vmem:[%s7143_s6 + $0x34] ss:$12 sps:$4 sm:$0xff]   ;;  %v5200_v20 = vld [vmem:[%s7143_s6 + $0x4c] ss:$12 sps:$4 sm:$0xff]   ;;  %v5221_v23 = vld [vmem:[%s7143_s6 + $0x64] ss:$12 sps:$4 sm:$0xff]  }
  0x1d   :  { %543 = vmatprep.subr.bf16.mxu1 %v4248_v30  ;;  %v5215_v22 = vld [vmem:[%s7143_s6 + $0x48] ss:$12 sps:$4 sm:$0xff]   ;;  %v5234_v25 = vld [vmem:[%s7143_s6 + $0x60] ss:$12 sps:$4 sm:$0xff]   ;;  %v5255_v28 = vld [vmem:[%s7143_s6 + $0x78] ss:$12 sps:$4 sm:$0xff]  }
  0x1e   :  { %v5227_v24 = vld [vmem:[%s7142_s4 + $0x68] ss:$12 sps:$4 sm:$0xff]   ;;  %v5247_v27 = vld [vmem:[%s7142_s4 + $0x80] ss:$12 sps:$4 sm:$0xff]   ;;  %v5267_v30 = vld [vmem:[%s7142_s4 + $0x98] ss:$12 sps:$4 sm:$0xff]  }
  0x1f   :  { %431 = vmatpush1.bf16.msra.mxu0 %v4250_v31  ;;  %v5240_v26 = vld [vmem:[%s7143_s6 + $0x7c] ss:$12 sps:$4 sm:$0xff]   ;;  %v5261_v29 = vld [vmem:[%s7143_s6 + $0x94] ss:$12 sps:$4 sm:$0xff]  }
  0x20   :  { %544 = vmatpush1.bf16.msra.mxu1 %v4251_v32  ;;  %642 = vmatprep.subr.bf16.mxu0 %v4255_v33  ;;  %v5274_v31 = vld [vmem:[%s7143_s6 + $0x90] ss:$12 sps:$4 sm:$0xff]   ;;  %v5280_v32 = vld [vmem:[%s7143_s6 + $0xac] ss:$12 sps:$4 sm:$0xff]  }
  0x21   :  { %1050 = vmatprep.subr.bf16.mxu1 %v4932_v35  ;;  %v5287_v33 = vld [vmem:[%s7142_s4 + $0xb0] ss:$12 sps:$4 sm:$0xff]  }
  0x22   :  { %449 = vmatmul.mubr.bf16.vlgmr.msra.gmra.mrb[0].mxu0 %v4927_v34 }
  0x23   :  { %562 = vmatmul.mubr.bf16.vlgmr.msra.gmra.mrb[0].mxu1 %v4927_v34  ;;  %643 = vmatpush1.bf16.msra.mxu0 %v4253_v36  ;;  %v5302_v36 = vld [vmem:[%s7143_s6 + $0x8] ss:$12 sps:$4 sm:$0xff]  }
  0x24   :  { %458 = vmatprep.mubr.bf16.mxu0 %v7150_v1  ;;  %571 = vmatprep.mubr.bf16.mxu1 %v7150_v1 }
  0x25   :  { %644 = vmatprep.subr.bf16.mxu0 %v4259_v37  ;;  %1051 = vmatpush1.bf16.msra.mxu1 %v4944_v38  ;;  %v5314_v37 = vld [vmem:[%s7143_s6 + $0x20] ss:$12 sps:$4 sm:$0xff]  }
  0x26   :  { %1052 = vmatprep.subr.bf16.mxu1 %v4951_v39 }
  0x27   :  { %645 = vmatpush1.bf16.msra.mxu0 %v4257_v40  ;;  %v5332_v40 = vld [vmem:[%s7143_s6 + $0x50] ss:$12 sps:$4 sm:$0xff]  }
  0x28   :  { %646 = vmatprep.subr.bf16.mxu0 %v4263_v41  ;;  %v5339_v41 = vld [vmem:[%s7143_s6 + $0x68] ss:$12 sps:$4 sm:$0xff]  }
  0x29   :  { %1053 = vmatpush1.bf16.msra.mxu1 %v4965_v42 }
  0x2a   :  { %459 = vmatmul.mubr.bf16.gmra.mrb[4].mxu0 %v4970_v43  ;;  %1054 = vmatprep.subr.bf16.mxu1 %v4982_v46 }
  0x2b   :  { %572 = vmatmul.mubr.bf16.gmra.mrb[4].mxu1 %v4970_v43  ;;  %468 = vmatprep.mubr.bf16.mxu0 %v7150_v1 }
  0x2c   :  { %581 = vmatprep.mubr.bf16.mxu1 %v7150_v1  ;;  %647 = vmatpush1.bf16.msra.mxu0 %v4261_v44  ;;  %v5355_v44 = vld [vmem:[%s7143_s6 + $0x98] ss:$12 sps:$4 sm:$0xff]  }
  0x2d   :  { %648 = vmatprep.subr.bf16.mxu0 %v4267_v45  ;;  %1055 = vmatpush1.bf16.msra.mxu1 %v4988_v47  ;;  %v5364_v45 = vld [vmem:[%s7143_s6 + $0xb0] ss:$12 sps:$4 sm:$0xff]  }
  0x2e   :  { %1056 = vmatprep.subr.bf16.mxu1 %v4995_v48 }
  0x30   :  { %649 = vmatpush1.bf16.msra.mxu0 %v4265_v49 }
  0x31   :  { %650 = vmatprep.subr.bf16.mxu0 %v4274_v50  ;;  %1057 = vmatpush1.bf16.msra.mxu1 %v5010_v51 }
  0x32   :  { %469 = vmatmul.mubr.bf16.gmra.mrb[8].mxu0 %v5015_v52  ;;  %1058 = vmatprep.subr.bf16.mxu1 %v5024_v54 }
  0x33   :  { %582 = vmatmul.mubr.bf16.gmra.mrb[8].mxu1 %v5015_v52  ;;  %478 = vmatprep.mubr.bf16.mxu0 %v7150_v1 }
  0x34   :  { %591 = vmatprep.mubr.bf16.mxu1 %v7150_v1  ;;  %651 = vmatpush1.bf16.msra.mxu0 %v4272_v53 }
  0x35   :  { %652 = vmatprep.subr.bf16.mxu0 %v4283_v55  ;;  %1059 = vmatpush1.bf16.msra.mxu1 %v5033_v56 }
  0x36   :  { %1060 = vmatprep.subr.bf16.mxu1 %v5040_v57 }
  0x38   :  { %653 = vmatpush1.bf16.msra.mxu0 %v4281_v58 }
  0x39   :  { %654 = vmatprep.subr.bf16.mxu0 %v4293_v60  ;;  %1061 = vmatpush1.bf16.msra.mxu1 %v5060_v61 }
  0x3a   :  { %479 = vmatmul.mubr.bf16.gmra.mrb[12].mxu0 %v5050_v59  ;;  %1062 = vmatprep.subr.bf16.mxu1 %v5069_v63 }
  0x3b   :  { %592 = vmatmul.mubr.bf16.gmra.mrb[12].mxu1 %v5050_v59  ;;  %488 = vmatprep.mubr.bf16.mxu0 %v7150_v1 }
  0x3c   :  { %601 = vmatprep.mubr.bf16.mxu1 %v7150_v1  ;;  %655 = vmatpush1.bf16.msra.mxu0 %v4291_v62 }
  0x3d   :  { %656 = vmatprep.subr.bf16.mxu0 %v4303_v0  ;;  %1063 = vmatpush1.bf16.msra.mxu1 %v5078_v2 }
  0x3e   :  { %1064 = vmatprep.subr.bf16.mxu1 %v5085_v3 }
  0x40   :  { %657 = vmatpush1.bf16.msra.mxu0 %v4301_v4 }
  0x41   :  { %1065 = vmatpush1.bf16.msra.mxu1 %v5097_v5  ;;  %1322 = vmatprep.subr.bf16.mxu0 %v5102_v6 }
  0x42   :  { %489 = vmatmul.mubr.bf16.gmra.mrb[16].mxu0 %v5107_v7  ;;  %3881 = vmatprep.subr.bf16.mxu1 %v7152_v8 }
  0x43   :  { %602 = vmatmul.mubr.bf16.gmra.mrb[16].mxu1 %v5107_v7  ;;  %498 = vmatprep.mubr.bf16.mxu0 %v7150_v1 }
  0x44   :  { %611 = vmatprep.mubr.bf16.mxu1 %v7150_v1 }
  0x4a   :  { %499 = vmatmul.mubr.bf16.gmra.mrb[20].mxu0 %v5120_v9 }
  0x4b   :  { %612 = vmatmul.mubr.bf16.gmra.mrb[20].mxu1 %v5120_v9  ;;  %508 = vmatprep.mubr.bf16.mxu0 %v7150_v1 }
  0x4c   :  { %621 = vmatprep.mubr.bf16.mxu1 %v7150_v1 }
  0x52   :  { %509 = vmatmul.mubr.bf16.gmra.mrb[24].mxu0 %v5129_v10 }
  0x53   :  { %622 = vmatmul.mubr.bf16.gmra.mrb[24].mxu1 %v5129_v10  ;;  %518 = vmatprep.mubr.bf16.mxu0 %v7150_v1 }
  0x54   :  { %631 = vmatprep.mubr.bf16.mxu1 %v7150_v1 }
  0x5a   :  { %519 = vmatmul.mubr.bf16.gmra.mrb[28].mxu0 %v5138_v11 }
  0x5b   :  { %632 = vmatmul.mubr.bf16.gmra.mrb[28].mxu1 %v5138_v11  ;;  %674 = vmatprep.mubr.bf16.mxu0 %v7150_v1 }
  0x5c   :  { %1082 = vmatprep.mubr.bf16.mxu1 %v7150_v1 }
  0x62   :  { %675 = vmatmul.mubr.bf16.vlgmr.msra.gmra.mrb[32].mxu0 %v4927_v34  ;;  %v5295_v34 = vld [vmem:[%s7143_s6 + $0xa8] ss:$12 sps:$4 sm:$0xff]  }
  0x63   :  { %1083 = vmatmul.mubr.bf16.vlgmr.msra.gmra.mrb[32].mxu1 %v7150_v1  ;;  %1323 = vmatpush1.bf16.msra.mxu0 %v5152_v13 }
  0x64   :  { %3882 = vmatpush3.bf16.msra.mxu1 %v5147_v12  ;;  %684 = vmatprep.mubr.bf16.mxu0 %v7150_v1 }
  0x65   :  { %3883 = vmatprep.subr.bf16.mxu1 %v7152_v8  ;;  %1324 = vmatprep.subr.bf16.mxu0 %v5157_v14 }
  0x66   :  { %3897 = vmatprep.mubr.msk.bf16.mxu1 %vm4772_vm0, %v7152_v8 }
  0x67   :  { %1325 = vmatpush1.bf16.msra.mxu0 %v5171_v16 }
  0x68   :  { %3884 = vmatpush3.bf16.msra.mxu1 %v5166_v15  ;;  %1326 = vmatprep.subr.bf16.mxu0 %v5178_v17 }
  0x69   :  { %3885 = vmatprep.subr.bf16.mxu1 %v7152_v8 }
  0x6a   :  { %685 = vmatmul.mubr.bf16.gmra.mrb[36].mxu0 %v4970_v43  ;;  %v5348_v43 = vld [vmem:[%s7143_s6 + $0x80] ss:$12 sps:$4 sm:$0xff]  }
  0x6b   :  { %694 = vmatprep.mubr.bf16.mxu0 %v7150_v1  ;;  %1327 = vmatpush1.bf16.msra.mxu0 %v5195_v19 }
  0x6c   :  { %3886 = vmatpush3.bf16.msra.mxu1 %v5187_v18  ;;  %1328 = vmatprep.subr.bf16.mxu0 %v5200_v20 }
  0x6d   :  { %3887 = vmatprep.subr.bf16.mxu1 %v7152_v8 }
  0x6f   :  { %1329 = vmatpush1.bf16.msra.mxu0 %v5215_v22 }
  0x70   :  { %3888 = vmatpush3.bf16.msra.mxu1 %v5207_v21  ;;  %1330 = vmatprep.subr.bf16.mxu0 %v5221_v23 }
  0x71   :  { %3889 = vmatprep.subr.bf16.mxu1 %v7152_v8 }
  0x72   :  { %695 = vmatmul.mubr.bf16.gmra.mrb[40].mxu0 %v5015_v52 }
  0x73   :  { %704 = vmatprep.mubr.bf16.mxu0 %v7150_v1  ;;  %1331 = vmatpush1.bf16.msra.mxu0 %v5234_v25 }
  0x74   :  { %3890 = vmatpush3.bf16.msra.mxu1 %v5227_v24  ;;  %1332 = vmatprep.subr.bf16.mxu0 %v5240_v26 }
  0x75   :  { %3891 = vmatprep.subr.bf16.mxu1 %v7152_v8 }
  0x77   :  { %1333 = vmatpush1.bf16.msra.mxu0 %v5255_v28 }
  0x78   :  { %3892 = vmatpush3.bf16.msra.mxu1 %v5247_v27  ;;  %1334 = vmatprep.subr.bf16.mxu0 %v5261_v29 }
  0x79   :  { %3893 = vmatprep.subr.bf16.mxu1 %v7152_v8 }
  0x7a   :  { %705 = vmatmul.mubr.bf16.gmra.mrb[44].mxu0 %v5050_v59 }
  0x7b   :  { %714 = vmatprep.mubr.bf16.mxu0 %v7150_v1  ;;  %1335 = vmatpush1.bf16.msra.mxu0 %v5274_v31 }
  0x7c   :  { %3894 = vmatpush3.bf16.msra.mxu1 %v5267_v30  ;;  %1336 = vmatprep.subr.bf16.mxu0 %v5280_v32 }
  0x7d   :  { %3895 = vmatprep.subr.bf16.mxu1 %v7152_v8 }
  0x7f   :  { %1337 = vmatpush1.bf16.msra.mxu0 %v5295_v34 }
  0x80   :  { %3896 = vmatpush3.bf16.msra.mxu1 %v5287_v33  ;;  %1480 = vmatprep.subr.bf16.mxu0 %v4932_v35  ;;  %v5323_v35 = vld [vmem:[%s7143_s6 + $0x38] ss:$12 sps:$4 sm:$0xff]  }
  0x81   :  { %3901 = vmatprep.subr.bf16.mxu1 %v7152_v8 }
  0x82   :  { %715 = vmatmul.mubr.bf16.gmra.mrb[48].mxu0 %v5107_v7 }
  0x83   :  { %3898 = vmatmul.mubr.bf16.vlgmr.msra.gmra.mrb[36].mxu1 %v7150_v1  ;;  %724 = vmatprep.mubr.bf16.mxu0 %v7150_v1 }
  0x84   :  { %3902 = vmatpush3.bf16.msra.mxu1 %v5302_v36  ;;  %3917 = vmatprep.mubr.msk.bf16.mxu1 %vm4772_vm0, %v7152_v8 }
  0x85   :  { %3903 = vmatprep.subr.bf16.mxu1 %v7152_v8 }
  0x88   :  { %3904 = vmatpush3.bf16.msra.mxu1 %v5314_v37 }
  0x89   :  { %3905 = vmatprep.subr.bf16.mxu1 %v7152_v8 }
  0x8a   :  { %725 = vmatmul.mubr.bf16.gmra.mrb[52].mxu0 %v5120_v9 }
  0x8b   :  { %734 = vmatprep.mubr.bf16.mxu0 %v7150_v1 }
  0x8c   :  { %3906 = vmatpush3.bf16.msra.mxu1 %v5323_v35 }
  0x8d   :  { %3907 = vmatprep.subr.bf16.mxu1 %v7152_v8 }
  0x90   :  { %3908 = vmatpush3.bf16.msra.mxu1 %v5332_v40 }
  0x91   :  { %3909 = vmatprep.subr.bf16.mxu1 %v7152_v8 }
  0x92   :  { %735 = vmatmul.mubr.bf16.gmra.mrb[56].mxu0 %v5129_v10 }
  0x93   :  { %744 = vmatprep.mubr.bf16.mxu0 %v7150_v1 }
  0x94   :  { %3910 = vmatpush3.bf16.msra.mxu1 %v5339_v41 }
  0x95   :  { %3911 = vmatprep.subr.bf16.mxu1 %v7152_v8 }
  0x98   :  { %3912 = vmatpush3.bf16.msra.mxu1 %v5348_v43 }
  0x99   :  { %3913 = vmatprep.subr.bf16.mxu1 %v7152_v8 }
  0x9a   :  { %745 = vmatmul.mubr.bf16.gmra.mrb[60].mxu0 %v5138_v11 }
  0x9b   :  { %1354 = vmatprep.mubr.bf16.mxu0 %v7150_v1 }
  0x9c   :  { %3914 = vmatpush3.bf16.msra.mxu1 %v5355_v44 }
  0x9d   :  { %3915 = vmatprep.subr.bf16.mxu1 %v7152_v8 }
  0xa0   :  { %3916 = vmatpush3.bf16.msra.mxu1 %v5364_v45 }
  0xa1   :  { %3921 = vmatprep.subr.bf16.mxu1 %v7152_v8 }
  0xa2   :  { %1355 = vmatmul.mubr.bf16.vlgmr.msra.gmra.mrb[64].mxu0 %v7150_v1 }
  0xa3   :  { %3918 = vmatmul.mubr.bf16.vlgmr.msra.gmra.mrb[40].mxu1 %v7150_v1  ;;  %1481 = vmatpush1.bf16.msra.mxu0 %v4944_v38  ;;  %v98_v38 = vlaneseq }
  0xa4   :  { %3922 = vmatpush3.bf16.msra.mxu1 %v5147_v12  ;;  %1482 = vmatprep.subr.bf16.mxu0 %v4951_v39 }
  0xa5   :  { %3923 = vmatprep.subr.bf16.mxu1 %v7152_v8  ;;  %1512 = vmatprep.mubr.bf16.mxu0 %v7150_v1  ;;  %v5406_v39 = vshrl.u32 %v98_v38, 7 }
  0xa6   :  { %3937 = vmatprep.mubr.msk.bf16.mxu1 %vm4772_vm0, %v7152_v8 }
  0xa7   :  { %1483 = vmatpush1.bf16.msra.mxu0 %v4965_v42  ;;  %v108_v42 = vsub.s32 2, %v5406_v39  ;;  %v104_v49 = vsub.s32 1, %v5406_v39 }
  0xa8   :  { %3924 = vmatpush3.bf16.msra.mxu1 %v5166_v15  ;;  %1484 = vmatprep.subr.bf16.mxu0 %v4982_v46  ;;  %v112_v46 = vsub.s32 3, %v5406_v39 }
  0xa9   :  { %3925 = vmatprep.subr.bf16.mxu1 %v7152_v8 }
  0xab   :  { %1485 = vmatpush1.bf16.msra.mxu0 %v4988_v47  ;;  %v100_v47 = vsub.s32 0, %v5406_v39 }
  0xac   :  { %3926 = vmatpush3.bf16.msra.mxu1 %v5187_v18  ;;  %1486 = vmatprep.subr.bf16.mxu0 %v4995_v48  ;;  %v5414_v48 = vld [vmem:[%s7144_s3] sm:$0x3f] }
  0xad   :  { %3927 = vmatprep.subr.bf16.mxu1 %v7152_v8  ;;  %v5418_v50 = vrot.slane %v5414_v48, %v108_v42  ;;  %v5424_v52 = vrot.slane %v5414_v48, %v100_v47 }
  0xaf   :  { %1487 = vmatpush1.bf16.msra.mxu0 %v5010_v51  ;;  %v5421_v51 = vrot.slane %v5414_v48, %v112_v46 }
  0xb0   :  { %3928 = vmatpush3.bf16.msra.mxu1 %v5207_v21  ;;  %1488 = vmatprep.subr.bf16.mxu0 %v5024_v54  ;;  %v5427_v54 = vrot.slane %v5414_v48, %v104_v49 }
  0xb1   :  { %3929 = vmatprep.subr.bf16.mxu1 %v7152_v8 }
  0xb3   :  { %1489 = vmatpush1.bf16.msra.mxu0 %v5033_v56 }
  0xb4   :  { %3930 = vmatpush3.bf16.msra.mxu1 %v5227_v24  ;;  %1490 = vmatprep.subr.bf16.mxu0 %v5040_v57 }
  0xb5   :  { %3931 = vmatprep.subr.bf16.mxu1 %v7152_v8 }
  0xb7   :  { %1491 = vmatpush1.bf16.msra.mxu0 %v5060_v61 }
  0xb8   :  { %3932 = vmatpush3.bf16.msra.mxu1 %v5247_v27  ;;  %1492 = vmatprep.subr.bf16.mxu0 %v5069_v63 }
  0xb9   :  { %3933 = vmatprep.subr.bf16.mxu1 %v7152_v8 }
  0xbb   :  { %1493 = vmatpush1.bf16.msra.mxu0 %v5078_v2 }
  0xbc   :  { %3934 = vmatpush3.bf16.msra.mxu1 %v5267_v30  ;;  %1494 = vmatprep.subr.bf16.mxu0 %v5085_v3 }
  0xbd   :  { %3935 = vmatprep.subr.bf16.mxu1 %v7152_v8 }
  0xbf   :  { %1495 = vmatpush1.bf16.msra.mxu0 %v5097_v5 }
  0xc0   :  { %3936 = vmatpush3.bf16.msra.mxu1 %v5287_v33  ;;  %1619 = vmatprep.subr.bf16.mxu0 %v5102_v6 }
  0xc1   :  { %3941 = vmatprep.subr.bf16.mxu1 %v7152_v8 }
  0xf5   :  { %v450_v53 = vpop.f32.mrb[0].mxu0 }
  0xf6   :  { %v563_v55 = vpop.f32.mrb[0].mxu1  ;;  %v452_v56 = vpop.f32.mrb[1].mxu0  ;;  %v451_v62 = vadd.f32 %v450_v53, %v5424_v52 }
  0xf7   :  { %v564_v57 = vadd.f32 %v563_v55, %v5418_v50  ;;  %v565_v58 = vpop.f32.mrb[1].mxu1  ;;  %v454_v59 = vpop.f32.mrb[2].mxu0  ;;  %v453_v4 = vadd.f32 %v452_v56, %v5427_v54 }
  0xf8   :  { %v566_v60 = vadd.f32 %v565_v58, %v5421_v51  ;;  %v567_v61 = vpop.f32.mrb[2].mxu1  ;;  %v455_v63 = vadd.f32 %v454_v59, %v5424_v52  ;;  %v456_v0 = vpop.f32.mrb[3].mxu0 }
  0xf9   :  { %v568_v2 = vadd.f32 %v567_v61, %v5418_v50  ;;  %v569_v3 = vpop.f32.mrb[3].mxu1  ;;  %v457_v5 = vadd.f32 %v456_v0, %v5427_v54 }
  0xfa   :  { %v570_v6 = vadd.f32 %v569_v3, %v5421_v51  ;;  %v5437_v7 = vpack.c.bf16 %v455_v63, %v451_v62 }
  0xfb   :  { %v5439_v9 = vpack.c.bf16 %v568_v2, %v564_v57  ;;  %v5441_v10 = vpack.c.bf16 %v457_v5, %v453_v4 }
  0xfc   :  { %v5443_v11 = vpack.c.bf16 %v570_v6, %v566_v60 }
  0xfd   :  { %v460_v12 = vpop.f32.mrb[4].mxu0 }
  0xfe   :  { %7255 = vst [vmem:[#allocation3_spill] sm:$0xff] %v5443_v11  ;;  %v573_v15 = vpop.f32.mrb[4].mxu1  ;;  %v461_v18 = vadd.f32 %v460_v12, %v5424_v52  ;;  %v462_v21 = vpop.f32.mrb[5].mxu0 }
  0xff   :  { %v574_v24 = vadd.f32 %v573_v15, %v5418_v50  ;;  %v575_v27 = vpop.f32.mrb[5].mxu1  ;;  %v463_v30 = vadd.f32 %v462_v21, %v5427_v54  ;;  %v464_v33 = vpop.f32.mrb[6].mxu0 }
 0x100   :  { %v576_v38 = vadd.f32 %v575_v27, %v5421_v51  ;;  %v577_v42 = vpop.f32.mrb[6].mxu1  ;;  %v465_v46 = vadd.f32 %v464_v33, %v5424_v52  ;;  %v466_v47 = vpop.f32.mrb[7].mxu0 }
 0x101   :  { %v578_v49 = vadd.f32 %v577_v42, %v5418_v50  ;;  %v579_v53 = vpop.f32.mrb[7].mxu1  ;;  %v467_v55 = vadd.f32 %v466_v47, %v5427_v54 }
 0x102   :  { %v580_v56 = vadd.f32 %v579_v53, %v5421_v51  ;;  %v5453_v57 = vpack.c.bf16 %v465_v46, %v461_v18 }
 0x103   :  { %v5455_v58 = vpack.c.bf16 %v578_v49, %v574_v24  ;;  %v5457_v59 = vpack.c.bf16 %v467_v55, %v463_v30 }
 0x104   :  { %v5459_v60 = vpack.c.bf16 %v580_v56, %v576_v38 }
 0x105   :  { %v470_v61 = vpop.f32.mrb[8].mxu0 }
 0x106   :  { %7256 = vst [vmem:[#allocation4_spill] sm:$0xff] %v5459_v60  ;;  %v583_v62 = vpop.f32.mrb[8].mxu1  ;;  %v471_v63 = vadd.f32 %v470_v61, %v5424_v52  ;;  %v472_v0 = vpop.f32.mrb[9].mxu0 }
 0x107   :  { %v584_v2 = vadd.f32 %v583_v62, %v5418_v50  ;;  %v585_v3 = vpop.f32.mrb[9].mxu1  ;;  %v473_v4 = vadd.f32 %v472_v0, %v5427_v54  ;;  %v474_v5 = vpop.f32.mrb[10].mxu0 }
 0x108   :  { %v586_v6 = vadd.f32 %v585_v3, %v5421_v51  ;;  %v587_v12 = vpop.f32.mrb[10].mxu1  ;;  %v475_v15 = vadd.f32 %v474_v5, %v5424_v52  ;;  %v476_v18 = vpop.f32.mrb[11].mxu0 }
 0x109   :  { %v588_v21 = vadd.f32 %v587_v12, %v5418_v50  ;;  %v589_v24 = vpop.f32.mrb[11].mxu1  ;;  %v477_v27 = vadd.f32 %v476_v18, %v5427_v54 }
 0x10a   :  { %v590_v30 = vadd.f32 %v589_v24, %v5421_v51  ;;  %v5469_v33 = vpack.c.bf16 %v475_v15, %v471_v63 }
 0x10b   :  { %v5471_v38 = vpack.c.bf16 %v588_v21, %v584_v2  ;;  %v5473_v42 = vpack.c.bf16 %v477_v27, %v473_v4 }
 0x10c   :  { %v5475_v46 = vpack.c.bf16 %v590_v30, %v586_v6 }
 0x10d   :  { %v480_v47 = vpop.f32.mrb[12].mxu0 }
 0x10e   :  { %7257 = vst [vmem:[#allocation5_spill] sm:$0xff] %v5475_v46  ;;  %v593_v49 = vpop.f32.mrb[12].mxu1  ;;  %v481_v53 = vadd.f32 %v480_v47, %v5424_v52  ;;  %v482_v55 = vpop.f32.mrb[13].mxu0 }
 0x10f   :  { %v594_v56 = vadd.f32 %v593_v49, %v5418_v50  ;;  %v595_v61 = vpop.f32.mrb[13].mxu1  ;;  %v483_v62 = vadd.f32 %v482_v55, %v5427_v54  ;;  %v484_v0 = vpop.f32.mrb[14].mxu0 }
 0x110   :  { %v596_v63 = vadd.f32 %v595_v61, %v5421_v51  ;;  %v597_v3 = vpop.f32.mrb[14].mxu1  ;;  %v485_v2 = vadd.f32 %v484_v0, %v5424_v52  ;;  %v486_v4 = vpop.f32.mrb[15].mxu0 }
 0x111   :  { %v598_v5 = vadd.f32 %v597_v3, %v5418_v50  ;;  %v599_v6 = vpop.f32.mrb[15].mxu1  ;;  %v487_v12 = vadd.f32 %v486_v4, %v5427_v54 }
 0x112   :  { %v600_v15 = vadd.f32 %v599_v6, %v5421_v51  ;;  %v5485_v18 = vpack.c.bf16 %v485_v2, %v481_v53 }
 0x113   :  { %v5487_v21 = vpack.c.bf16 %v598_v5, %v594_v56  ;;  %v5489_v24 = vpack.c.bf16 %v487_v12, %v483_v62 }
 0x114   :  { %7258 = vst [vmem:[#allocation6_spill] sm:$0xff] %v5485_v18  ;;  %v5491_v27 = vpack.c.bf16 %v600_v15, %v596_v63 }
 0x115   :  { %7259 = vst [vmem:[#allocation7_spill] sm:$0xff] %v5487_v21  ;;  %7260 = vst [vmem:[#allocation8_spill] sm:$0xff] %v5489_v24  ;;  %v490_v30 = vpop.f32.mrb[16].mxu0 }
 0x116   :  { %7261 = vst [vmem:[#allocation9_spill] sm:$0xff] %v5491_v27  ;;  %v603_v47 = vpop.f32.mrb[16].mxu1  ;;  %v491_v49 = vadd.f32 %v490_v30, %v5424_v52  ;;  %v492_v55 = vpop.f32.mrb[17].mxu0 }
 0x117   :  { %v604_v61 = vadd.f32 %v603_v47, %v5418_v50  ;;  %v605_v0 = vpop.f32.mrb[17].mxu1  ;;  %v493_v3 = vadd.f32 %v492_v55, %v5427_v54  ;;  %v494_v4 = vpop.f32.mrb[18].mxu0 }
 0x118   :  { %v606_v53 = vadd.f32 %v605_v0, %v5421_v51  ;;  %v607_v2 = vpop.f32.mrb[18].mxu1  ;;  %v495_v56 = vadd.f32 %v494_v4, %v5424_v52  ;;  %v496_v62 = vpop.f32.mrb[19].mxu0 }
 0x119   :  { %v608_v63 = vadd.f32 %v607_v2, %v5418_v50  ;;  %v609_v5 = vpop.f32.mrb[19].mxu1  ;;  %v497_v6 = vadd.f32 %v496_v62, %v5427_v54 }
 0x11a   :  { %v610_v12 = vadd.f32 %v609_v5, %v5421_v51  ;;  %v5501_v15 = vpack.c.bf16 %v495_v56, %v491_v49 }
 0x11b   :  { %v5503_v30 = vpack.c.bf16 %v608_v63, %v604_v61  ;;  %v5505_v47 = vpack.c.bf16 %v497_v6, %v493_v3 }
 0x11c   :  { %7262 = vst [vmem:[#allocation10_spill] sm:$0xff] %v5501_v15  ;;  %v5507_v55 = vpack.c.bf16 %v610_v12, %v606_v53 }
 0x11d   :  { %7263 = vst [vmem:[#allocation11_spill] sm:$0xff] %v5503_v30  ;;  %7264 = vst [vmem:[#allocation12_spill] sm:$0xff] %v5505_v47  ;;  %v500_v0 = vpop.f32.mrb[20].mxu0 }
 0x11e   :  { %7265 = vst [vmem:[#allocation13_spill] sm:$0xff] %v5507_v55  ;;  %v613_v1 = vpop.f32.mrb[20].mxu1  ;;  %v501_v4 = vadd.f32 %v500_v0, %v5424_v52  ;;  %v502_v8 = vpop.f32.mrb[21].mxu0 }
 0x11f   :  { %v614_v2 = vadd.f32 %v613_v1, %v5418_v50  ;;  %v615_v11 = vpop.f32.mrb[21].mxu1  ;;  %v503_v62 = vadd.f32 %v502_v8, %v5427_v54  ;;  %v504_v60 = vpop.f32.mrb[22].mxu0 }
 0x120   :  { %v616_v49 = vadd.f32 %v615_v11, %v5421_v51  ;;  %v617_v56 = vpop.f32.mrb[22].mxu1  ;;  %v505_v61 = vadd.f32 %v504_v60, %v5424_v52  ;;  %v506_v3 = vpop.f32.mrb[23].mxu0 }
 0x121   :  { %v618_v53 = vadd.f32 %v617_v56, %v5418_v50  ;;  %v619_v63 = vpop.f32.mrb[23].mxu1  ;;  %v507_v5 = vadd.f32 %v506_v3, %v5427_v54 }
 0x122   :  { %v620_v6 = vadd.f32 %v619_v63, %v5421_v51  ;;  %v5517_v12 = vpack.c.bf16 %v505_v61, %v501_v4 }
 0x123   :  { %v5519_v1 = vpack.c.bf16 %v618_v53, %v614_v2  ;;  %v5521_v0 = vpack.c.bf16 %v507_v5, %v503_v62 }
 0x124   :  { %7266 = vst [vmem:[#allocation14_spill] sm:$0xff] %v5517_v12  ;;  %v5523_v8 = vpack.c.bf16 %v620_v6, %v616_v49 }
 0x125   :  { %7267 = vst [vmem:[#allocation15_spill] sm:$0xff] %v5519_v1  ;;  %7268 = vst [vmem:[#allocation16_spill] sm:$0xff] %v5521_v0  ;;  %v510_v11 = vpop.f32.mrb[24].mxu0 }
 0x126   :  { %7269 = vst [vmem:[#allocation17_spill] sm:$0xff] %v5523_v8  ;;  %v623_v46 = vpop.f32.mrb[24].mxu1  ;;  %v511_v60 = vadd.f32 %v510_v11, %v5424_v52  ;;  %v512_v27 = vpop.f32.mrb[25].mxu0 }
 0x127   :  { %v624_v56 = vadd.f32 %v623_v46, %v5418_v50  ;;  %v625_v30 = vpop.f32.mrb[25].mxu1  ;;  %v513_v3 = vadd.f32 %v512_v27, %v5427_v54  ;;  %v514_v47 = vpop.f32.mrb[26].mxu0 }
 0x128   :  { %v626_v4 = vadd.f32 %v625_v30, %v5421_v51  ;;  %v627_v61 = vpop.f32.mrb[26].mxu1  ;;  %v515_v2 = vadd.f32 %v514_v47, %v5424_v52  ;;  %v516_v62 = vpop.f32.mrb[27].mxu0 }
 0x129   :  { %v628_v49 = vadd.f32 %v627_v61, %v5418_v50  ;;  %v629_v53 = vpop.f32.mrb[27].mxu1  ;;  %v517_v63 = vadd.f32 %v516_v62, %v5427_v54  ;;  %v116_v62 = vsub.s32 4, %v5406_v39 }
 0x12a   :  { %v630_v5 = vadd.f32 %v629_v53, %v5421_v51  ;;  %v5533_v6 = vpack.c.bf16 %v515_v2, %v511_v60 }
 0x12b   :  { %v5535_v46 = vpack.c.bf16 %v628_v49, %v624_v56  ;;  %v5537_v11 = vpack.c.bf16 %v517_v63, %v513_v3  ;;  %v120_v3 = vsub.s32 5, %v5406_v39 }
 0x12c   :  { %7270 = vst [vmem:[#allocation18_spill] sm:$0xff] %v5533_v6  ;;  %v5539_v27 = vpack.c.bf16 %v630_v5, %v626_v4 }
 0x12d   :  { %7271 = vst [vmem:[#allocation19_spill] sm:$0xff] %v5535_v46  ;;  %7272 = vst [vmem:[#allocation20_spill] sm:$0xff] %v5537_v11  ;;  %v520_v30 = vpop.f32.mrb[28].mxu0 }
 0x12e   :  { %v633_v1 = vpop.f32.mrb[28].mxu1  ;;  %v521_v47 = vadd.f32 %v520_v30, %v5424_v52  ;;  %v522_v0 = vpop.f32.mrb[29].mxu0 }
 0x12f   :  { %v634_v61 = vadd.f32 %v633_v1, %v5418_v50  ;;  %v635_v12 = vpop.f32.mrb[29].mxu1  ;;  %v523_v53 = vadd.f32 %v522_v0, %v5427_v54  ;;  %v524_v60 = vpop.f32.mrb[30].mxu0  ;;  %v5556_v0 = vrot.slane %v5414_v48, %v116_v62  ;;  %v1135_v62 = vunpack.c.h.bf16 %v5437_v7 }
 0x130   :  { %v636_v56 = vadd.f32 %v635_v12, %v5421_v51  ;;  %v637_v2 = vpop.f32.mrb[30].mxu1  ;;  %v525_v4 = vadd.f32 %v524_v60, %v5424_v52  ;;  %v526_v49 = vpop.f32.mrb[31].mxu0  ;;  %v5563_v52 = vrot.slane %v5414_v48, %v120_v3  ;;  %v1151_v48 = vunpack.c.h.bf16 %v5441_v10 }
 0x131   :  { %v638_v63 = vadd.f32 %v637_v2, %v5418_v50  ;;  %v639_v5 = vpop.f32.mrb[31].mxu1  ;;  %v527_v30 = vadd.f32 %v526_v49, %v5427_v54  ;;  %v1134_v50 = vunpack.c.l.bf16 %v5437_v7 }
 0x132   :  { %v640_v1 = vadd.f32 %v639_v5, %v5421_v51  ;;  %v5551_v46 = vpack.c.bf16 %v525_v4, %v521_v47  ;;  %v1150_v51 = vunpack.c.l.bf16 %v5441_v10 }
 0x133   :  { %v5553_v11 = vpack.c.bf16 %v638_v63, %v634_v61  ;;  %v5558_v12 = vpack.c.bf16 %v527_v30, %v523_v53 }
 0x134   :  { %7273 = vst [vmem:[#allocation21_spill] sm:$0xff] %v5551_v46  ;;  %v5560_v39 = vpack.c.bf16 %v640_v1, %v636_v56 }
 0x135   :  { %7274 = vst [vmem:[#allocation22_spill] sm:$0xff] %v5553_v11  ;;  %7275 = vst [vmem:[#allocation23_spill] sm:$0xff] %v5558_v12  ;;  %v676_v60 = vpop.f32.mrb[32].mxu0 }
 0x136   :  { %v1084_v54 = vpop.f32.mrb[32].mxu1  ;;  %v677_v47 = vadd.f32 %v676_v60, %v5556_v0  ;;  %v678_v2 = vpop.f32.mrb[33].mxu0 }
 0x137   :  { %v1136_v61 = vadd.f32 %v1134_v50, %v1084_v54  ;;  %v1086_v4 = vpop.f32.mrb[33].mxu1  ;;  %v679_v53 = vadd.f32 %v678_v2, %v5563_v52  ;;  %v680_v49 = vpop.f32.mrb[34].mxu0 }
 0x138   :  { %v1152_v56 = vadd.f32 %v1150_v51, %v1086_v4  ;;  %v1088_v63 = vpop.f32.mrb[34].mxu1  ;;  %v681_v5 = vadd.f32 %v680_v49, %v5556_v0  ;;  %v682_v1 = vpop.f32.mrb[35].mxu0 }
 0x139   :  { %v3607_v3 = vmul.f32 -1.442695, %v1136_v61  ;;  %v1137_v30 = vadd.f32 %v1135_v62, %v1088_v63  ;;  %v1090_v11 = vpop.f32.mrb[35].mxu1  ;;  %v683_v60 = vadd.f32 %v682_v1, %v5563_v52 }
 0x13a   :  { %v1153_v50 = vadd.f32 %v1151_v48, %v1090_v11  ;;  %v5573_v54 = vpack.c.bf16 %v681_v5, %v677_v47  ;;  %v3609_v47 = vmul.f32 -1.442695, %v1152_v56 }
 0x13b   :  { %v3608_v12 = vmul.f32 -1.442695, %v1137_v30  ;;  %v5575_v7 = vpack.c.bf16 %v683_v60, %v679_v53  ;;  %4348 = vpow2.f32 %v3607_v3 }
 0x13c   :  { %7276 = vst [vmem:[#allocation24_spill] sm:$0xff] %v5573_v54  ;;  %v3610_v53 = vmul.f32 -1.442695, %v1153_v50 }
 0x13d   :  { %7277 = vst [vmem:[#allocation25_spill] sm:$0xff] %v5575_v7  ;;  %v686_v51 = vpop.f32.mrb[36].mxu0  ;;  %4350 = vpow2.f32 %v3608_v12 }
 0x13e   :  { %v687_v2 = vadd.f32 %v686_v51, %v5556_v0  ;;  %v688_v10 = vpop.f32.mrb[37].mxu0  ;;  %4352 = vpow2.f32 %v3609_v47 }
 0x13f   :  { %v689_v61 = vadd.f32 %v688_v10, %v5563_v52  ;;  %v690_v4 = vpop.f32.mrb[38].mxu0  ;;  %4354 = vpow2.f32 %v3610_v53 }
 0x140   :  { %v691_v62 = vadd.f32 %v690_v4, %v5556_v0  ;;  %v692_v49 = vpop.f32.mrb[39].mxu0 }
 0x141   :  { %v693_v63 = vadd.f32 %v692_v49, %v5563_v52 }
 0x142   :  { %v5581_v11 = vpack.c.bf16 %v691_v62, %v687_v2 }
 0x143   :  { %v5583_v48 = vpack.c.bf16 %v693_v63, %v689_v61 }
 0x144   :  { %7278 = vst [vmem:[#allocation26_spill] sm:$0xff] %v5581_v11 }
 0x145   :  { %7279 = vst [vmem:[#allocation27_spill] sm:$0xff] %v5583_v48  ;;  %v696_v3 = vpop.f32.mrb[40].mxu0  ;;  %v4349_v5 = vpop.eup %4348 }
 0x146   :  { %v697_v12 = vadd.f32 %v696_v3, %v5556_v0  ;;  %v698_v30 = vpop.f32.mrb[41].mxu0  ;;  %v1144_v49 = vadd.f32 1.0, %v4349_v5 }
 0x147   :  { %v699_v1 = vadd.f32 %v698_v30, %v5563_v52  ;;  %v700_v60 = vpop.f32.mrb[42].mxu0  ;;  %v4351_v51 = vpop.eup %4350 }
 0x148   :  { %v701_v10 = vadd.f32 %v700_v60, %v5556_v0  ;;  %v702_v4 = vpop.f32.mrb[43].mxu0  ;;  %v1145_v50 = vadd.f32 1.0, %v4351_v51  ;;  %4356 = vrcp.f32 %v1144_v49  ;;  %v4353_v53 = vpop.eup %4352 }
 0x149   :  { %v703_v56 = vadd.f32 %v702_v4, %v5563_v52  ;;  %v4355_v51 = vpop.eup %4354  ;;  %v1160_v49 = vadd.f32 1.0, %v4353_v53 }
 0x14a   :  { %v5589_v2 = vpack.c.bf16 %v701_v10, %v697_v12  ;;  %4358 = vrcp.f32 %v1145_v50  ;;  %v5604_v10 = vld [vmem:[%s7145_s5] ss:$0 sm:$0xff] }
 0x14b   :  { %v5591_v61 = vpack.c.bf16 %v703_v56, %v699_v1  ;;  %4360 = vrcp.f32 %v1160_v49 }
 0x14c   :  { %7280 = vst [vmem:[#allocation28_spill] sm:$0xff] %v5589_v2 }
 0x14d   :  { %7281 = vst [vmem:[#allocation29_spill] sm:$0xff] %v5591_v61  ;;  %v706_v62 = vpop.f32.mrb[44].mxu0 }
 0x14e   :  { %v707_v63 = vadd.f32 %v706_v62, %v5556_v0  ;;  %v708_v47 = vpop.f32.mrb[45].mxu0  ;;  %v1161_v62 = vadd.f32 1.0, %v4355_v51 }
 0x14f   :  { %v709_v3 = vadd.f32 %v708_v47, %v5563_v52  ;;  %v710_v30 = vpop.f32.mrb[46].mxu0 }
 0x150   :  { %v711_v60 = vadd.f32 %v710_v30, %v5556_v0  ;;  %v712_v5 = vpop.f32.mrb[47].mxu0  ;;  %4362 = vrcp.f32 %v1161_v62 }
 0x151   :  { %v713_v4 = vadd.f32 %v712_v5, %v5563_v52 }
 0x152   :  { %v5597_v12 = vpack.c.bf16 %v711_v60, %v707_v63  ;;  %v4357_v63 = vpop.eup %4356  ;;  %v1176_v60 = vunpack.c.l.bf16 %v5439_v9 }
 0x153   :  { %v5599_v1 = vpack.c.bf16 %v713_v4, %v709_v3 }
 0x154   :  { %7282 = vst [vmem:[#allocation30_spill] sm:$0xff] %v5597_v12 }
 0x155   :  { %7283 = vst [vmem:[#allocation31_spill] sm:$0xff] %v5599_v1  ;;  %v716_v50 = vpop.f32.mrb[48].mxu0 }
 0x156   :  { %v1127_v56 = vpop.f32.mrb[36].mxu1  ;;  %v717_v30 = vadd.f32 %v716_v50, %v5556_v0  ;;  %v718_v5 = vpop.f32.mrb[49].mxu0  ;;  %v1177_v50 = vunpack.c.h.bf16 %v5439_v9 }
 0x157   :  { %v1172_v47 = vadd.f32 %v5604_v10, %v1127_v56  ;;  %v3899_v7 = vpop.f32.mrb[37].mxu1  ;;  %v719_v3 = vadd.f32 %v718_v5, %v5563_v52  ;;  %v720_v54 = vpop.f32.mrb[50].mxu0 }
 0x158   :  { %v1130_v4 = vpop.f32.mrb[38].mxu1  ;;  %v721_v48 = vadd.f32 %v720_v54, %v5556_v0  ;;  %v722_v51 = vpop.f32.mrb[51].mxu0 }
 0x159   :  { %v1174_v46 = vmul.f32 %v4357_v63, %v1172_v47  ;;  %v1173_v53 = vadd.f32 %v5604_v10, %v1130_v4  ;;  %v3900_v11 = vpop.f32.mrb[39].mxu1  ;;  %v4359_v56 = vpop.eup %4358  ;;  %v723_v7 = vadd.f32 %v722_v51, %v5563_v52 }
 0x15a   :  { %v5614_v2 = vpack.c.bf16 %v721_v48, %v717_v30  ;;  %v4361_v62 = vpop.eup %4360 }
 0x15b   :  { %v1178_v6 = vadd.f32 %v1176_v60, %v1174_v46  ;;  %v1175_v61 = vmul.f32 %v4359_v56, %v1173_v53  ;;  %v5616_v5 = vpack.c.bf16 %v723_v7, %v719_v3  ;;  %v5629_v3 = vld [vmem:[%s7146_s1] sm:$0xff]  ;;  %v5634_v53 = vld [vmem:[%s7146_s1 + $0x8] sm:$0xff] }
 0x15c   :  { %7284 = vst [vmem:[#allocation32_spill] sm:$0xff] %v5614_v2  ;;  %7288 = vst [vmem:[#allocation36_spill] sm:$0xff] %v5629_v3  ;;  %vm1462_vm1 = vcmp.gt.s32.totalorder %v5629_v3, 0  ;;  %vm7224_vm2 = vcmp.gt.s32.totalorder %v5634_v53, 0  ;;  %vm1464_vm4 = vcmp.gt.s32.totalorder %v5629_v3, 7  ;;  %vm1465_vm5 = vcmp.gt.s32.totalorder %v5634_v53, 7 }
 0x15d   :  { %7285 = vst [vmem:[#allocation33_spill] sm:$0xff] %v5616_v5  ;;  %4364 = vtanh.f32 %v1178_v6  ;;  %v1179_v49 = vadd.f32 %v1177_v50, %v1175_v61  ;;  %v726_v47 = vpop.f32.mrb[52].mxu0  ;;  %v4363_v6 = vpop.eup %4362  ;;  %v1182_v61 = vsub.f32 1.0, %v4361_v62  ;;  %7289 = vst [vmem:[#allocation37_spill] sm:$0xff] %v5634_v53  ;;  %v1581_v5 = vunpack.c.h.bf16 %v5457_v59 }
 0x15e   :  { %v727_v54 = vadd.f32 %v726_v47, %v5556_v0  ;;  %v728_v63 = vpop.f32.mrb[53].mxu0  ;;  %v1183_v47 = vsub.f32 1.0, %v4363_v6  ;;  %vm3643_vm3 = vmpackc.low %vm7224_vm2, %vm1462_vm1  ;;  %vm1753_vm7 = vcmp.gt.s32.totalorder %v5629_v3, 1  ;;  %vm1754_vm8 = vcmp.gt.s32.totalorder %v5634_v53, 1 }
 0x15f   :  { %4366 = vtanh.f32 %v1179_v49  ;;  %v729_v11 = vadd.f32 %v728_v63, %v5563_v52  ;;  %v730_v4 = vpop.f32.mrb[54].mxu0  ;;  %v1186_v49 = vmul.f32 0.0, %v4361_v62  ;;  %vm3653_vm6 = vmpackc.low %vm1465_vm5, %vm1464_vm4  ;;  %vm1755_vm9 = vcmp.gt.s32.totalorder %v5629_v3, 6 }
 0x160   :  { %v731_v9 = vadd.f32 %v730_v4, %v5556_v0  ;;  %v732_v51 = vpop.f32.mrb[55].mxu0  ;;  %vm1756_vm10 = vcmp.gt.s32.totalorder %v5634_v53, 6  ;;  %vm2049_vm11 = vcmp.gt.s32.totalorder %v5629_v3, 2  ;;  %vm2050_vm12 = vcmp.gt.s32.totalorder %v5634_v53, 2 }
 0x161   :  { %v733_v46 = vadd.f32 %v732_v51, %v5563_v52 }
 0x162   :  { %v5622_v48 = vpack.c.bf16 %v731_v9, %v727_v54 }
 0x163   :  { %v5624_v30 = vpack.c.bf16 %v733_v46, %v729_v11  ;;  %v1187_v46 = vmul.f32 0.0, %v4363_v6 }
 0x164   :  { %7286 = vst [vmem:[#allocation34_spill] sm:$0xff] %v5622_v48 }
 0x165   :  { %7287 = vst [vmem:[#allocation35_spill] sm:$0xff] %v5624_v30  ;;  %v736_v60 = vpop.f32.mrb[56].mxu0 }
 0x166   :  { %v737_v50 = vadd.f32 %v736_v60, %v5556_v0  ;;  %v738_v7 = vpop.f32.mrb[57].mxu0 }
 0x167   :  { %v4365_v56 = vpop.eup %4364  ;;  %v739_v54 = vadd.f32 %v738_v7, %v5563_v52  ;;  %v740_v63 = vpop.f32.mrb[58].mxu0 }
 0x168   :  { %v1184_v11 = vmul.f32 %v4365_v56, %v1182_v61  ;;  %v741_v9 = vadd.f32 %v740_v63, %v5556_v0  ;;  %v742_v51 = vpop.f32.mrb[59].mxu0 }
 0x169   :  { %v4367_v4 = vpop.eup %4366  ;;  %v743_v1 = vadd.f32 %v742_v51, %v5563_v52  ;;  %v7291_v51 = vmov 0  }
 0x16a   :  { %v1185_v12 = vmul.f32 %v4367_v4, %v1183_v47  ;;  %v1188_v60 = vadd.f32 %v1186_v49, %v1184_v11  ;;  %v5642_v15 = vpack.c.bf16 %v741_v9, %v737_v50  ;;  %v7290_v4 = vmov 0.0  }
 0x16b   :  { %v5644_v62 = vpack.c.bf16 %v743_v1, %v739_v54 }
 0x16c   :  { %v1189_v7 = vadd.f32 %v1187_v46, %v1185_v12  ;;  %v5648_v61 = vsel %vm1462_vm1, %v1188_v60, 0.0  ;;  %v7328_v3 = vld [vmem:[#allocation35_spill] sm:$0xff] }
 0x16d   :  { %1470 = vst [vmem:[%s7147_s8] sm:$0xff] %v5648_v61  ;;  %v746_v6 = vpop.f32.mrb[60].mxu0 }
 0x16e   :  { %v3644_v56 = vpack.c.bf16 %v1189_v7, %v1188_v60  ;;  %v5660_v1 = vsel %vm7224_vm2, %v1189_v7, 0.0  ;;  %v748_v12 = vpop.f32.mrb[61].mxu0  ;;  %v747_v49 = vadd.f32 %v746_v6, %v5556_v0  ;;  %v1407_v7 = vunpack.c.h.bf16 %v5560_v39 }
 0x16f   :  { %1471 = vst [vmem:[%s7147_s8 + $0x10] sm:$0xff] %v5660_v1  ;;  %v750_v50 = vpop.f32.mrb[62].mxu0  ;;  %v749_v63 = vadd.f32 %v748_v12, %v5563_v52 }
 0x170   :  { %3645 = vmatmul.mubr.msk.bf16.vlgmr.msra.gmra.mrb[68].mxu0 %vm3643_vm3, %v3644_v56  ;;  %3938 = vmatmul.mubr.msk.bf16.vlgmr.msra.gmra.mrb[44].mxu1 %vm3643_vm3, %v3644_v56  ;;  %v751_v47 = vadd.f32 %v750_v50, %v5556_v0  ;;  %v752_v54 = vpop.f32.mrb[63].mxu0 }
 0x171   :  { %1620 = vmatpush1.bf16.msra.mxu0 %v5152_v13  ;;  %3942 = vmatpush3.bf16.msra.mxu1 %v5302_v36  ;;  %v753_v11 = vadd.f32 %v752_v54, %v5563_v52  ;;  %v1406_v13 = vunpack.c.l.bf16 %v5560_v39 }
 0x172   :  { %1621 = vmatprep.subr.bf16.mxu0 %v5157_v14  ;;  %3943 = vmatprep.subr.bf16.mxu1 %v7290_v4  ;;  %v801_v9 = vpack.c.bf16 %v751_v47, %v747_v49 }
 0x173   :  { %1651 = vmatprep.mubr.bf16.mxu0 %v7291_v51  ;;  %3957 = vmatprep.mubr.msk.bf16.mxu1 %vm4772_vm0, %v7290_v4  ;;  %v5677_v0 = vpack.c.bf16 %v753_v11, %v749_v63 }
 0x174   :  { %v1422_v46 = vunpack.c.l.bf16 %v801_v9  ;;  %v1423_v50 = vunpack.c.h.bf16 %v801_v9 }
 0x175   :  { %1622 = vmatpush1.bf16.msra.mxu0 %v5171_v16  ;;  %3944 = vmatpush3.bf16.msra.mxu1 %v5314_v37  ;;  %v1356_v36 = vpop.f32.mrb[64].mxu0  ;;  %v1449_v11 = vunpack.c.h.bf16 %v5677_v0 }
 0x176   :  { %v1399_v52 = vpop.f32.mrb[40].mxu1  ;;  %1623 = vmatprep.subr.bf16.mxu0 %v5178_v17  ;;  %3945 = vmatprep.subr.bf16.mxu1 %v7290_v4  ;;  %v1408_v14 = vadd.f32 %v1406_v13, %v1356_v36  ;;  %v1358_v60 = vpop.f32.mrb[65].mxu0 }
 0x177   :  { %v3919_v6 = vpop.f32.mrb[41].mxu1  ;;  %v1424_v56 = vadd.f32 %v1422_v46, %v1358_v60  ;;  %v1360_v12 = vpop.f32.mrb[66].mxu0 }
 0x178   :  { %v1402_v49 = vpop.f32.mrb[42].mxu1  ;;  %v3636_v47 = vmul.f32 -1.442695, %v1408_v14  ;;  %v1409_v54 = vadd.f32 %v1407_v7, %v1360_v12  ;;  %v1362_v16 = vpop.f32.mrb[67].mxu0 }
 0x179   :  { %v3920_v63 = vpop.f32.mrb[43].mxu1  ;;  %1624 = vmatpush1.bf16.msra.mxu0 %v5195_v19  ;;  %3946 = vmatpush3.bf16.msra.mxu1 %v5323_v35  ;;  %v1425_v17 = vadd.f32 %v1423_v50, %v1362_v16  ;;  %v3638_v39 = vmul.f32 -1.442695, %v1424_v56 }
 0x17a   :  { %1625 = vmatprep.subr.bf16.mxu0 %v5200_v20  ;;  %3947 = vmatprep.subr.bf16.mxu1 %v7290_v4  ;;  %4368 = vpow2.f32 %v3636_v47  ;;  %v3637_v37 = vmul.f32 -1.442695, %v1409_v54 }
 0x17b   :  { %v3639_v19 = vmul.f32 -1.442695, %v1425_v17  ;;  %v5748_v17 = vld [vmem:[%s7142_s4] ss:$12 sps:$4 sm:$0xff]  }
 0x17c   :  { %4370 = vpow2.f32 %v3637_v37  ;;  %v5754_v37 = vld [vmem:[%s7142_s4 + $0x8] ss:$12 sps:$4 sm:$0xff]  }
 0x17d   :  { %1626 = vmatpush1.bf16.msra.mxu0 %v5215_v22  ;;  %3948 = vmatpush3.bf16.msra.mxu1 %v5332_v40  ;;  %4372 = vpow2.f32 %v3638_v39  ;;  %v5760_v39 = vld [vmem:[%s7142_s4 + $0x1c] ss:$12 sps:$4 sm:$0xff]  }
 0x17e   :  { %1627 = vmatprep.subr.bf16.mxu0 %v5221_v23  ;;  %3949 = vmatprep.subr.bf16.mxu1 %v7290_v4  ;;  %4374 = vpow2.f32 %v3639_v19  ;;  %v5770_v19 = vld [vmem:[%s7142_s4 + $0x18] ss:$12 sps:$4 sm:$0xff]  }
 0x181   :  { %1628 = vmatpush1.bf16.msra.mxu0 %v5234_v25  ;;  %3950 = vmatpush3.bf16.msra.mxu1 %v5339_v41 }
 0x182   :  { %1629 = vmatprep.subr.bf16.mxu0 %v5240_v26  ;;  %3951 = vmatprep.subr.bf16.mxu1 %v7290_v4 }
 0x184   :  { %v4369_v20 = vpop.eup %4368 }
 0x185   :  { %1630 = vmatpush1.bf16.msra.mxu0 %v5255_v28  ;;  %3952 = vmatpush3.bf16.msra.mxu1 %v5348_v43  ;;  %v1416_v22 = vadd.f32 1.0, %v4369_v20  ;;  %v5708_v28 = vld [vmem:[%s7148_s7] ss:$0 sm:$0xff]  ;;  %v1448_v43 = vunpack.c.l.bf16 %v5677_v0 }
 0x186   :  { %1631 = vmatprep.subr.bf16.mxu0 %v5261_v29  ;;  %3953 = vmatprep.subr.bf16.mxu1 %v7290_v4  ;;  %v4371_v23 = vpop.eup %4370  ;;  %v1444_v35 = vadd.f32 %v5708_v28, %v1399_v52  ;;  %v5776_v20 = vld [vmem:[%s7142_s4 + $0x20] ss:$12 sps:$4 sm:$0xff]  }
 0x187   :  { %4376 = vrcp.f32 %v1416_v22  ;;  %v1417_v25 = vadd.f32 1.0, %v4371_v23  ;;  %v4373_v26 = vpop.eup %4372  ;;  %v5782_v22 = vld [vmem:[%s7142_s4 + $0x34] ss:$12 sps:$4 sm:$0xff]   ;;  %v5789_v23 = vld [vmem:[%s7142_s4 + $0x30] ss:$12 sps:$4 sm:$0xff]  }
 0x188   :  { %v4375_v29 = vpop.eup %4374 }
 0x189   :  { %1632 = vmatpush1.bf16.msra.mxu0 %v5274_v31  ;;  %3954 = vmatpush3.bf16.msra.mxu1 %v5355_v44  ;;  %4378 = vrcp.f32 %v1417_v25  ;;  %v5715_v31 = vld [vmem:[%s7142_s4 + $0x4] ss:$12 sps:$4 sm:$0xff]   ;;  %v1433_v40 = vadd.f32 1.0, %v4375_v29  ;;  %v1445_v44 = vadd.f32 %v5708_v28, %v1402_v49  ;;  %v5808_v29 = vld [vmem:[%s7142_s4 + $0x48] ss:$12 sps:$4 sm:$0xff]  }
 0x18a   :  { %1633 = vmatprep.subr.bf16.mxu0 %v5280_v32  ;;  %3955 = vmatprep.subr.bf16.mxu1 %v7290_v4  ;;  %7292 = vst [vmem:[#allocation38_spill] sm:$0xff] %v5715_v31  ;;  %v1432_v32 = vadd.f32 1.0, %v4373_v26  ;;  %v5795_v25 = vld [vmem:[%s7142_s4 + $0x38] ss:$12 sps:$4 sm:$0xff]  }
 0x18b   :  { %v5801_v26 = vld [vmem:[%s7142_s4 + $0x4c] ss:$12 sps:$4 sm:$0xff]  }
 0x18c   :  { %4380 = vrcp.f32 %v1432_v32  ;;  %v5814_v32 = vld [vmem:[%s7142_s4 + $0x50] ss:$12 sps:$4 sm:$0xff]  }
 0x18d   :  { %1634 = vmatpush1.bf16.msra.mxu0 %v5295_v34  ;;  %3956 = vmatpush3.bf16.msra.mxu1 %v5364_v45  ;;  %4382 = vrcp.f32 %v1433_v40  ;;  %v5827_v40 = vld [vmem:[%s7142_s4 + $0x60] ss:$12 sps:$4 sm:$0xff]  }
 0x18e   :  { %1776 = vmatprep.subr.bf16.mxu0 %v5715_v31  ;;  %3961 = vmatprep.subr.bf16.mxu1 %v7290_v4 }
 0x191   :  { %v4377_v41 = vpop.eup %4376  ;;  %v7327_v53 = vld [vmem:[#allocation38_spill] sm:$0xff] }
 0x192   :  { %v1446_v34 = vmul.f32 %v4377_v41, %v1444_v35  ;;  %v5820_v35 = vld [vmem:[%s7142_s4 + $0x64] ss:$12 sps:$4 sm:$0xff]   ;;  %v5833_v41 = vld [vmem:[%s7142_s4 + $0x68] ss:$12 sps:$4 sm:$0xff]  }
 0x193   :  { %v4379_v45 = vpop.eup %4378 }
 0x194   :  { %v1450_v9 = vadd.f32 %v1448_v43, %v1446_v34  ;;  %v1447_v13 = vmul.f32 %v4379_v45, %v1445_v44  ;;  %v5839_v43 = vld [vmem:[%s7142_s4 + $0x7c] ss:$12 sps:$4 sm:$0xff]   ;;  %v5846_v34 = vld [vmem:[%s7142_s4 + $0x78] ss:$12 sps:$4 sm:$0xff]   ;;  %v5852_v44 = vld [vmem:[%s7142_s4 + $0x80] ss:$12 sps:$4 sm:$0xff]  }
 0x195   :  { %v5858_v45 = vld [vmem:[%s7142_s4 + $0x94] ss:$12 sps:$4 sm:$0xff]  }
 0x196   :  { %4384 = vtanh.f32 %v1450_v9  ;;  %v1451_v46 = vadd.f32 %v1449_v11, %v1447_v13  ;;  %v4381_v36 = vpop.eup %4380  ;;  %v5865_v11 = vld [vmem:[%s7142_s4 + $0x90] ss:$12 sps:$4 sm:$0xff]   ;;  %v5871_v9 = vld [vmem:[%s7142_s4 + $0x98] ss:$12 sps:$4 sm:$0xff]  }
 0x197   :  { %v4383_v14 = vpop.eup %4382  ;;  %v1454_v52 = vsub.f32 1.0, %v4381_v36  ;;  %v1458_v7 = vmul.f32 0.0, %v4381_v36  ;;  %v5877_v13 = vld [vmem:[%s7142_s4 + $0xac] ss:$12 sps:$4 sm:$0xff]   ;;  %v5890_v36 = vld [vmem:[%s7142_s4 + $0xb0] ss:$12 sps:$4 sm:$0xff]  }
 0x198   :  { %4386 = vtanh.f32 %v1451_v46  ;;  %v1455_v6 = vsub.f32 1.0, %v4383_v14  ;;  %v1459_v50 = vmul.f32 0.0, %v4383_v14  ;;  %v5884_v46 = vld [vmem:[%s7142_s4 + $0xa8] ss:$12 sps:$4 sm:$0xff]   ;;  %v5896_v14 = vld [vmem:[%s7143_s6 + $0x4] ss:$12 sps:$4 sm:$0xff]  }
 0x1a0   :  { %v4385_v60 = vpop.eup %4384 }
 0x1a1   :  { %v1456_v56 = vmul.f32 %v4385_v60, %v1454_v52  ;;  %v1564_v52 = vunpack.c.l.bf16 %v5453_v57 }
 0x1a2   :  { %v4387_v12 = vpop.eup %4386 }
 0x1a3   :  { %v1457_v49 = vmul.f32 %v4387_v12, %v1455_v6  ;;  %v1460_v47 = vadd.f32 %v1458_v7, %v1456_v56  ;;  %v1580_v6 = vunpack.c.l.bf16 %v5457_v59 }
 0x1a5   :  { %v1461_v0 = vadd.f32 %v1459_v50, %v1457_v49  ;;  %v5727_v54 = vsel %vm1464_vm4, %v1460_v47, 0.0  ;;  %v1565_v49 = vunpack.c.h.bf16 %v5453_v57 }
 0x1a6   :  { %3641 = vst [vmem:[%s7147_s8 + $0xe8] sm:$0xff] %v5727_v54 }
 0x1a7   :  { %v3654_v16 = vpack.c.bf16 %v1461_v0, %v1460_v47  ;;  %v5739_v63 = vsel %vm1465_vm5, %v1461_v0, 0.0 }
 0x1a8   :  { %3642 = vst [vmem:[%s7147_s8 + $0xf8] sm:$0xff] %v5739_v63 }
 0x1a9   :  { %3655 = vmatmul.mubr.msk.bf16.vlgmr.msra.gmra.mrb[72].mxu0 %vm3653_vm6, %v3654_v16  ;;  %3958 = vmatmul.mubr.msk.bf16.vlgmr.msra.gmra.mrb[48].mxu1 %vm3653_vm6, %v3654_v16 }
 0x1aa   :  { %1777 = vmatpush1.bf16.msra.mxu0 %v5748_v17  ;;  %3962 = vmatpush3.bf16.msra.mxu1 %v5754_v37 }
 0x1ab   :  { %1778 = vmatprep.subr.bf16.mxu0 %v5760_v39  ;;  %3963 = vmatprep.subr.bf16.mxu1 %v7290_v4 }
 0x1ac   :  { %1808 = vmatprep.mubr.bf16.mxu0 %v7291_v51  ;;  %3977 = vmatprep.mubr.msk.bf16.mxu1 %vm4772_vm0, %v7290_v4 }
 0x1ae   :  { %1779 = vmatpush1.bf16.msra.mxu0 %v5770_v19  ;;  %3964 = vmatpush3.bf16.msra.mxu1 %v5776_v20 }
 0x1af   :  { %1780 = vmatprep.subr.bf16.mxu0 %v5782_v22  ;;  %3965 = vmatprep.subr.bf16.mxu1 %v7290_v4 }
 0x1b2   :  { %1781 = vmatpush1.bf16.msra.mxu0 %v5789_v23  ;;  %3966 = vmatpush3.bf16.msra.mxu1 %v5795_v25 }
 0x1b3   :  { %1782 = vmatprep.subr.bf16.mxu0 %v5801_v26  ;;  %3967 = vmatprep.subr.bf16.mxu1 %v7290_v4 }
 0x1b6   :  { %1783 = vmatpush1.bf16.msra.mxu0 %v5808_v29  ;;  %3968 = vmatpush3.bf16.msra.mxu1 %v5814_v32 }
 0x1b7   :  { %1784 = vmatprep.subr.bf16.mxu0 %v5820_v35  ;;  %3969 = vmatprep.subr.bf16.mxu1 %v7290_v4 }
 0x1ba   :  { %1785 = vmatpush1.bf16.msra.mxu0 %v5827_v40  ;;  %3970 = vmatpush3.bf16.msra.mxu1 %v5833_v41 }
 0x1bb   :  { %1786 = vmatprep.subr.bf16.mxu0 %v5839_v43  ;;  %3971 = vmatprep.subr.bf16.mxu1 %v7290_v4 }
 0x1be   :  { %1787 = vmatpush1.bf16.msra.mxu0 %v5846_v34  ;;  %3972 = vmatpush3.bf16.msra.mxu1 %v5852_v44 }
 0x1bf   :  { %1788 = vmatprep.subr.bf16.mxu0 %v5858_v45  ;;  %3973 = vmatprep.subr.bf16.mxu1 %v7290_v4 }
 0x1c2   :  { %1789 = vmatpush1.bf16.msra.mxu0 %v5865_v11  ;;  %3974 = vmatpush3.bf16.msra.mxu1 %v5871_v9 }
 0x1c3   :  { %1790 = vmatprep.subr.bf16.mxu0 %v5877_v13  ;;  %3975 = vmatprep.subr.bf16.mxu1 %v7290_v4 }
 0x1c6   :  { %1791 = vmatpush1.bf16.msra.mxu0 %v5884_v46  ;;  %3976 = vmatpush3.bf16.msra.mxu1 %v5890_v36 }
 0x1c7   :  { %1915 = vmatprep.subr.bf16.mxu0 %v5896_v14  ;;  %3981 = vmatprep.subr.bf16.mxu1 %v7290_v4 }
 0x243   :  { %v1514_v60 = vpop.f32.mrb[68].mxu0  ;;  %v1557_v7 = vpop.f32.mrb[44].mxu1 }
 0x244   :  { %v1566_v56 = vadd.f32 %v1564_v52, %v1514_v60  ;;  %v1516_v12 = vpop.f32.mrb[69].mxu0  ;;  %v3939_v50 = vpop.f32.mrb[45].mxu1 }
 0x245   :  { %v1582_v47 = vadd.f32 %v1580_v6, %v1516_v12  ;;  %v1518_v0 = vpop.f32.mrb[70].mxu0  ;;  %v1560_v16 = vpop.f32.mrb[46].mxu1  ;;  %v1596_v50 = vadd.f32 %v5604_v10, %v1557_v7 }
 0x246   :  { %v3649_v2 = vmul.f32 -1.442695, %v1566_v56  ;;  %v1567_v55 = vadd.f32 %v1565_v49, %v1518_v0  ;;  %v1520_v21 = vpop.f32.mrb[71].mxu0  ;;  %v3940_v24 = vpop.f32.mrb[47].mxu1 }
 0x247   :  { %v1583_v18 = vadd.f32 %v1581_v5, %v1520_v21  ;;  %v3651_v48 = vmul.f32 -1.442695, %v1582_v47  ;;  %v1601_v5 = vunpack.c.h.bf16 %v5455_v58 }
 0x248   :  { %4388 = vpow2.f32 %v3649_v2  ;;  %v3650_v30 = vmul.f32 -1.442695, %v1567_v55  ;;  %v1600_v55 = vunpack.c.l.bf16 %v5455_v58 }
 0x249   :  { %v3652_v8 = vmul.f32 -1.442695, %v1583_v18  ;;  %v1597_v18 = vadd.f32 %v5604_v10, %v1560_v16 }
 0x24a   :  { %4390 = vpow2.f32 %v3650_v30 }
 0x24b   :  { %4392 = vpow2.f32 %v3651_v48 }
 0x24c   :  { %4394 = vpow2.f32 %v3652_v8 }
 0x252   :  { %v4389_v52 = vpop.eup %4388 }
 0x253   :  { %v1574_v60 = vadd.f32 1.0, %v4389_v52 }
 0x254   :  { %v4391_v57 = vpop.eup %4390 }
 0x255   :  { %4396 = vrcp.f32 %v1574_v60  ;;  %v1575_v6 = vadd.f32 1.0, %v4391_v57  ;;  %v4393_v12 = vpop.eup %4392 }
 0x256   :  { %v4395_v59 = vpop.eup %4394  ;;  %v1590_v56 = vadd.f32 1.0, %v4393_v12 }
 0x257   :  { %4398 = vrcp.f32 %v1575_v6  ;;  %v1591_v24 = vadd.f32 1.0, %v4395_v59 }
 0x258   :  { %4400 = vrcp.f32 %v1590_v56 }
 0x259   :  { %4402 = vrcp.f32 %v1591_v24 }
 0x25f   :  { %v4397_v21 = vpop.eup %4396 }
 0x260   :  { %v1598_v2 = vmul.f32 %v4397_v21, %v1596_v50 }
 0x261   :  { %v4399_v8 = vpop.eup %4398 }
 0x262   :  { %v1602_v48 = vadd.f32 %v1600_v55, %v1598_v2  ;;  %v1599_v30 = vmul.f32 %v4399_v8, %v1597_v18  ;;  %v4401_v47 = vpop.eup %4400  ;;  %v5949_v18 = vld [vmem:[%s7143_s6 + $0x1c] ss:$12 sps:$4 sm:$0xff]   ;;  %v1703_v8 = vunpack.c.l.bf16 %v5539_v27 }
 0x263   :  { %v4403_v0 = vpop.eup %4402  ;;  %v1606_v7 = vsub.f32 1.0, %v4401_v47  ;;  %v1610_v6 = vmul.f32 %v4401_v47, %v5648_v61  ;;  %v5969_v47 = vld [vmem:[%s7143_s6 + $0x20] ss:$12 sps:$4 sm:$0xff]  }
 0x264   :  { %4404 = vtanh.f32 %v1602_v48  ;;  %v1603_v49 = vadd.f32 %v1601_v5, %v1599_v30  ;;  %v1607_v60 = vsub.f32 1.0, %v4403_v0  ;;  %v1611_v58 = vmul.f32 %v4403_v0, %v5660_v1 }
 0x265   :  { %v1719_v30 = vunpack.c.l.bf16 %v5642_v15 }
 0x266   :  { %4406 = vtanh.f32 %v1603_v49  ;;  %v5963_v49 = vld [vmem:[%s7143_s6 + $0x18] ss:$12 sps:$4 sm:$0xff]  }
 0x26e   :  { %v4405_v52 = vpop.eup %4404 }
 0x26f   :  { %v1608_v57 = vmul.f32 %v4405_v52, %v1606_v7 }
 0x270   :  { %v4407_v12 = vpop.eup %4406 }
 0x271   :  { %v1609_v16 = vmul.f32 %v4407_v12, %v1607_v60  ;;  %v1612_v59 = vadd.f32 %v1610_v6, %v1608_v57  ;;  %v1704_v60 = vunpack.c.h.bf16 %v5539_v27  ;;  %v5976_v57 = vld [vmem:[%s7143_s6 + $0x34] ss:$12 sps:$4 sm:$0xff]  }
 0x273   :  { %v1613_v56 = vadd.f32 %v1611_v58, %v1609_v16  ;;  %v1761_v50 = vsel %vm1753_vm7, %v1612_v59, 0.0  ;;  %v5920_v24 = vsel %vm1753_vm7, %v1612_v59, %v5648_v61  ;;  %v5937_v61 = vld [vmem:[%s7143_s6] ss:$12 sps:$4 sm:$0xff]   ;;  %v1720_v58 = vunpack.c.h.bf16 %v5642_v15 }
 0x274   :  { %3663 = vst [vmem:[%s7147_s8 + $0x20] sm:$0xff] %v1761_v50 }
 0x275   :  { %v5925_v21 = vsel %vm1754_vm8, %v1613_v56, %v5660_v1  ;;  %v1762_v55 = vsel %vm1754_vm8, %v1613_v56, 0.0  ;;  %v5943_v1 = vld [vmem:[%s7143_s6 + $0x8] ss:$12 sps:$4 sm:$0xff]  }
 0x276   :  { %3664 = vst [vmem:[%s7147_s8 + $0x30] sm:$0xff] %v1762_v55  ;;  %v1775_v2 = vpack.c.bf16 %v5925_v21, %v5920_v24 }
 0x278   :  { %1809 = vmatmul.mubr.bf16.vlgmr.msra.gmra.mrb[76].mxu0 %v1775_v2  ;;  %3978 = vmatmul.mubr.bf16.vlgmr.msra.gmra.mrb[52].mxu1 %v1775_v2  ;;  %v5986_v2 = vld [vmem:[%s7143_s6 + $0x30] ss:$12 sps:$4 sm:$0xff]  }
 0x279   :  { %1916 = vmatpush1.bf16.msra.mxu0 %v5937_v61  ;;  %3982 = vmatpush3.bf16.msra.mxu1 %v5943_v1 }
 0x27a   :  { %1917 = vmatprep.subr.bf16.mxu0 %v5949_v18  ;;  %3983 = vmatprep.subr.bf16.mxu1 %v7290_v4 }
 0x27b   :  { %1947 = vmatprep.mubr.bf16.mxu0 %v7291_v51  ;;  %3997 = vmatprep.mubr.msk.bf16.mxu1 %vm4772_vm0, %v7290_v4 }
 0x27c   :  { %v1653_v5 = vpop.f32.mrb[72].mxu0  ;;  %v5957_v48 = vpop.f32.mrb[48].mxu1 }
 0x27d   :  { %1918 = vmatpush1.bf16.msra.mxu0 %v5963_v49  ;;  %3984 = vmatpush3.bf16.msra.mxu1 %v5969_v47  ;;  %v1705_v0 = vadd.f32 %v1703_v8, %v1653_v5  ;;  %v1655_v7 = vpop.f32.mrb[73].mxu0  ;;  %v3959_v52 = vpop.f32.mrb[49].mxu1  ;;  %v5992_v8 = vld [vmem:[%s7143_s6 + $0x38] ss:$12 sps:$4 sm:$0xff]  }
 0x27e   :  { %1919 = vmatprep.subr.bf16.mxu0 %v5976_v57  ;;  %3985 = vmatprep.subr.bf16.mxu1 %v7290_v4  ;;  %v1721_v6 = vadd.f32 %v1719_v30, %v1655_v7  ;;  %v1657_v12 = vpop.f32.mrb[74].mxu0  ;;  %v5980_v16 = vpop.f32.mrb[50].mxu1  ;;  %7293 = vst [vmem:[#allocation39_spill] sm:$0xff] %v5992_v8  ;;  %v5998_v5 = vld [vmem:[%s7143_s6 + $0x4c] ss:$12 sps:$4 sm:$0xff]  }
 0x27f   :  { %v3659_v59 = vmul.f32 -1.442695, %v1705_v0  ;;  %v1706_v56 = vadd.f32 %v1704_v60, %v1657_v12  ;;  %v1659_v50 = vpop.f32.mrb[75].mxu0  ;;  %v3960_v55 = vpop.f32.mrb[51].mxu1  ;;  %7294 = vst [vmem:[#allocation40_spill] sm:$0xff] %v5998_v5 }
 0x280   :  { %v1722_v27 = vadd.f32 %v1720_v58, %v1659_v50  ;;  %v3661_v30 = vmul.f32 -1.442695, %v1721_v6  ;;  %v6005_v0 = vld [vmem:[%s7143_s6 + $0x48] ss:$12 sps:$4 sm:$0xff]   ;;  %v6011_v7 = vld [vmem:[%s7143_s6 + $0x50] ss:$12 sps:$4 sm:$0xff]  }
 0x281   :  { %1920 = vmatpush1.bf16.msra.mxu0 %v5986_v2  ;;  %3986 = vmatpush3.bf16.msra.mxu1 %v5992_v8  ;;  %4408 = vpow2.f32 %v3659_v59  ;;  %v3660_v15 = vmul.f32 -1.442695, %v1706_v56  ;;  %7295 = vst [vmem:[#allocation41_spill] sm:$0xff] %v6005_v0  ;;  %7296 = vst [vmem:[#allocation42_spill] sm:$0xff] %v6011_v7  ;;  %v6017_v52 = vld [vmem:[%s7143_s6 + $0x64] ss:$12 sps:$4 sm:$0xff]  }
 0x282   :  { %1921 = vmatprep.subr.bf16.mxu0 %v5998_v5  ;;  %3987 = vmatprep.subr.bf16.mxu1 %v7290_v4  ;;  %7297 = vst [vmem:[#allocation43_spill] sm:$0xff] %v6017_v52  ;;  %v3662_v60 = vmul.f32 -1.442695, %v1722_v27  ;;  %v6024_v6 = vld [vmem:[%s7143_s6 + $0x60] ss:$12 sps:$4 sm:$0xff]  }
 0x283   :  { %4410 = vpow2.f32 %v3660_v15  ;;  %7298 = vst [vmem:[#allocation44_spill] sm:$0xff] %v6024_v6  ;;  %v6030_v12 = vld [vmem:[%s7143_s6 + $0x68] ss:$12 sps:$4 sm:$0xff]   ;;  %v6043_v50 = vld [vmem:[%s7143_s6 + $0x78] ss:$12 sps:$4 sm:$0xff]  }
 0x284   :  { %4412 = vpow2.f32 %v3661_v30  ;;  %7299 = vst [vmem:[#allocation45_spill] sm:$0xff] %v6030_v12  ;;  %v6036_v58 = vld [vmem:[%s7143_s6 + $0x7c] ss:$12 sps:$4 sm:$0xff]   ;;  %7301 = vst [vmem:[#allocation47_spill] sm:$0xff] %v6043_v50  ;;  %v6049_v55 = vld [vmem:[%s7143_s6 + $0x80] ss:$12 sps:$4 sm:$0xff]  }
 0x285   :  { %1922 = vmatpush1.bf16.msra.mxu0 %v6005_v0  ;;  %3988 = vmatpush3.bf16.msra.mxu1 %v6011_v7  ;;  %7300 = vst [vmem:[#allocation46_spill] sm:$0xff] %v6036_v58  ;;  %4414 = vpow2.f32 %v3662_v60  ;;  %7302 = vst [vmem:[#allocation48_spill] sm:$0xff] %v6049_v55  ;;  %v6055_v15 = vld [vmem:[%s7143_s6 + $0x94] ss:$12 sps:$4 sm:$0xff]   ;;  %v6062_v60 = vld [vmem:[%s7143_s6 + $0x90] ss:$12 sps:$4 sm:$0xff]  }
 0x286   :  { %1923 = vmatprep.subr.bf16.mxu0 %v6017_v52  ;;  %3989 = vmatprep.subr.bf16.mxu1 %v7290_v4  ;;  %7303 = vst [vmem:[#allocation49_spill] sm:$0xff] %v6055_v15  ;;  %7304 = vst [vmem:[#allocation50_spill] sm:$0xff] %v6062_v60 }
 0x289   :  { %1924 = vmatpush1.bf16.msra.mxu0 %v6024_v6  ;;  %3990 = vmatpush3.bf16.msra.mxu1 %v6030_v12  ;;  %v1736_v12 = vadd.f32 %v5708_v28, %v5980_v16 }
 0x28a   :  { %1925 = vmatprep.subr.bf16.mxu0 %v6036_v58  ;;  %3991 = vmatprep.subr.bf16.mxu1 %v7290_v4  ;;  %v1739_v58 = vunpack.c.l.bf16 %v5644_v62 }
 0x28b   :  { %v4409_v59 = vpop.eup %4408 }
 0x28c   :  { %v1713_v56 = vadd.f32 1.0, %v4409_v59  ;;  %v6068_v59 = vld [vmem:[%s7143_s6 + $0x98] ss:$12 sps:$4 sm:$0xff]  }
 0x28d   :  { %1926 = vmatpush1.bf16.msra.mxu0 %v6043_v50  ;;  %3992 = vmatpush3.bf16.msra.mxu1 %v6049_v55  ;;  %v4411_v27 = vpop.eup %4410  ;;  %7305 = vst [vmem:[#allocation51_spill] sm:$0xff] %v6068_v59 }
 0x28e   :  { %1927 = vmatprep.subr.bf16.mxu0 %v6055_v15  ;;  %3993 = vmatprep.subr.bf16.mxu1 %v7290_v4  ;;  %4416 = vrcp.f32 %v1713_v56  ;;  %v1714_v30 = vadd.f32 1.0, %v4411_v27  ;;  %v6074_v56 = vld [vmem:[%s7143_s6 + $0xac] ss:$12 sps:$4 sm:$0xff]   ;;  %v4413_v27 = vpop.eup %4412 }
 0x28f   :  { %7306 = vst [vmem:[#allocation52_spill] sm:$0xff] %v6074_v56  ;;  %v1729_v15 = vadd.f32 1.0, %v4413_v27 }
 0x290   :  { %4418 = vrcp.f32 %v1714_v30  ;;  %v4415_v30 = vpop.eup %4414 }
 0x291   :  { %1928 = vmatpush1.bf16.msra.mxu0 %v6062_v60  ;;  %3994 = vmatpush3.bf16.msra.mxu1 %v6068_v59  ;;  %v6081_v60 = vld [vmem:[%s7143_s6 + $0xa8] ss:$12 sps:$4 sm:$0xff]   ;;  %v6087_v59 = vld [vmem:[%s7143_s6 + $0xb0] ss:$12 sps:$4 sm:$0xff]   ;;  %v1730_v55 = vadd.f32 1.0, %v4415_v30  ;;  %4420 = vrcp.f32 %v1729_v15 }
 0x292   :  { %1929 = vmatprep.subr.bf16.mxu0 %v6074_v56  ;;  %3995 = vmatprep.subr.bf16.mxu1 %v7290_v4  ;;  %7307 = vst [vmem:[#allocation53_spill] sm:$0xff] %v6081_v60  ;;  %7308 = vst [vmem:[#allocation54_spill] sm:$0xff] %v6087_v59  ;;  %v1735_v56 = vadd.f32 %v5708_v28, %v5957_v48 }
 0x293   :  { %4422 = vrcp.f32 %v1730_v55 }
 0x295   :  { %1930 = vmatpush1.bf16.msra.mxu0 %v6081_v60  ;;  %3996 = vmatpush3.bf16.msra.mxu1 %v6087_v59  ;;  %v1740_v59 = vunpack.c.h.bf16 %v5644_v62 }
 0x296   :  { %2072 = vmatprep.subr.bf16.mxu0 %v5715_v31  ;;  %4001 = vmatprep.subr.bf16.mxu1 %v7290_v4 }
 0x298   :  { %v4417_v50 = vpop.eup %4416 }
 0x299   :  { %v1737_v60 = vmul.f32 %v4417_v50, %v1735_v56  ;;  %v1861_v56 = vunpack.c.h.bf16 %v5469_v33 }
 0x29a   :  { %v4419_v6 = vpop.eup %4418 }
 0x29b   :  { %v1741_v27 = vadd.f32 %v1739_v58, %v1737_v60  ;;  %v1738_v52 = vmul.f32 %v4419_v6, %v1736_v12  ;;  %v4421_v7 = vpop.eup %4420  ;;  %v1876_v12 = vunpack.c.l.bf16 %v5473_v42 }
 0x29c   :  { %v1745_v30 = vsub.f32 1.0, %v4421_v7  ;;  %v1749_v50 = vmul.f32 %v4421_v7, %v5727_v54 }
 0x29d   :  { %4424 = vtanh.f32 %v1741_v27  ;;  %v1742_v31 = vadd.f32 %v1740_v59, %v1738_v52  ;;  %v4423_v48 = vpop.eup %4422 }
 0x29e   :  { %v1746_v5 = vsub.f32 1.0, %v4423_v48  ;;  %v1750_v62 = vmul.f32 %v4423_v48, %v5739_v63 }
 0x29f   :  { %4426 = vtanh.f32 %v1742_v31 }
 0x2a7   :  { %v4425_v0 = vpop.eup %4424 }
 0x2a8   :  { %v1747_v8 = vmul.f32 %v4425_v0, %v1745_v30 }
 0x2a9   :  { %v4427_v15 = vpop.eup %4426 }
 0x2aa   :  { %v1748_v16 = vmul.f32 %v4427_v15, %v1746_v5  ;;  %v1751_v58 = vadd.f32 %v1749_v50, %v1747_v8  ;;  %v1877_v50 = vunpack.c.h.bf16 %v5473_v42 }
 0x2ac   :  { %v1752_v6 = vadd.f32 %v1750_v62, %v1748_v16  ;;  %v1766_v31 = vsel %vm1755_vm9, %v1751_v58, 0.0  ;;  %v6110_v0 = vsel %vm1755_vm9, %v1751_v58, %v5727_v54  ;;  %v1860_v54 = vunpack.c.l.bf16 %v5469_v33 }
 0x2ad   :  { %3665 = vst [vmem:[%s7147_s8 + $0xc8] sm:$0xff] %v1766_v31 }
 0x2ae   :  { %v6115_v5 = vsel %vm1756_vm10, %v1752_v6, %v5739_v63  ;;  %v1767_v8 = vsel %vm1756_vm10, %v1752_v6, 0.0 }
 0x2af   :  { %3666 = vst [vmem:[%s7147_s8 + $0xd8] sm:$0xff] %v1767_v8  ;;  %v1914_v7 = vpack.c.bf16 %v6115_v5, %v6110_v0 }
 0x2b1   :  { %1948 = vmatmul.mubr.bf16.vlgmr.msra.gmra.mrb[80].mxu0 %v1914_v7  ;;  %3998 = vmatmul.mubr.bf16.vlgmr.msra.gmra.mrb[56].mxu1 %v1914_v7 }
 0x2b2   :  { %2073 = vmatpush1.bf16.msra.mxu0 %v5748_v17  ;;  %4002 = vmatpush3.bf16.msra.mxu1 %v5754_v37 }
 0x2b3   :  { %2074 = vmatprep.subr.bf16.mxu0 %v5760_v39  ;;  %4003 = vmatprep.subr.bf16.mxu1 %v7290_v4 }
 0x2b4   :  { %2104 = vmatprep.mubr.bf16.mxu0 %v7291_v51  ;;  %4017 = vmatprep.mubr.msk.bf16.mxu1 %vm4772_vm0, %v7290_v4 }
 0x2b6   :  { %2075 = vmatpush1.bf16.msra.mxu0 %v5770_v19  ;;  %4004 = vmatpush3.bf16.msra.mxu1 %v5776_v20 }
 0x2b7   :  { %2076 = vmatprep.subr.bf16.mxu0 %v5782_v22  ;;  %4005 = vmatprep.subr.bf16.mxu1 %v7290_v4 }
 0x2ba   :  { %2077 = vmatpush1.bf16.msra.mxu0 %v5789_v23  ;;  %4006 = vmatpush3.bf16.msra.mxu1 %v5795_v25 }
 0x2bb   :  { %2078 = vmatprep.subr.bf16.mxu0 %v5801_v26  ;;  %4007 = vmatprep.subr.bf16.mxu1 %v7290_v4 }
 0x2be   :  { %2079 = vmatpush1.bf16.msra.mxu0 %v5808_v29  ;;  %4008 = vmatpush3.bf16.msra.mxu1 %v5814_v32 }
 0x2bf   :  { %2080 = vmatprep.subr.bf16.mxu0 %v5820_v35  ;;  %4009 = vmatprep.subr.bf16.mxu1 %v7290_v4 }
 0x2c2   :  { %2081 = vmatpush1.bf16.msra.mxu0 %v5827_v40  ;;  %4010 = vmatpush3.bf16.msra.mxu1 %v5833_v41 }
 0x2c3   :  { %2082 = vmatprep.subr.bf16.mxu0 %v5839_v43  ;;  %4011 = vmatprep.subr.bf16.mxu1 %v7290_v4 }
 0x2c6   :  { %2083 = vmatpush1.bf16.msra.mxu0 %v5846_v34  ;;  %4012 = vmatpush3.bf16.msra.mxu1 %v5852_v44 }
 0x2c7   :  { %2084 = vmatprep.subr.bf16.mxu0 %v5858_v45  ;;  %4013 = vmatprep.subr.bf16.mxu1 %v7290_v4 }
 0x2ca   :  { %2085 = vmatpush1.bf16.msra.mxu0 %v5865_v11  ;;  %4014 = vmatpush3.bf16.msra.mxu1 %v5871_v9 }
 0x2cb   :  { %2086 = vmatprep.subr.bf16.mxu0 %v5877_v13  ;;  %4015 = vmatprep.subr.bf16.mxu1 %v7290_v4 }
 0x2ce   :  { %2087 = vmatpush1.bf16.msra.mxu0 %v5884_v46  ;;  %4016 = vmatpush3.bf16.msra.mxu1 %v5890_v36 }
 0x2cf   :  { %2211 = vmatprep.subr.bf16.mxu0 %v5896_v14  ;;  %4021 = vmatprep.subr.bf16.mxu1 %v7290_v4 }
 0x34b   :  { %v1810_v63 = vpop.f32.mrb[76].mxu0  ;;  %v1853_v52 = vpop.f32.mrb[52].mxu1 }
 0x34c   :  { %v1862_v55 = vadd.f32 %v1860_v54, %v1810_v63  ;;  %v1812_v60 = vpop.f32.mrb[77].mxu0  ;;  %v3979_v59 = vpop.f32.mrb[53].mxu1 }
 0x34d   :  { %v1878_v27 = vadd.f32 %v1876_v12, %v1812_v60  ;;  %v1814_v48 = vpop.f32.mrb[78].mxu0  ;;  %v1856_v30 = vpop.f32.mrb[54].mxu1  ;;  %v1892_v59 = vadd.f32 %v5604_v10, %v1853_v52 }
 0x34e   :  { %v3667_v15 = vmul.f32 -1.442695, %v1862_v55  ;;  %v1863_v16 = vadd.f32 %v1861_v56, %v1814_v48  ;;  %v1816_v62 = vpop.f32.mrb[79].mxu0  ;;  %v3980_v58 = vpop.f32.mrb[55].mxu1 }
 0x34f   :  { %v1879_v6 = vadd.f32 %v1877_v50, %v1816_v62  ;;  %v3669_v8 = vmul.f32 -1.442695, %v1878_v27  ;;  %v1896_v50 = vunpack.c.l.bf16 %v5471_v38  ;;  %v1893_v27 = vadd.f32 %v5604_v10, %v1856_v30 }
 0x350   :  { %4428 = vpow2.f32 %v3667_v15  ;;  %v3668_v31 = vmul.f32 -1.442695, %v1863_v16  ;;  %v1897_v62 = vunpack.c.h.bf16 %v5471_v38 }
 0x351   :  { %v3670_v7 = vmul.f32 -1.442695, %v1879_v6 }
 0x352   :  { %4430 = vpow2.f32 %v3668_v31 }
 0x353   :  { %4432 = vpow2.f32 %v3669_v8 }
 0x354   :  { %4434 = vpow2.f32 %v3670_v7 }
 0x35a   :  { %v4429_v54 = vpop.eup %4428 }
 0x35b   :  { %v1870_v63 = vadd.f32 1.0, %v4429_v54 }
 0x35c   :  { %v4431_v33 = vpop.eup %4430 }
 0x35d   :  { %4436 = vrcp.f32 %v1870_v63  ;;  %v1871_v12 = vadd.f32 1.0, %v4431_v33  ;;  %v4433_v60 = vpop.eup %4432 }
 0x35e   :  { %v4435_v42 = vpop.eup %4434  ;;  %v1886_v55 = vadd.f32 1.0, %v4433_v60 }
 0x35f   :  { %4438 = vrcp.f32 %v1871_v12  ;;  %v1887_v56 = vadd.f32 1.0, %v4435_v42 }
 0x360   :  { %4440 = vrcp.f32 %v1886_v55 }
 0x361   :  { %4442 = vrcp.f32 %v1887_v56 }
 0x367   :  { %v4437_v48 = vpop.eup %4436 }
 0x368   :  { %v1894_v15 = vmul.f32 %v4437_v48, %v1892_v59 }
 0x369   :  { %v4439_v16 = vpop.eup %4438 }
 0x36a   :  { %v1898_v58 = vadd.f32 %v1896_v50, %v1894_v15  ;;  %v1895_v6 = vmul.f32 %v4439_v16, %v1893_v27  ;;  %v4441_v8 = vpop.eup %4440  ;;  %v7310_v16 = vld [vmem:[#allocation34_spill] sm:$0xff] }
 0x36b   :  { %v4443_v7 = vpop.eup %4442  ;;  %v1902_v52 = vsub.f32 1.0, %v4441_v8  ;;  %v1906_v63 = vmul.f32 %v4441_v8, %v5920_v24 }
 0x36c   :  { %4444 = vtanh.f32 %v1898_v58  ;;  %v1899_v31 = vadd.f32 %v1897_v62, %v1895_v6  ;;  %v1903_v33 = vsub.f32 1.0, %v4443_v7  ;;  %v1907_v10 = vmul.f32 %v4443_v7, %v5925_v21 }
 0x36d   :  { %v2015_v62 = vunpack.c.l.bf16 %v7310_v16 }
 0x36e   :  { %4446 = vtanh.f32 %v1899_v31 }
 0x376   :  { %v4445_v54 = vpop.eup %4444 }
 0x377   :  { %v1904_v12 = vmul.f32 %v4445_v54, %v1902_v52 }
 0x378   :  { %v4447_v60 = vpop.eup %4446 }
 0x379   :  { %v1905_v38 = vmul.f32 %v4447_v60, %v1903_v33  ;;  %v1908_v30 = vadd.f32 %v1906_v63, %v1904_v12  ;;  %v2016_v63 = vunpack.c.h.bf16 %v7310_v16  ;;  %v7316_v16 = vld [vmem:[#allocation44_spill] sm:$0xff] }
 0x37b   :  { %v1909_v42 = vadd.f32 %v1907_v10, %v1905_v38  ;;  %v2057_v55 = vsel %vm2049_vm11, %v1908_v30, 0.0  ;;  %v6179_v59 = vsel %vm2049_vm11, %v1908_v30, %v5920_v24  ;;  %v7309_v24 = vld [vmem:[#allocation17_spill] sm:$0xff]  ;;  %v7311_v30 = vld [vmem:[#allocation39_spill] sm:$0xff] }
 0x37c   :  { %3675 = vst [vmem:[%s7147_s8 + $0x40] sm:$0xff] %v2057_v55  ;;  %v2000_v8 = vunpack.c.h.bf16 %v7309_v24  ;;  %v7312_v55 = vld [vmem:[#allocation40_spill] sm:$0xff] }
 0x37d   :  { %v6184_v56 = vsel %vm2050_vm12, %v1909_v42, %v5925_v21  ;;  %v2058_v48 = vsel %vm2050_vm12, %v1909_v42, 0.0  ;;  %v1999_v21 = vunpack.c.l.bf16 %v7309_v24  ;;  %v7314_v24 = vld [vmem:[#allocation42_spill] sm:$0xff] }
 0x37e   :  { %3676 = vst [vmem:[%s7147_s8 + $0x50] sm:$0xff] %v2058_v48  ;;  %v2071_v50 = vpack.c.bf16 %v6184_v56, %v6179_v59 }
 0x380   :  { %2105 = vmatmul.mubr.bf16.vlgmr.msra.gmra.mrb[84].mxu0 %v2071_v50  ;;  %4018 = vmatmul.mubr.bf16.vlgmr.msra.gmra.mrb[60].mxu1 %v2071_v50  ;;  %v7313_v50 = vld [vmem:[#allocation41_spill] sm:$0xff] }
 0x381   :  { %2212 = vmatpush1.bf16.msra.mxu0 %v5937_v61  ;;  %4022 = vmatpush3.bf16.msra.mxu1 %v5943_v1 }
 0x382   :  { %2213 = vmatprep.subr.bf16.mxu0 %v5949_v18  ;;  %4023 = vmatprep.subr.bf16.mxu1 %v7290_v4 }
 0x383   :  { %2243 = vmatprep.mubr.bf16.mxu0 %v7291_v51  ;;  %4037 = vmatprep.mubr.msk.bf16.mxu1 %vm4772_vm0, %v7290_v4 }
 0x384   :  { %v1949_v15 = vpop.f32.mrb[80].mxu0  ;;  %v1992_v27 = vpop.f32.mrb[56].mxu1 }
 0x385   :  { %2214 = vmatpush1.bf16.msra.mxu0 %v5963_v49  ;;  %4024 = vmatpush3.bf16.msra.mxu1 %v5969_v47  ;;  %v2001_v58 = vadd.f32 %v1999_v21, %v1949_v15  ;;  %v1951_v6 = vpop.f32.mrb[81].mxu0  ;;  %v3999_v31 = vpop.f32.mrb[57].mxu1  ;;  %v7315_v21 = vld [vmem:[#allocation43_spill] sm:$0xff] }
 0x386   :  { %2215 = vmatprep.subr.bf16.mxu0 %v5976_v57  ;;  %4025 = vmatprep.subr.bf16.mxu1 %v7290_v4  ;;  %v2017_v7 = vadd.f32 %v2015_v62, %v1951_v6  ;;  %v1953_v52 = vpop.f32.mrb[82].mxu0  ;;  %v1995_v54 = vpop.f32.mrb[58].mxu1  ;;  %v7317_v62 = vld [vmem:[#allocation45_spill] sm:$0xff] }
 0x387   :  { %v3671_v33 = vmul.f32 -1.442695, %v2001_v58  ;;  %v2002_v12 = vadd.f32 %v2000_v8, %v1953_v52  ;;  %v1955_v60 = vpop.f32.mrb[83].mxu0  ;;  %v4000_v10 = vpop.f32.mrb[59].mxu1  ;;  %v7318_v58 = vld [vmem:[#allocation46_spill] sm:$0xff]  ;;  %v7319_v8 = vld [vmem:[#allocation47_spill] sm:$0xff] }
 0x388   :  { %v2018_v38 = vadd.f32 %v2016_v63, %v1955_v60  ;;  %v3673_v48 = vmul.f32 -1.442695, %v2017_v7  ;;  %v7320_v7 = vld [vmem:[#allocation48_spill] sm:$0xff]  ;;  %v7321_v63 = vld [vmem:[#allocation49_spill] sm:$0xff]  ;;  %v7323_v60 = vld [vmem:[#allocation51_spill] sm:$0xff] }
 0x389   :  { %2216 = vmatpush1.bf16.msra.mxu0 %v5986_v2  ;;  %4026 = vmatpush3.bf16.msra.mxu1 %v7311_v30  ;;  %4448 = vpow2.f32 %v3671_v33  ;;  %v3672_v42 = vmul.f32 -1.442695, %v2002_v12  ;;  %v7322_v12 = vld [vmem:[#allocation50_spill] sm:$0xff]  ;;  %v7324_v10 = vld [vmem:[#allocation52_spill] sm:$0xff] }
 0x38a   :  { %2217 = vmatprep.subr.bf16.mxu0 %v7312_v55  ;;  %4027 = vmatprep.subr.bf16.mxu1 %v7290_v4  ;;  %v3674_v15 = vmul.f32 -1.442695, %v2018_v38 }
 0x38b   :  { %4450 = vpow2.f32 %v3672_v42 }
 0x38c   :  { %4452 = vpow2.f32 %v3673_v48  ;;  %v7325_v48 = vld [vmem:[#allocation53_spill] sm:$0xff] }
 0x38d   :  { %2218 = vmatpush1.bf16.msra.mxu0 %v7313_v50  ;;  %4028 = vmatpush3.bf16.msra.mxu1 %v7314_v24  ;;  %4454 = vpow2.f32 %v3674_v15  ;;  %v7326_v15 = vld [vmem:[#allocation54_spill] sm:$0xff] }
 0x38e   :  { %2219 = vmatprep.subr.bf16.mxu0 %v7315_v21  ;;  %4029 = vmatprep.subr.bf16.mxu1 %v7290_v4 }
 0x391   :  { %2220 = vmatpush1.bf16.msra.mxu0 %v7316_v16  ;;  %4030 = vmatpush3.bf16.msra.mxu1 %v7317_v62 }
 0x392   :  { %2221 = vmatprep.subr.bf16.mxu0 %v7318_v58  ;;  %4031 = vmatprep.subr.bf16.mxu1 %v7290_v4 }
 0x393   :  { %v4449_v6 = vpop.eup %4448 }
 0x394   :  { %v2009_v31 = vadd.f32 1.0, %v4449_v6 }
 0x395   :  { %2222 = vmatpush1.bf16.msra.mxu0 %v7319_v8  ;;  %4032 = vmatpush3.bf16.msra.mxu1 %v7320_v7  ;;  %v4451_v52 = vpop.eup %4450 }
 0x396   :  { %2223 = vmatprep.subr.bf16.mxu0 %v7321_v63  ;;  %4033 = vmatprep.subr.bf16.mxu1 %v7290_v4  ;;  %4456 = vrcp.f32 %v2009_v31  ;;  %v2010_v33 = vadd.f32 1.0, %v4451_v52  ;;  %v4453_v38 = vpop.eup %4452  ;;  %v2031_v31 = vadd.f32 %v5708_v28, %v1992_v27 }
 0x397   :  { %v4455_v42 = vpop.eup %4454  ;;  %v2025_v6 = vadd.f32 1.0, %v4453_v38 }
 0x398   :  { %4458 = vrcp.f32 %v2010_v33  ;;  %v2026_v52 = vadd.f32 1.0, %v4455_v42 }
 0x399   :  { %2224 = vmatpush1.bf16.msra.mxu0 %v7322_v12  ;;  %4034 = vmatpush3.bf16.msra.mxu1 %v7323_v60  ;;  %v2035_v60 = vunpack.c.l.bf16 %v7328_v3  ;;  %4460 = vrcp.f32 %v2025_v6  ;;  %v2032_v12 = vadd.f32 %v5708_v28, %v1995_v54  ;;  %v6240_v28 = vld [vmem:[%s7146_s1] sm:$0xff] }
 0x39a   :  { %2225 = vmatprep.subr.bf16.mxu0 %v7324_v10  ;;  %4035 = vmatprep.subr.bf16.mxu1 %v7290_v4  ;;  %4462 = vrcp.f32 %v2026_v52  ;;  %vm2051_vm13 = vcmp.gt.s32.totalorder %v6240_v28, 5  ;;  %vm2345_vm15 = vcmp.gt.s32.totalorder %v6240_v28, 3  ;;  %vm2347_vm6 = vcmp.gt.s32.totalorder %v6240_v28, 4  ;;  %v7370_v28 = vld [vmem:[#allocation5_spill] sm:$0xff] }
 0x39d   :  { %2226 = vmatpush1.bf16.msra.mxu0 %v7325_v48  ;;  %4036 = vmatpush3.bf16.msra.mxu1 %v7326_v15  ;;  %v2036_v48 = vunpack.c.h.bf16 %v7328_v3 }
 0x39e   :  { %2367 = vmatprep.subr.bf16.mxu0 %v7327_v53  ;;  %4041 = vmatprep.subr.bf16.mxu1 %v7290_v4 }
 0x3a0   :  { %v4457_v33 = vpop.eup %4456 }
 0x3a1   :  { %v2033_v10 = vmul.f32 %v4457_v33, %v2031_v31  ;;  %v6314_v33 = vld [vmem:[%s7145_s5] ss:$0 sm:$0xff] }
 0x3a2   :  { %v4459_v63 = vpop.eup %4458 }
 0x3a3   :  { %v2037_v7 = vadd.f32 %v2035_v60, %v2033_v10  ;;  %v2034_v15 = vmul.f32 %v4459_v63, %v2032_v12  ;;  %v4461_v38 = vpop.eup %4460  ;;  %v6247_v63 = vld [vmem:[%s7146_s1 + $0x8] sm:$0xff] }
 0x3a4   :  { %v4463_v8 = vpop.eup %4462  ;;  %v2041_v27 = vsub.f32 1.0, %v4461_v38  ;;  %v2045_v58 = vmul.f32 %v4461_v38, %v6110_v0  ;;  %vm2052_vm14 = vcmp.gt.s32.totalorder %v6247_v63, 5  ;;  %vm2346_vm3 = vcmp.gt.s32.totalorder %v6247_v63, 3 }
 0x3a5   :  { %4464 = vtanh.f32 %v2037_v7  ;;  %v2038_v53 = vadd.f32 %v2036_v48, %v2034_v15  ;;  %v2042_v62 = vsub.f32 1.0, %v4463_v8  ;;  %v2046_v3 = vmul.f32 %v4463_v8, %v6115_v5 }
 0x3a6   :  { %vm2348_vm2 = vcmp.gt.s32.totalorder %v6247_v63, 4  ;;  %v2877_v63 = vunpack.c.l.bf16 %v7370_v28 }
 0x3a7   :  { %4466 = vtanh.f32 %v2038_v53 }
 0x3af   :  { %v4465_v42 = vpop.eup %4464 }
 0x3b0   :  { %v2043_v31 = vmul.f32 %v4465_v42, %v2041_v27  ;;  %v7331_v42 = vld [vmem:[#allocation7_spill] sm:$0xff] }
 0x3b1   :  { %v4467_v6 = vpop.eup %4466 }
 0x3b2   :  { %v2044_v54 = vmul.f32 %v4467_v6, %v2042_v62  ;;  %v2047_v7 = vadd.f32 %v2045_v58, %v2043_v31  ;;  %v2192_v31 = vunpack.c.l.bf16 %v7331_v42 }
 0x3b4   :  { %v2048_v12 = vadd.f32 %v2046_v3, %v2044_v54  ;;  %v2062_v60 = vsel %vm2051_vm13, %v2047_v7, 0.0  ;;  %v6258_v62 = vsel %vm2051_vm13, %v2047_v7, %v6110_v0  ;;  %v2193_v7 = vunpack.c.h.bf16 %v7331_v42  ;;  %v7339_v42 = vld [vmem:[#allocation50_spill] sm:$0xff] }
 0x3b5   :  { %3677 = vst [vmem:[%s7147_s8 + $0xa8] sm:$0xff] %v2062_v60 }
 0x3b6   :  { %v6263_v58 = vsel %vm2052_vm14, %v2048_v12, %v6115_v5  ;;  %v2063_v8 = vsel %vm2052_vm14, %v2048_v12, 0.0 }
 0x3b7   :  { %3678 = vst [vmem:[%s7147_s8 + $0xb8] sm:$0xff] %v2063_v8  ;;  %v2210_v10 = vpack.c.bf16 %v6263_v58, %v6258_v62 }
 0x3b9   :  { %2244 = vmatmul.mubr.bf16.vlgmr.msra.gmra.mrb[88].mxu0 %v2210_v10  ;;  %4038 = vmatmul.mubr.bf16.vlgmr.msra.gmra.mrb[64].mxu1 %v2210_v10 }
 0x3ba   :  { %2368 = vmatpush1.bf16.msra.mxu0 %v5748_v17  ;;  %4042 = vmatpush3.bf16.msra.mxu1 %v5754_v37  ;;  %v7329_v17 = vld [vmem:[#allocation6_spill] sm:$0xff] }
 0x3bb   :  { %2369 = vmatprep.subr.bf16.mxu0 %v5760_v39  ;;  %4043 = vmatprep.subr.bf16.mxu1 %v7290_v4  ;;  %v2156_v37 = vunpack.c.l.bf16 %v7329_v17 }
 0x3bc   :  { %2399 = vmatprep.mubr.bf16.mxu0 %v7291_v51  ;;  %4057 = vmatprep.mubr.msk.bf16.mxu1 %vm4772_vm0, %v7290_v4 }
 0x3be   :  { %2370 = vmatpush1.bf16.msra.mxu0 %v5770_v19  ;;  %4044 = vmatpush3.bf16.msra.mxu1 %v5776_v20  ;;  %v7330_v20 = vld [vmem:[#allocation8_spill] sm:$0xff] }
 0x3bf   :  { %2371 = vmatprep.subr.bf16.mxu0 %v5782_v22  ;;  %4045 = vmatprep.subr.bf16.mxu1 %v7290_v4  ;;  %v2172_v22 = vunpack.c.l.bf16 %v7330_v20 }
 0x3c2   :  { %2372 = vmatpush1.bf16.msra.mxu0 %v5789_v23  ;;  %4046 = vmatpush3.bf16.msra.mxu1 %v5795_v25 }
 0x3c3   :  { %2373 = vmatprep.subr.bf16.mxu0 %v5801_v26  ;;  %4047 = vmatprep.subr.bf16.mxu1 %v7290_v4 }
 0x3c6   :  { %2374 = vmatpush1.bf16.msra.mxu0 %v5808_v29  ;;  %4048 = vmatpush3.bf16.msra.mxu1 %v5814_v32  ;;  %v2157_v29 = vunpack.c.h.bf16 %v7329_v17 }
 0x3c7   :  { %2375 = vmatprep.subr.bf16.mxu0 %v5820_v35  ;;  %4049 = vmatprep.subr.bf16.mxu1 %v7290_v4 }
 0x3ca   :  { %2376 = vmatpush1.bf16.msra.mxu0 %v5827_v40  ;;  %4050 = vmatpush3.bf16.msra.mxu1 %v5833_v41  ;;  %v2173_v41 = vunpack.c.h.bf16 %v7330_v20 }
 0x3cb   :  { %2377 = vmatprep.subr.bf16.mxu0 %v5839_v43  ;;  %4051 = vmatprep.subr.bf16.mxu1 %v7290_v4 }
 0x3ce   :  { %2378 = vmatpush1.bf16.msra.mxu0 %v5846_v34  ;;  %4052 = vmatpush3.bf16.msra.mxu1 %v5852_v44 }
 0x3cf   :  { %2379 = vmatprep.subr.bf16.mxu0 %v5858_v45  ;;  %4053 = vmatprep.subr.bf16.mxu1 %v7290_v4 }
 0x3d2   :  { %2380 = vmatpush1.bf16.msra.mxu0 %v5865_v11  ;;  %4054 = vmatpush3.bf16.msra.mxu1 %v5871_v9 }
 0x3d3   :  { %2381 = vmatprep.subr.bf16.mxu0 %v5877_v13  ;;  %4055 = vmatprep.subr.bf16.mxu1 %v7290_v4 }
 0x3d6   :  { %2382 = vmatpush1.bf16.msra.mxu0 %v5884_v46  ;;  %4056 = vmatpush3.bf16.msra.mxu1 %v5890_v36 }
 0x3d7   :  { %2505 = vmatprep.subr.bf16.mxu0 %v5896_v14  ;;  %4061 = vmatprep.subr.bf16.mxu1 %v7290_v4 }
 0x453   :  { %v2106_v39 = vpop.f32.mrb[84].mxu0  ;;  %v2149_v19 = vpop.f32.mrb[60].mxu1 }
 0x454   :  { %v2158_v23 = vadd.f32 %v2156_v37, %v2106_v39  ;;  %v2108_v25 = vpop.f32.mrb[85].mxu0  ;;  %v4019_v26 = vpop.f32.mrb[61].mxu1  ;;  %v2188_v53 = vadd.f32 %v6314_v33, %v2149_v19 }
 0x455   :  { %v2174_v32 = vadd.f32 %v2172_v22, %v2108_v25  ;;  %v2110_v35 = vpop.f32.mrb[86].mxu0  ;;  %v2152_v40 = vpop.f32.mrb[62].mxu1 }
 0x456   :  { %v3679_v43 = vmul.f32 -1.442695, %v2158_v23  ;;  %v2159_v34 = vadd.f32 %v2157_v29, %v2110_v35  ;;  %v2112_v44 = vpop.f32.mrb[87].mxu0  ;;  %v4020_v45 = vpop.f32.mrb[63].mxu1  ;;  %v2189_v3 = vadd.f32 %v6314_v33, %v2152_v40 }
 0x457   :  { %v2175_v11 = vadd.f32 %v2173_v41, %v2112_v44  ;;  %v3681_v13 = vmul.f32 -1.442695, %v2174_v32 }
 0x458   :  { %4468 = vpow2.f32 %v3679_v43  ;;  %v3680_v9 = vmul.f32 -1.442695, %v2159_v34 }
 0x459   :  { %v3682_v46 = vmul.f32 -1.442695, %v2175_v11  ;;  %v7333_v11 = vld [vmem:[#allocation32_spill] sm:$0xff] }
 0x45a   :  { %4470 = vpow2.f32 %v3680_v9  ;;  %v2311_v9 = vunpack.c.l.bf16 %v7333_v11 }
 0x45b   :  { %4472 = vpow2.f32 %v3681_v13 }
 0x45c   :  { %4474 = vpow2.f32 %v3682_v46 }
 0x462   :  { %v4469_v36 = vpop.eup %4468 }
 0x463   :  { %v2166_v14 = vadd.f32 1.0, %v4469_v36 }
 0x464   :  { %v4471_v0 = vpop.eup %4470 }
 0x465   :  { %4476 = vrcp.f32 %v2166_v14  ;;  %v2167_v5 = vadd.f32 1.0, %v4471_v0  ;;  %v4473_v48 = vpop.eup %4472  ;;  %v2312_v0 = vunpack.c.h.bf16 %v7333_v11 }
 0x466   :  { %v4475_v15 = vpop.eup %4474  ;;  %v2182_v52 = vadd.f32 1.0, %v4473_v48 }
 0x467   :  { %4478 = vrcp.f32 %v2167_v5  ;;  %v2183_v38 = vadd.f32 1.0, %v4475_v15 }
 0x468   :  { %4480 = vrcp.f32 %v2182_v52 }
 0x469   :  { %4482 = vrcp.f32 %v2183_v38 }
 0x46f   :  { %v4477_v27 = vpop.eup %4476 }
 0x470   :  { %v2190_v6 = vmul.f32 %v4477_v27, %v2188_v53  ;;  %v7338_v27 = vld [vmem:[#allocation49_spill] sm:$0xff] }
 0x471   :  { %v4479_v54 = vpop.eup %4478 }
 0x472   :  { %v2194_v12 = vadd.f32 %v2192_v31, %v2190_v6  ;;  %v2191_v60 = vmul.f32 %v4479_v54, %v2189_v3  ;;  %v4481_v10 = vpop.eup %4480  ;;  %v7340_v31 = vld [vmem:[#allocation51_spill] sm:$0xff]  ;;  %v7341_v6 = vld [vmem:[#allocation52_spill] sm:$0xff] }
 0x473   :  { %v4483_v17 = vpop.eup %4482  ;;  %v2198_v37 = vsub.f32 1.0, %v4481_v10  ;;  %v2202_v19 = vmul.f32 %v4481_v10, %v6179_v59  ;;  %v6393_v10 = vld [vmem:[%s7148_s7] ss:$0 sm:$0xff] }
 0x474   :  { %4484 = vtanh.f32 %v2194_v12  ;;  %v2195_v8 = vadd.f32 %v2193_v7, %v2191_v60  ;;  %v2199_v20 = vsub.f32 1.0, %v4483_v17  ;;  %v2203_v25 = vmul.f32 %v4483_v17, %v6184_v56  ;;  %v7342_v7 = vld [vmem:[#allocation53_spill] sm:$0xff]  ;;  %v7343_v12 = vld [vmem:[#allocation54_spill] sm:$0xff]  ;;  %7345 = vst [vmem:[#allocation34_spill] sm:$0xff] %v6393_v10 }
 0x476   :  { %4486 = vtanh.f32 %v2195_v8  ;;  %v6386_v8 = vld [vmem:[%s7142_s4 + $0x4] ss:$12 sps:$4 sm:$0xff]  }
 0x477   :  { %7344 = vst [vmem:[#allocation17_spill] sm:$0xff] %v6386_v8 }
 0x47e   :  { %v4485_v39 = vpop.eup %4484 }
 0x47f   :  { %v2200_v22 = vmul.f32 %v4485_v39, %v2198_v37 }
 0x480   :  { %v4487_v23 = vpop.eup %4486 }
 0x481   :  { %v2201_v26 = vmul.f32 %v4487_v23, %v2199_v20  ;;  %v2204_v29 = vadd.f32 %v2202_v19, %v2200_v22  ;;  %v7346_v19 = vld [vmem:[#allocation33_spill] sm:$0xff] }
 0x482   :  { %v2331_v20 = vunpack.c.l.bf16 %v7346_v19 }
 0x483   :  { %v2205_v32 = vadd.f32 %v2203_v25, %v2201_v26  ;;  %v2353_v35 = vsel %vm2345_vm15, %v2204_v29, 0.0  ;;  %v6332_v40 = vsel %vm2345_vm15, %v2204_v29, %v6179_v59  ;;  %v7332_v59 = vld [vmem:[#allocation13_spill] sm:$0xff]  ;;  %v2332_v26 = vunpack.c.h.bf16 %v7346_v19 }
 0x484   :  { %3687 = vst [vmem:[%s7147_s8 + $0x60] sm:$0xff] %v2353_v35  ;;  %v2296_v13 = vunpack.c.h.bf16 %v7332_v59 }
 0x485   :  { %v6337_v41 = vsel %vm2346_vm3, %v2205_v32, %v6184_v56  ;;  %v2354_v43 = vsel %vm2346_vm3, %v2205_v32, 0.0  ;;  %v2295_v56 = vunpack.c.l.bf16 %v7332_v59 }
 0x486   :  { %3688 = vst [vmem:[%s7147_s8 + $0x70] sm:$0xff] %v2354_v43  ;;  %v2366_v34 = vpack.c.bf16 %v6337_v41, %v6332_v40 }
 0x488   :  { %2400 = vmatmul.mubr.bf16.vlgmr.msra.gmra.mrb[92].mxu0 %v2366_v34  ;;  %4058 = vmatmul.mubr.bf16.vlgmr.msra.gmra.mrb[68].mxu1 %v2366_v34 }
 0x489   :  { %2506 = vmatpush1.bf16.msra.mxu0 %v5937_v61  ;;  %4062 = vmatpush3.bf16.msra.mxu1 %v5943_v1 }
 0x48a   :  { %2507 = vmatprep.subr.bf16.mxu0 %v5949_v18  ;;  %4063 = vmatprep.subr.bf16.mxu1 %v7290_v4 }
 0x48b   :  { %2537 = vmatprep.mubr.bf16.mxu0 %v7291_v51  ;;  %4077 = vmatprep.mubr.msk.bf16.mxu1 %vm4772_vm0, %v7290_v4 }
 0x48c   :  { %v2245_v44 = vpop.f32.mrb[88].mxu0  ;;  %v2288_v45 = vpop.f32.mrb[64].mxu1 }
 0x48d   :  { %2508 = vmatpush1.bf16.msra.mxu0 %v5963_v49  ;;  %4064 = vmatpush3.bf16.msra.mxu1 %v5969_v47  ;;  %v2297_v61 = vadd.f32 %v2295_v56, %v2245_v44  ;;  %v2247_v1 = vpop.f32.mrb[89].mxu0  ;;  %v4039_v18 = vpop.f32.mrb[65].mxu1  ;;  %v2327_v17 = vadd.f32 %v6393_v10, %v2288_v45 }
 0x48e   :  { %2509 = vmatprep.subr.bf16.mxu0 %v5976_v57  ;;  %4065 = vmatprep.subr.bf16.mxu1 %v7290_v4  ;;  %v2313_v46 = vadd.f32 %v2311_v9, %v2247_v1  ;;  %v2249_v36 = vpop.f32.mrb[90].mxu0  ;;  %v2291_v14 = vpop.f32.mrb[66].mxu1 }
 0x48f   :  { %v3683_v5 = vmul.f32 -1.442695, %v2297_v61  ;;  %v2298_v48 = vadd.f32 %v2296_v13, %v2249_v36  ;;  %v2251_v15 = vpop.f32.mrb[91].mxu0  ;;  %v4040_v49 = vpop.f32.mrb[67].mxu1  ;;  %v2328_v23 = vadd.f32 %v6393_v10, %v2291_v14 }
 0x490   :  { %v2314_v52 = vadd.f32 %v2312_v0, %v2251_v15  ;;  %v3685_v57 = vmul.f32 -1.442695, %v2313_v46  ;;  %v6450_v15 = vld [vmem:[%s7142_s4 + $0x18] ss:$12 sps:$4 sm:$0xff]   ;;  %v6456_v49 = vld [vmem:[%s7142_s4 + $0x20] ss:$12 sps:$4 sm:$0xff]  }
 0x491   :  { %2510 = vmatpush1.bf16.msra.mxu0 %v5986_v2  ;;  %4066 = vmatpush3.bf16.msra.mxu1 %v7311_v30  ;;  %4488 = vpow2.f32 %v3683_v5  ;;  %v3684_v47 = vmul.f32 -1.442695, %v2298_v48  ;;  %v7334_v2 = vld [vmem:[#allocation45_spill] sm:$0xff]  ;;  %v7335_v30 = vld [vmem:[#allocation46_spill] sm:$0xff] }
 0x492   :  { %2511 = vmatprep.subr.bf16.mxu0 %v7312_v55  ;;  %4067 = vmatprep.subr.bf16.mxu1 %v7290_v4  ;;  %v3686_v53 = vmul.f32 -1.442695, %v2314_v52  ;;  %v6440_v48 = vld [vmem:[%s7142_s4 + $0x1c] ss:$12 sps:$4 sm:$0xff]   ;;  %v6462_v52 = vld [vmem:[%s7142_s4 + $0x34] ss:$12 sps:$4 sm:$0xff]  }
 0x493   :  { %4490 = vpow2.f32 %v3684_v47  ;;  %v6469_v47 = vld [vmem:[%s7142_s4 + $0x30] ss:$12 sps:$4 sm:$0xff]  }
 0x494   :  { %4492 = vpow2.f32 %v3685_v57  ;;  %v6475_v57 = vld [vmem:[%s7142_s4 + $0x38] ss:$12 sps:$4 sm:$0xff]  }
 0x495   :  { %2512 = vmatpush1.bf16.msra.mxu0 %v7313_v50  ;;  %4068 = vmatpush3.bf16.msra.mxu1 %v7314_v24  ;;  %4494 = vpow2.f32 %v3686_v53  ;;  %v7336_v50 = vld [vmem:[#allocation47_spill] sm:$0xff]  ;;  %v7337_v24 = vld [vmem:[#allocation48_spill] sm:$0xff] }
 0x496   :  { %2513 = vmatprep.subr.bf16.mxu0 %v7315_v21  ;;  %4069 = vmatprep.subr.bf16.mxu1 %v7290_v4  ;;  %v6481_v53 = vld [vmem:[%s7142_s4 + $0x4c] ss:$12 sps:$4 sm:$0xff]  }
 0x499   :  { %2514 = vmatpush1.bf16.msra.mxu0 %v7316_v16  ;;  %4070 = vmatpush3.bf16.msra.mxu1 %v7334_v2  ;;  %v6488_v2 = vld [vmem:[%s7142_s4 + $0x48] ss:$12 sps:$4 sm:$0xff]  }
 0x49a   :  { %2515 = vmatprep.subr.bf16.mxu0 %v7335_v30  ;;  %4071 = vmatprep.subr.bf16.mxu1 %v7290_v4  ;;  %v6494_v30 = vld [vmem:[%s7142_s4 + $0x50] ss:$12 sps:$4 sm:$0xff]  }
 0x49b   :  { %v4489_v55 = vpop.eup %4488 }
 0x49c   :  { %v2305_v38 = vadd.f32 1.0, %v4489_v55  ;;  %v6500_v55 = vld [vmem:[%s7142_s4 + $0x64] ss:$12 sps:$4 sm:$0xff]  }
 0x49d   :  { %2516 = vmatpush1.bf16.msra.mxu0 %v7336_v50  ;;  %4072 = vmatpush3.bf16.msra.mxu1 %v7337_v24  ;;  %v4491_v21 = vpop.eup %4490  ;;  %v6513_v50 = vld [vmem:[%s7142_s4 + $0x68] ss:$12 sps:$4 sm:$0xff]  }
 0x49e   :  { %2517 = vmatprep.subr.bf16.mxu0 %v7338_v27  ;;  %4073 = vmatprep.subr.bf16.mxu1 %v7290_v4  ;;  %4496 = vrcp.f32 %v2305_v38  ;;  %v2306_v16 = vadd.f32 1.0, %v4491_v21  ;;  %v4493_v3 = vpop.eup %4492  ;;  %v6507_v38 = vld [vmem:[%s7142_s4 + $0x60] ss:$12 sps:$4 sm:$0xff]   ;;  %v6519_v24 = vld [vmem:[%s7142_s4 + $0x7c] ss:$12 sps:$4 sm:$0xff]  }
 0x49f   :  { %v4495_v54 = vpop.eup %4494  ;;  %v2321_v60 = vadd.f32 1.0, %v4493_v3  ;;  %v6526_v21 = vld [vmem:[%s7142_s4 + $0x78] ss:$12 sps:$4 sm:$0xff]   ;;  %v6532_v27 = vld [vmem:[%s7142_s4 + $0x80] ss:$12 sps:$4 sm:$0xff]  }
 0x4a0   :  { %4498 = vrcp.f32 %v2306_v16  ;;  %v2322_v37 = vadd.f32 1.0, %v4495_v54  ;;  %v6538_v16 = vld [vmem:[%s7142_s4 + $0x94] ss:$12 sps:$4 sm:$0xff]   ;;  %v6570_v54 = vld [vmem:[%s7142_s4 + $0xb0] ss:$12 sps:$4 sm:$0xff]  }
 0x4a1   :  { %2518 = vmatpush1.bf16.msra.mxu0 %v7339_v42  ;;  %4074 = vmatpush3.bf16.msra.mxu1 %v7340_v31  ;;  %4500 = vrcp.f32 %v2321_v60  ;;  %v6545_v42 = vld [vmem:[%s7142_s4 + $0x90] ss:$12 sps:$4 sm:$0xff]   ;;  %v6551_v31 = vld [vmem:[%s7142_s4 + $0x98] ss:$12 sps:$4 sm:$0xff]   ;;  %v6564_v3 = vld [vmem:[%s7142_s4 + $0xa8] ss:$12 sps:$4 sm:$0xff]  }
 0x4a2   :  { %2519 = vmatprep.subr.bf16.mxu0 %v7341_v6  ;;  %4075 = vmatprep.subr.bf16.mxu1 %v7290_v4  ;;  %4502 = vrcp.f32 %v2322_v37  ;;  %v6557_v6 = vld [vmem:[%s7142_s4 + $0xac] ss:$12 sps:$4 sm:$0xff]  }
 0x4a5   :  { %2520 = vmatpush1.bf16.msra.mxu0 %v7342_v7  ;;  %4076 = vmatpush3.bf16.msra.mxu1 %v7343_v12  ;;  %v6576_v7 = vld [vmem:[%s7143_s6 + $0x4] ss:$12 sps:$4 sm:$0xff]   ;;  %v7348_v12 = vld [vmem:[#allocation10_spill] sm:$0xff] }
 0x4a6   :  { %2655 = vmatprep.subr.bf16.mxu0 %v6386_v8  ;;  %4081 = vmatprep.subr.bf16.mxu1 %v7290_v4  ;;  %7347 = vst [vmem:[#allocation39_spill] sm:$0xff] %v6576_v7  ;;  %v2451_v60 = vunpack.c.l.bf16 %v7348_v12 }
 0x4a8   :  { %v4497_v39 = vpop.eup %4496 }
 0x4a9   :  { %v2329_v22 = vmul.f32 %v4497_v39, %v2327_v17  ;;  %v7349_v39 = vld [vmem:[#allocation12_spill] sm:$0xff] }
 0x4aa   :  { %v4499_v25 = vpop.eup %4498  ;;  %v2467_v19 = vunpack.c.l.bf16 %v7349_v39 }
 0x4ab   :  { %v2333_v29 = vadd.f32 %v2331_v20, %v2329_v22  ;;  %v2330_v32 = vmul.f32 %v4499_v25, %v2328_v23  ;;  %v4501_v43 = vpop.eup %4500  ;;  %v2452_v25 = vunpack.c.h.bf16 %v7348_v12 }
 0x4ac   :  { %v4503_v34 = vpop.eup %4502  ;;  %v2337_v59 = vsub.f32 1.0, %v4501_v43  ;;  %v2341_v44 = vmul.f32 %v4501_v43, %v6258_v62 }
 0x4ad   :  { %4504 = vtanh.f32 %v2333_v29  ;;  %v2334_v35 = vadd.f32 %v2332_v26, %v2330_v32  ;;  %v2338_v45 = vsub.f32 1.0, %v4503_v34  ;;  %v2342_v61 = vmul.f32 %v4503_v34, %v6263_v58 }
 0x4af   :  { %4506 = vtanh.f32 %v2334_v35  ;;  %v2468_v35 = vunpack.c.h.bf16 %v7349_v39  ;;  %v7350_v39 = vld [vmem:[#allocation11_spill] sm:$0xff] }
 0x4b7   :  { %v4505_v56 = vpop.eup %4504 }
 0x4b8   :  { %v2339_v11 = vmul.f32 %v4505_v56, %v2337_v59 }
 0x4b9   :  { %v4507_v9 = vpop.eup %4506 }
 0x4ba   :  { %v2340_v1 = vmul.f32 %v4507_v9, %v2338_v45  ;;  %v2343_v18 = vadd.f32 %v2341_v44, %v2339_v11 }
 0x4bc   :  { %v2344_v13 = vadd.f32 %v2342_v61, %v2340_v1  ;;  %v2358_v46 = vsel %vm2347_vm6, %v2343_v18, 0.0  ;;  %v6411_v36 = vsel %vm2347_vm6, %v2343_v18, %v6258_v62  ;;  %v6428_v62 = vld [vmem:[%s7142_s4] ss:$12 sps:$4 sm:$0xff]  }
 0x4bd   :  { %3689 = vst [vmem:[%s7147_s8 + $0x88] sm:$0xff] %v2358_v46 }
 0x4be   :  { %v6416_v14 = vsel %vm2348_vm2, %v2344_v13, %v6263_v58  ;;  %v2359_v0 = vsel %vm2348_vm2, %v2344_v13, 0.0  ;;  %v6434_v58 = vld [vmem:[%s7142_s4 + $0x8] ss:$12 sps:$4 sm:$0xff]  }
 0x4bf   :  { %3690 = vst [vmem:[%s7147_s8 + $0x98] sm:$0xff] %v2359_v0  ;;  %v2504_v5 = vpack.c.bf16 %v6416_v14, %v6411_v36 }
 0x4c1   :  { %2538 = vmatmul.mubr.bf16.vlgmr.msra.gmra.mrb[96].mxu0 %v2504_v5  ;;  %4078 = vmatmul.mubr.bf16.vlgmr.msra.gmra.mrb[72].mxu1 %v2504_v5 }
 0x4c2   :  { %2656 = vmatpush1.bf16.msra.mxu0 %v6428_v62  ;;  %4082 = vmatpush3.bf16.msra.mxu1 %v6434_v58 }
 0x4c3   :  { %2657 = vmatprep.subr.bf16.mxu0 %v6440_v48  ;;  %4083 = vmatprep.subr.bf16.mxu1 %v7290_v4 }
 0x4c4   :  { %2687 = vmatprep.mubr.bf16.mxu0 %v7291_v51  ;;  %4097 = vmatprep.mubr.msk.bf16.mxu1 %vm4772_vm0, %v7290_v4 }
 0x4c6   :  { %2658 = vmatpush1.bf16.msra.mxu0 %v6450_v15  ;;  %4084 = vmatpush3.bf16.msra.mxu1 %v6456_v49 }
 0x4c7   :  { %2659 = vmatprep.subr.bf16.mxu0 %v6462_v52  ;;  %4085 = vmatprep.subr.bf16.mxu1 %v7290_v4 }
 0x4ca   :  { %2660 = vmatpush1.bf16.msra.mxu0 %v6469_v47  ;;  %4086 = vmatpush3.bf16.msra.mxu1 %v6475_v57 }
 0x4cb   :  { %2661 = vmatprep.subr.bf16.mxu0 %v6481_v53  ;;  %4087 = vmatprep.subr.bf16.mxu1 %v7290_v4 }
 0x4ce   :  { %2662 = vmatpush1.bf16.msra.mxu0 %v6488_v2  ;;  %4088 = vmatpush3.bf16.msra.mxu1 %v6494_v30 }
 0x4cf   :  { %2663 = vmatprep.subr.bf16.mxu0 %v6500_v55  ;;  %4089 = vmatprep.subr.bf16.mxu1 %v7290_v4 }
 0x4d2   :  { %2664 = vmatpush1.bf16.msra.mxu0 %v6507_v38  ;;  %4090 = vmatpush3.bf16.msra.mxu1 %v6513_v50 }
 0x4d3   :  { %2665 = vmatprep.subr.bf16.mxu0 %v6519_v24  ;;  %4091 = vmatprep.subr.bf16.mxu1 %v7290_v4 }
 0x4d6   :  { %2666 = vmatpush1.bf16.msra.mxu0 %v6526_v21  ;;  %4092 = vmatpush3.bf16.msra.mxu1 %v6532_v27 }
 0x4d7   :  { %2667 = vmatprep.subr.bf16.mxu0 %v6538_v16  ;;  %4093 = vmatprep.subr.bf16.mxu1 %v7290_v4 }
 0x4da   :  { %2668 = vmatpush1.bf16.msra.mxu0 %v6545_v42  ;;  %4094 = vmatpush3.bf16.msra.mxu1 %v6551_v31 }
 0x4db   :  { %2669 = vmatprep.subr.bf16.mxu0 %v6557_v6  ;;  %4095 = vmatprep.subr.bf16.mxu1 %v7290_v4 }
 0x4de   :  { %2670 = vmatpush1.bf16.msra.mxu0 %v6564_v3  ;;  %4096 = vmatpush3.bf16.msra.mxu1 %v6570_v54 }
 0x4df   :  { %2793 = vmatprep.subr.bf16.mxu0 %v6576_v7  ;;  %4101 = vmatprep.subr.bf16.mxu1 %v7290_v4 }
 0x55b   :  { %v2401_v17 = vpop.f32.mrb[92].mxu0  ;;  %v2444_v37 = vpop.f32.mrb[68].mxu1 }
 0x55c   :  { %v2453_v20 = vadd.f32 %v2451_v60, %v2401_v17  ;;  %v2403_v22 = vpop.f32.mrb[93].mxu0  ;;  %v4059_v23 = vpop.f32.mrb[69].mxu1  ;;  %v2483_v12 = vadd.f32 %v6314_v33, %v2444_v37 }
 0x55d   :  { %v2469_v26 = vadd.f32 %v2467_v19, %v2403_v22  ;;  %v2405_v29 = vpop.f32.mrb[94].mxu0  ;;  %v2447_v32 = vpop.f32.mrb[70].mxu1  ;;  %v2487_v19 = vunpack.c.l.bf16 %v7350_v39 }
 0x55e   :  { %v3691_v43 = vmul.f32 -1.442695, %v2453_v20  ;;  %v2454_v34 = vadd.f32 %v2452_v25, %v2405_v29  ;;  %v2407_v59 = vpop.f32.mrb[95].mxu0  ;;  %v4060_v56 = vpop.f32.mrb[71].mxu1  ;;  %v2484_v22 = vadd.f32 %v6314_v33, %v2447_v32  ;;  %v2488_v25 = vunpack.c.h.bf16 %v7350_v39 }
 0x55f   :  { %v2470_v44 = vadd.f32 %v2468_v35, %v2407_v59  ;;  %v3693_v11 = vmul.f32 -1.442695, %v2469_v26 }
 0x560   :  { %4508 = vpow2.f32 %v3691_v43  ;;  %v3692_v45 = vmul.f32 -1.442695, %v2454_v34 }
 0x561   :  { %v3694_v9 = vmul.f32 -1.442695, %v2470_v44 }
 0x562   :  { %4510 = vpow2.f32 %v3692_v45 }
 0x563   :  { %4512 = vpow2.f32 %v3693_v11 }
 0x564   :  { %4514 = vpow2.f32 %v3694_v9 }
 0x56a   :  { %v4509_v61 = vpop.eup %4508 }
 0x56b   :  { %v2461_v1 = vadd.f32 1.0, %v4509_v61 }
 0x56c   :  { %v4511_v18 = vpop.eup %4510 }
 0x56d   :  { %4516 = vrcp.f32 %v2461_v1  ;;  %v2462_v13 = vadd.f32 1.0, %v4511_v18  ;;  %v4513_v46 = vpop.eup %4512 }
 0x56e   :  { %v4515_v0 = vpop.eup %4514  ;;  %v2477_v5 = vadd.f32 1.0, %v4513_v46 }
 0x56f   :  { %4518 = vrcp.f32 %v2462_v13  ;;  %v2478_v60 = vadd.f32 1.0, %v4515_v0 }
 0x570   :  { %4520 = vrcp.f32 %v2477_v5 }
 0x571   :  { %4522 = vrcp.f32 %v2478_v60  ;;  %v7351_v60 = vld [vmem:[#allocation9_spill] sm:$0xff] }
 0x577   :  { %v4517_v17 = vpop.eup %4516 }
 0x578   :  { %v2485_v20 = vmul.f32 %v4517_v17, %v2483_v12  ;;  %v6627_v12 = vld [vmem:[%s7143_s6 + $0x1c] ss:$12 sps:$4 sm:$0xff]   ;;  %v2589_v17 = vunpack.c.l.bf16 %v7351_v60 }
 0x579   :  { %v4519_v23 = vpop.eup %4518 }
 0x57a   :  { %v2489_v26 = vadd.f32 %v2487_v19, %v2485_v20  ;;  %v2486_v29 = vmul.f32 %v4519_v23, %v2484_v22  ;;  %v4521_v43 = vpop.eup %4520  ;;  %v7352_v20 = vld [vmem:[#allocation30_spill] sm:$0xff] }
 0x57b   :  { %v4523_v34 = vpop.eup %4522  ;;  %v2493_v37 = vsub.f32 1.0, %v4521_v43  ;;  %v2497_v56 = vmul.f32 %v4521_v43, %v6332_v40  ;;  %v2605_v22 = vunpack.c.l.bf16 %v7352_v20  ;;  %v6641_v23 = vld [vmem:[%s7143_s6 + $0x18] ss:$12 sps:$4 sm:$0xff]   ;;  %v2590_v43 = vunpack.c.h.bf16 %v7351_v60 }
 0x57c   :  { %4524 = vtanh.f32 %v2489_v26  ;;  %v2490_v35 = vadd.f32 %v2488_v25, %v2486_v29  ;;  %v2494_v44 = vsub.f32 1.0, %v4523_v34  ;;  %v2498_v32 = vmul.f32 %v4523_v34, %v6337_v41  ;;  %v6647_v25 = vld [vmem:[%s7143_s6 + $0x20] ss:$12 sps:$4 sm:$0xff]  }
 0x57d   :  { %v6654_v34 = vld [vmem:[%s7143_s6 + $0x34] ss:$12 sps:$4 sm:$0xff]  }
 0x57e   :  { %4526 = vtanh.f32 %v2490_v35 }
 0x586   :  { %v4525_v59 = vpop.eup %4524 }
 0x587   :  { %v2495_v45 = vmul.f32 %v4525_v59, %v2493_v37 }
 0x588   :  { %v4527_v11 = vpop.eup %4526 }
 0x589   :  { %v2496_v9 = vmul.f32 %v4527_v11, %v2494_v44  ;;  %v2499_v61 = vadd.f32 %v2497_v56, %v2495_v45  ;;  %v2606_v44 = vunpack.c.h.bf16 %v7352_v20  ;;  %v6695_v20 = vld [vmem:[%s7143_s6 + $0x64] ss:$12 sps:$4 sm:$0xff]  }
 0x58a   :  { %7354 = vst [vmem:[#allocation41_spill] sm:$0xff] %v6695_v20 }
 0x58b   :  { %v2500_v1 = vadd.f32 %v2498_v32, %v2496_v9  ;;  %v2643_v18 = vsel %vm2347_vm6, %v2499_v61, 0.0  ;;  %v6598_v13 = vsel %vm2347_vm6, %v2499_v61, %v6332_v40  ;;  %v6615_v40 = vld [vmem:[%s7143_s6] ss:$12 sps:$4 sm:$0xff]  }
 0x58c   :  { %3699 = vst [vmem:[%s7147_s8 + $0x80] sm:$0xff] %v2643_v18  ;;  %v6670_v18 = vld [vmem:[%s7143_s6 + $0x38] ss:$12 sps:$4 sm:$0xff]  }
 0x58d   :  { %v6603_v46 = vsel %vm2348_vm2, %v2500_v1, %v6337_v41  ;;  %v2644_v0 = vsel %vm2348_vm2, %v2500_v1, 0.0  ;;  %v6621_v41 = vld [vmem:[%s7143_s6 + $0x8] ss:$12 sps:$4 sm:$0xff]   ;;  %v6664_v1 = vld [vmem:[%s7143_s6 + $0x30] ss:$12 sps:$4 sm:$0xff]  }
 0x58e   :  { %3700 = vst [vmem:[%s7147_s8 + $0x90] sm:$0xff] %v2644_v0  ;;  %v2654_v5 = vpack.c.bf16 %v6603_v46, %v6598_v13 }
 0x590   :  { %2688 = vmatmul.mubr.bf16.vlgmr.msra.gmra.mrb[100].mxu0 %v2654_v5  ;;  %4098 = vmatmul.mubr.bf16.vlgmr.msra.gmra.mrb[76].mxu1 %v2654_v5  ;;  %v6676_v5 = vld [vmem:[%s7143_s6 + $0x4c] ss:$12 sps:$4 sm:$0xff]  }
 0x591   :  { %2794 = vmatpush1.bf16.msra.mxu0 %v6615_v40  ;;  %4102 = vmatpush3.bf16.msra.mxu1 %v6621_v41 }
 0x592   :  { %2795 = vmatprep.subr.bf16.mxu0 %v6627_v12  ;;  %4103 = vmatprep.subr.bf16.mxu1 %v7290_v4 }
 0x593   :  { %2825 = vmatprep.mubr.bf16.mxu0 %v7291_v51  ;;  %4117 = vmatprep.mubr.msk.bf16.mxu1 %vm4772_vm0, %v7290_v4 }
 0x594   :  { %v2539_v39 = vpop.f32.mrb[96].mxu0  ;;  %v6635_v19 = vpop.f32.mrb[72].mxu1 }
 0x595   :  { %2796 = vmatpush1.bf16.msra.mxu0 %v6641_v23  ;;  %4104 = vmatpush3.bf16.msra.mxu1 %v6647_v25  ;;  %v2591_v26 = vadd.f32 %v2589_v17, %v2539_v39  ;;  %v2541_v29 = vpop.f32.mrb[97].mxu0  ;;  %v4079_v35 = vpop.f32.mrb[73].mxu1  ;;  %v6683_v17 = vld [vmem:[%s7143_s6 + $0x48] ss:$12 sps:$4 sm:$0xff]   ;;  %v6689_v39 = vld [vmem:[%s7143_s6 + $0x50] ss:$12 sps:$4 sm:$0xff]  }
 0x596   :  { %2797 = vmatprep.subr.bf16.mxu0 %v6654_v34  ;;  %4105 = vmatprep.subr.bf16.mxu1 %v7290_v4  ;;  %v2607_v37 = vadd.f32 %v2605_v22, %v2541_v29  ;;  %v2543_v59 = vpop.f32.mrb[98].mxu0  ;;  %v6658_v56 = vpop.f32.mrb[74].mxu1  ;;  %7353 = vst [vmem:[#allocation40_spill] sm:$0xff] %v6689_v39  ;;  %v6708_v29 = vld [vmem:[%s7143_s6 + $0x68] ss:$12 sps:$4 sm:$0xff]  }
 0x597   :  { %v3695_v45 = vmul.f32 -1.442695, %v2591_v26  ;;  %v2592_v11 = vadd.f32 %v2590_v43, %v2543_v59  ;;  %v2545_v32 = vpop.f32.mrb[99].mxu0  ;;  %v4080_v9 = vpop.f32.mrb[75].mxu1  ;;  %v6702_v26 = vld [vmem:[%s7143_s6 + $0x60] ss:$12 sps:$4 sm:$0xff]  }
 0x598   :  { %v2608_v61 = vadd.f32 %v2606_v44, %v2545_v32  ;;  %v3697_v60 = vmul.f32 -1.442695, %v2607_v37  ;;  %7355 = vst [vmem:[#allocation42_spill] sm:$0xff] %v6702_v26  ;;  %7356 = vst [vmem:[#allocation43_spill] sm:$0xff] %v6708_v29  ;;  %v6714_v35 = vld [vmem:[%s7143_s6 + $0x7c] ss:$12 sps:$4 sm:$0xff]  }
 0x599   :  { %2798 = vmatpush1.bf16.msra.mxu0 %v6664_v1  ;;  %4106 = vmatpush3.bf16.msra.mxu1 %v6670_v18  ;;  %4528 = vpow2.f32 %v3695_v45  ;;  %v3696_v0 = vmul.f32 -1.442695, %v2592_v11  ;;  %7357 = vst [vmem:[#allocation44_spill] sm:$0xff] %v6714_v35  ;;  %v6721_v59 = vld [vmem:[%s7143_s6 + $0x78] ss:$12 sps:$4 sm:$0xff]  }
 0x59a   :  { %2799 = vmatprep.subr.bf16.mxu0 %v6676_v5  ;;  %4107 = vmatprep.subr.bf16.mxu1 %v7290_v4  ;;  %v3698_v22 = vmul.f32 -1.442695, %v2608_v61  ;;  %7358 = vst [vmem:[#allocation38_spill] sm:$0xff] %v6721_v59  ;;  %v6727_v44 = vld [vmem:[%s7143_s6 + $0x80] ss:$12 sps:$4 sm:$0xff]  }
 0x59b   :  { %4530 = vpow2.f32 %v3696_v0  ;;  %7359 = vst [vmem:[#allocation35_spill] sm:$0xff] %v6727_v44  ;;  %v6733_v11 = vld [vmem:[%s7143_s6 + $0x94] ss:$12 sps:$4 sm:$0xff]   ;;  %v6740_v9 = vld [vmem:[%s7143_s6 + $0x90] ss:$12 sps:$4 sm:$0xff]  }
 0x59c   :  { %4532 = vpow2.f32 %v3697_v60  ;;  %7360 = vst [vmem:[#allocation6_spill] sm:$0xff] %v6733_v11  ;;  %7361 = vst [vmem:[#allocation8_spill] sm:$0xff] %v6740_v9  ;;  %v6746_v61 = vld [vmem:[%s7143_s6 + $0x98] ss:$12 sps:$4 sm:$0xff]  }
 0x59d   :  { %2800 = vmatpush1.bf16.msra.mxu0 %v6683_v17  ;;  %4108 = vmatpush3.bf16.msra.mxu1 %v6689_v39  ;;  %4534 = vpow2.f32 %v3698_v22  ;;  %7362 = vst [vmem:[#allocation7_spill] sm:$0xff] %v6746_v61  ;;  %v6752_v0 = vld [vmem:[%s7143_s6 + $0xac] ss:$12 sps:$4 sm:$0xff]  }
 0x59e   :  { %2801 = vmatprep.subr.bf16.mxu0 %v6695_v20  ;;  %4109 = vmatprep.subr.bf16.mxu1 %v7290_v4  ;;  %7363 = vst [vmem:[#allocation13_spill] sm:$0xff] %v6752_v0 }
 0x5a1   :  { %2802 = vmatpush1.bf16.msra.mxu0 %v6702_v26  ;;  %4110 = vmatpush3.bf16.msra.mxu1 %v6708_v29 }
 0x5a2   :  { %2803 = vmatprep.subr.bf16.mxu0 %v6714_v35  ;;  %4111 = vmatprep.subr.bf16.mxu1 %v7290_v4 }
 0x5a3   :  { %v4529_v43 = vpop.eup %4528 }
 0x5a4   :  { %v2599_v37 = vadd.f32 1.0, %v4529_v43  ;;  %v6759_v43 = vld [vmem:[%s7143_s6 + $0xa8] ss:$12 sps:$4 sm:$0xff]  }
 0x5a5   :  { %2804 = vmatpush1.bf16.msra.mxu0 %v6721_v59  ;;  %4112 = vmatpush3.bf16.msra.mxu1 %v6727_v44  ;;  %v4531_v45 = vpop.eup %4530  ;;  %7364 = vst [vmem:[#allocation32_spill] sm:$0xff] %v6759_v43  ;;  %v2622_v44 = vadd.f32 %v6393_v10, %v6658_v56 }
 0x5a6   :  { %2805 = vmatprep.subr.bf16.mxu0 %v6733_v11  ;;  %4113 = vmatprep.subr.bf16.mxu1 %v7290_v4  ;;  %4536 = vrcp.f32 %v2599_v37  ;;  %v2600_v32 = vadd.f32 1.0, %v4531_v45  ;;  %v4533_v60 = vpop.eup %4532  ;;  %v6765_v37 = vld [vmem:[%s7143_s6 + $0xb0] ss:$12 sps:$4 sm:$0xff]  }
 0x5a7   :  { %v4535_v22 = vpop.eup %4534  ;;  %7365 = vst [vmem:[#allocation45_spill] sm:$0xff] %v6765_v37  ;;  %v2615_v45 = vadd.f32 1.0, %v4533_v60 }
 0x5a8   :  { %4538 = vrcp.f32 %v2600_v32  ;;  %v2621_v32 = vadd.f32 %v6393_v10, %v6635_v19 }
 0x5a9   :  { %2806 = vmatpush1.bf16.msra.mxu0 %v6740_v9  ;;  %4114 = vmatpush3.bf16.msra.mxu1 %v6746_v61  ;;  %v7366_v9 = vld [vmem:[#allocation31_spill] sm:$0xff]  ;;  %4540 = vrcp.f32 %v2615_v45 }
 0x5aa   :  { %2807 = vmatprep.subr.bf16.mxu0 %v6752_v0  ;;  %4115 = vmatprep.subr.bf16.mxu1 %v7290_v4  ;;  %v2616_v0 = vadd.f32 1.0, %v4535_v22  ;;  %v2625_v11 = vunpack.c.l.bf16 %v7366_v9 }
 0x5ac   :  { %4542 = vrcp.f32 %v2616_v0 }
 0x5ad   :  { %2808 = vmatpush1.bf16.msra.mxu0 %v6759_v43  ;;  %4116 = vmatpush3.bf16.msra.mxu1 %v6765_v37  ;;  %v2626_v37 = vunpack.c.h.bf16 %v7366_v9 }
 0x5ae   :  { %2943 = vmatprep.subr.bf16.mxu0 %v6386_v8  ;;  %4121 = vmatprep.subr.bf16.mxu1 %v7290_v4 }
 0x5b0   :  { %v4537_v61 = vpop.eup %4536 }
 0x5b1   :  { %v2623_v43 = vmul.f32 %v4537_v61, %v2621_v32 }
 0x5b2   :  { %v4539_v59 = vpop.eup %4538 }
 0x5b3   :  { %v2627_v60 = vadd.f32 %v2625_v11, %v2623_v43  ;;  %v2624_v35 = vmul.f32 %v4539_v59, %v2622_v44  ;;  %v4541_v29 = vpop.eup %4540 }
 0x5b4   :  { %v2631_v22 = vsub.f32 1.0, %v4541_v29  ;;  %v2635_v20 = vmul.f32 %v4541_v29, %v6411_v36 }
 0x5b5   :  { %4544 = vtanh.f32 %v2627_v60  ;;  %v2628_v8 = vadd.f32 %v2626_v37, %v2624_v35  ;;  %v7368_v35 = vld [vmem:[#allocation16_spill] sm:$0xff] }
 0x5b6   :  { %v4543_v19 = vpop.eup %4542  ;;  %v2755_v44 = vunpack.c.l.bf16 %v7368_v35 }
 0x5b7   :  { %4546 = vtanh.f32 %v2628_v8  ;;  %v2632_v61 = vsub.f32 1.0, %v4543_v19  ;;  %v2636_v56 = vmul.f32 %v4543_v19, %v6416_v14 }
 0x5bf   :  { %v4545_v26 = vpop.eup %4544 }
 0x5c0   :  { %v2633_v45 = vmul.f32 %v4545_v26, %v2631_v22 }
 0x5c1   :  { %v4547_v32 = vpop.eup %4546 }
 0x5c2   :  { %v2634_v10 = vmul.f32 %v4547_v32, %v2632_v61  ;;  %v2637_v39 = vadd.f32 %v2635_v20, %v2633_v45  ;;  %v2756_v61 = vunpack.c.h.bf16 %v7368_v35 }
 0x5c4   :  { %v2638_v9 = vadd.f32 %v2636_v56, %v2634_v10  ;;  %v2647_v59 = vsel %vm2345_vm15, %v2637_v39, 0.0  ;;  %v6786_v8 = vsel %vm2345_vm15, %v2637_v39, %v6411_v36  ;;  %v7367_v36 = vld [vmem:[#allocation14_spill] sm:$0xff] }
 0x5c5   :  { %3701 = vst [vmem:[%s7147_s8 + $0x68] sm:$0xff] %v2647_v59  ;;  %v2740_v37 = vunpack.c.h.bf16 %v7367_v36 }
 0x5c6   :  { %v6791_v26 = vsel %vm2346_vm3, %v2638_v9, %v6416_v14  ;;  %v2648_v10 = vsel %vm2346_vm3, %v2638_v9, 0.0  ;;  %v2739_v14 = vunpack.c.l.bf16 %v7367_v36 }
 0x5c7   :  { %3702 = vst [vmem:[%s7147_s8 + $0x78] sm:$0xff] %v2648_v10  ;;  %v2792_v20 = vpack.c.bf16 %v6791_v26, %v6786_v8 }
 0x5c9   :  { %2826 = vmatmul.mubr.bf16.vlgmr.msra.gmra.mrb[104].mxu0 %v2792_v20  ;;  %4118 = vmatmul.mubr.bf16.vlgmr.msra.gmra.mrb[80].mxu1 %v2792_v20 }
 0x5ca   :  { %2944 = vmatpush1.bf16.msra.mxu0 %v6428_v62  ;;  %4122 = vmatpush3.bf16.msra.mxu1 %v6434_v58 }
 0x5cb   :  { %2945 = vmatprep.subr.bf16.mxu0 %v6440_v48  ;;  %4123 = vmatprep.subr.bf16.mxu1 %v7290_v4 }
 0x5cc   :  { %2975 = vmatprep.mubr.bf16.mxu0 %v7291_v51  ;;  %4137 = vmatprep.mubr.msk.bf16.mxu1 %vm4772_vm0, %v7290_v4 }
 0x5ce   :  { %2946 = vmatpush1.bf16.msra.mxu0 %v6450_v15  ;;  %4124 = vmatpush3.bf16.msra.mxu1 %v6456_v49 }
 0x5cf   :  { %2947 = vmatprep.subr.bf16.mxu0 %v6462_v52  ;;  %4125 = vmatprep.subr.bf16.mxu1 %v7290_v4 }
 0x5d2   :  { %2948 = vmatpush1.bf16.msra.mxu0 %v6469_v47  ;;  %4126 = vmatpush3.bf16.msra.mxu1 %v6475_v57 }
 0x5d3   :  { %2949 = vmatprep.subr.bf16.mxu0 %v6481_v53  ;;  %4127 = vmatprep.subr.bf16.mxu1 %v7290_v4 }
 0x5d6   :  { %2950 = vmatpush1.bf16.msra.mxu0 %v6488_v2  ;;  %4128 = vmatpush3.bf16.msra.mxu1 %v6494_v30 }
 0x5d7   :  { %2951 = vmatprep.subr.bf16.mxu0 %v6500_v55  ;;  %4129 = vmatprep.subr.bf16.mxu1 %v7290_v4 }
 0x5da   :  { %2952 = vmatpush1.bf16.msra.mxu0 %v6507_v38  ;;  %4130 = vmatpush3.bf16.msra.mxu1 %v6513_v50 }
 0x5db   :  { %2953 = vmatprep.subr.bf16.mxu0 %v6519_v24  ;;  %4131 = vmatprep.subr.bf16.mxu1 %v7290_v4 }
 0x5de   :  { %2954 = vmatpush1.bf16.msra.mxu0 %v6526_v21  ;;  %4132 = vmatpush3.bf16.msra.mxu1 %v6532_v27 }
 0x5df   :  { %2955 = vmatprep.subr.bf16.mxu0 %v6538_v16  ;;  %4133 = vmatprep.subr.bf16.mxu1 %v7290_v4 }
 0x5e2   :  { %2956 = vmatpush1.bf16.msra.mxu0 %v6545_v42  ;;  %4134 = vmatpush3.bf16.msra.mxu1 %v6551_v31 }
 0x5e3   :  { %2957 = vmatprep.subr.bf16.mxu0 %v6557_v6  ;;  %4135 = vmatprep.subr.bf16.mxu1 %v7290_v4 }
 0x5e6   :  { %2958 = vmatpush1.bf16.msra.mxu0 %v6564_v3  ;;  %4136 = vmatpush3.bf16.msra.mxu1 %v6570_v54 }
 0x5e7   :  { %3081 = vmatprep.subr.bf16.mxu0 %v6576_v7  ;;  %4141 = vmatprep.subr.bf16.mxu1 %v7290_v4 }
 0x663   :  { %v2689_v39 = vpop.f32.mrb[100].mxu0  ;;  %v2732_v29 = vpop.f32.mrb[76].mxu1 }
 0x664   :  { %v2741_v11 = vadd.f32 %v2739_v14, %v2689_v39  ;;  %v2691_v0 = vpop.f32.mrb[101].mxu0  ;;  %v4099_v43 = vpop.f32.mrb[77].mxu1 }
 0x665   :  { %v2757_v60 = vadd.f32 %v2755_v44, %v2691_v0  ;;  %v2693_v19 = vpop.f32.mrb[102].mxu0  ;;  %v2735_v22 = vpop.f32.mrb[78].mxu1  ;;  %v2771_v43 = vadd.f32 %v6314_v33, %v2732_v29 }
 0x666   :  { %v3703_v45 = vmul.f32 -1.442695, %v2741_v11  ;;  %v2742_v32 = vadd.f32 %v2740_v37, %v2693_v19  ;;  %v2695_v56 = vpop.f32.mrb[103].mxu0  ;;  %v4100_v9 = vpop.f32.mrb[79].mxu1 }
 0x667   :  { %v2758_v59 = vadd.f32 %v2756_v61, %v2695_v56  ;;  %v3705_v20 = vmul.f32 -1.442695, %v2757_v60  ;;  %v7369_v61 = vld [vmem:[#allocation15_spill] sm:$0xff]  ;;  %v2772_v60 = vadd.f32 %v6314_v33, %v2735_v22 }
 0x668   :  { %4548 = vpow2.f32 %v3703_v45  ;;  %v3704_v10 = vmul.f32 -1.442695, %v2742_v32  ;;  %v2775_v45 = vunpack.c.l.bf16 %v7369_v61  ;;  %v2776_v56 = vunpack.c.h.bf16 %v7369_v61 }
 0x669   :  { %v3706_v7 = vmul.f32 -1.442695, %v2758_v59 }
 0x66a   :  { %4550 = vpow2.f32 %v3704_v10 }
 0x66b   :  { %4552 = vpow2.f32 %v3705_v20 }
 0x66c   :  { %4554 = vpow2.f32 %v3706_v7 }
 0x672   :  { %v4549_v14 = vpop.eup %4548 }
 0x673   :  { %v2749_v39 = vadd.f32 1.0, %v4549_v14 }
 0x674   :  { %v4551_v36 = vpop.eup %4550 }
 0x675   :  { %4556 = vrcp.f32 %v2749_v39  ;;  %v2750_v44 = vadd.f32 1.0, %v4551_v36  ;;  %v4553_v0 = vpop.eup %4552 }
 0x676   :  { %v4555_v35 = vpop.eup %4554  ;;  %v2765_v11 = vadd.f32 1.0, %v4553_v0 }
 0x677   :  { %4558 = vrcp.f32 %v2750_v44  ;;  %v2766_v37 = vadd.f32 1.0, %v4555_v35 }
 0x678   :  { %4560 = vrcp.f32 %v2765_v11 }
 0x679   :  { %4562 = vrcp.f32 %v2766_v37 }
 0x67f   :  { %v4557_v19 = vpop.eup %4556 }
 0x680   :  { %v2773_v32 = vmul.f32 %v4557_v19, %v2771_v43 }
 0x681   :  { %v4559_v7 = vpop.eup %4558 }
 0x682   :  { %v2777_v9 = vadd.f32 %v2775_v45, %v2773_v32  ;;  %v2774_v59 = vmul.f32 %v4559_v7, %v2772_v60  ;;  %v4561_v20 = vpop.eup %4560  ;;  %v7371_v60 = vld [vmem:[#allocation28_spill] sm:$0xff] }
 0x683   :  { %v4563_v14 = vpop.eup %4562  ;;  %v2781_v29 = vsub.f32 1.0, %v4561_v20  ;;  %v2785_v36 = vmul.f32 %v4561_v20, %v6598_v13  ;;  %v2893_v7 = vunpack.c.l.bf16 %v7371_v60 }
 0x684   :  { %4564 = vtanh.f32 %v2777_v9  ;;  %v2778_v10 = vadd.f32 %v2776_v56, %v2774_v59  ;;  %v2782_v44 = vsub.f32 1.0, %v4563_v14  ;;  %v2786_v33 = vmul.f32 %v4563_v14, %v6603_v46 }
 0x686   :  { %4566 = vtanh.f32 %v2778_v10  ;;  %v2878_v10 = vunpack.c.h.bf16 %v7370_v28  ;;  %v7375_v28 = vld [vmem:[#allocation43_spill] sm:$0xff] }
 0x68e   :  { %v4565_v39 = vpop.eup %4564 }
 0x68f   :  { %v2783_v0 = vmul.f32 %v4565_v39, %v2781_v29  ;;  %v2894_v39 = vunpack.c.h.bf16 %v7371_v60 }
 0x690   :  { %v4567_v35 = vpop.eup %4566 }
 0x691   :  { %v2784_v22 = vmul.f32 %v4567_v35, %v2782_v44  ;;  %v2787_v11 = vadd.f32 %v2785_v36, %v2783_v0 }
 0x693   :  { %v2788_v43 = vadd.f32 %v2786_v33, %v2784_v22  ;;  %v2931_v37 = vsel %vm2051_vm13, %v2787_v11, 0.0  ;;  %v6853_v19 = vsel %vm2051_vm13, %v2787_v11, %v6598_v13 }
 0x694   :  { %3711 = vst [vmem:[%s7147_s8 + $0xa0] sm:$0xff] %v2931_v37  ;;  %v7373_v37 = vld [vmem:[#allocation41_spill] sm:$0xff] }
 0x695   :  { %v6858_v61 = vsel %vm2052_vm14, %v2788_v43, %v6603_v46  ;;  %v2932_v45 = vsel %vm2052_vm14, %v2788_v43, 0.0  ;;  %v7372_v43 = vld [vmem:[#allocation40_spill] sm:$0xff] }
 0x696   :  { %3712 = vst [vmem:[%s7147_s8 + $0xb0] sm:$0xff] %v2932_v45  ;;  %v2942_v32 = vpack.c.bf16 %v6858_v61, %v6853_v19 }
 0x698   :  { %2976 = vmatmul.mubr.bf16.vlgmr.msra.gmra.mrb[108].mxu0 %v2942_v32  ;;  %4138 = vmatmul.mubr.bf16.vlgmr.msra.gmra.mrb[84].mxu1 %v2942_v32  ;;  %v7374_v32 = vld [vmem:[#allocation42_spill] sm:$0xff] }
 0x699   :  { %3082 = vmatpush1.bf16.msra.mxu0 %v6615_v40  ;;  %4142 = vmatpush3.bf16.msra.mxu1 %v6621_v41 }
 0x69a   :  { %3083 = vmatprep.subr.bf16.mxu0 %v6627_v12  ;;  %4143 = vmatprep.subr.bf16.mxu1 %v7290_v4 }
 0x69b   :  { %3113 = vmatprep.mubr.bf16.mxu0 %v7291_v51  ;;  %4157 = vmatprep.mubr.msk.bf16.mxu1 %vm4772_vm0, %v7290_v4 }
 0x69c   :  { %v2827_v13 = vpop.f32.mrb[104].mxu0  ;;  %v2870_v46 = vpop.f32.mrb[80].mxu1 }
 0x69d   :  { %3084 = vmatpush1.bf16.msra.mxu0 %v6641_v23  ;;  %4144 = vmatpush3.bf16.msra.mxu1 %v6647_v25  ;;  %v2879_v56 = vadd.f32 %v2877_v63, %v2827_v13  ;;  %v2829_v9 = vpop.f32.mrb[105].mxu0  ;;  %v4119_v59 = vpop.f32.mrb[81].mxu1  ;;  %v7376_v63 = vld [vmem:[#allocation44_spill] sm:$0xff] }
 0x69e   :  { %3085 = vmatprep.subr.bf16.mxu0 %v6654_v34  ;;  %4145 = vmatprep.subr.bf16.mxu1 %v7290_v4  ;;  %v2895_v20 = vadd.f32 %v2893_v7, %v2829_v9  ;;  %v2831_v14 = vpop.f32.mrb[106].mxu0  ;;  %v2873_v29 = vpop.f32.mrb[82].mxu1  ;;  %v7377_v7 = vld [vmem:[#allocation38_spill] sm:$0xff] }
 0x69f   :  { %v3707_v36 = vmul.f32 -1.442695, %v2879_v56  ;;  %v2880_v44 = vadd.f32 %v2878_v10, %v2831_v14  ;;  %v2833_v0 = vpop.f32.mrb[107].mxu0  ;;  %v4120_v35 = vpop.f32.mrb[83].mxu1  ;;  %v7378_v56 = vld [vmem:[#allocation35_spill] sm:$0xff]  ;;  %v7379_v59 = vld [vmem:[#allocation6_spill] sm:$0xff] }
 0x6a0   :  { %v2896_v33 = vadd.f32 %v2894_v39, %v2833_v0  ;;  %v3709_v11 = vmul.f32 -1.442695, %v2895_v20  ;;  %v7380_v20 = vld [vmem:[#allocation8_spill] sm:$0xff]  ;;  %v7381_v14 = vld [vmem:[#allocation7_spill] sm:$0xff]  ;;  %v7382_v39 = vld [vmem:[#allocation13_spill] sm:$0xff] }
 0x6a1   :  { %3086 = vmatpush1.bf16.msra.mxu0 %v6664_v1  ;;  %4146 = vmatpush3.bf16.msra.mxu1 %v6670_v18  ;;  %4568 = vpow2.f32 %v3707_v36  ;;  %v3708_v22 = vmul.f32 -1.442695, %v2880_v44  ;;  %v7383_v0 = vld [vmem:[#allocation32_spill] sm:$0xff]  ;;  %v7384_v35 = vld [vmem:[#allocation45_spill] sm:$0xff] }
 0x6a2   :  { %3087 = vmatprep.subr.bf16.mxu0 %v6676_v5  ;;  %4147 = vmatprep.subr.bf16.mxu1 %v7290_v4  ;;  %v3710_v45 = vmul.f32 -1.442695, %v2896_v33 }
 0x6a3   :  { %4570 = vpow2.f32 %v3708_v22  ;;  %v7385_v22 = vld [vmem:[#allocation17_spill] sm:$0xff] }
 0x6a4   :  { %4572 = vpow2.f32 %v3709_v11  ;;  %v7386_v11 = vld [vmem:[#allocation34_spill] sm:$0xff] }
 0x6a5   :  { %3088 = vmatpush1.bf16.msra.mxu0 %v6683_v17  ;;  %4148 = vmatpush3.bf16.msra.mxu1 %v7372_v43  ;;  %4574 = vpow2.f32 %v3710_v45  ;;  %v2909_v45 = vadd.f32 %v7386_v11, %v2870_v46 }
 0x6a6   :  { %3089 = vmatprep.subr.bf16.mxu0 %v7373_v37  ;;  %4149 = vmatprep.subr.bf16.mxu1 %v7290_v4 }
 0x6a9   :  { %3090 = vmatpush1.bf16.msra.mxu0 %v7374_v32  ;;  %4150 = vmatpush3.bf16.msra.mxu1 %v7375_v28 }
 0x6aa   :  { %3091 = vmatprep.subr.bf16.mxu0 %v7376_v63  ;;  %4151 = vmatprep.subr.bf16.mxu1 %v7290_v4 }
 0x6ab   :  { %v4569_v13 = vpop.eup %4568 }
 0x6ac   :  { %v2887_v60 = vadd.f32 1.0, %v4569_v13 }
 0x6ad   :  { %3092 = vmatpush1.bf16.msra.mxu0 %v7377_v7  ;;  %4152 = vmatpush3.bf16.msra.mxu1 %v7378_v56  ;;  %v4571_v9 = vpop.eup %4570 }
 0x6ae   :  { %3093 = vmatprep.subr.bf16.mxu0 %v7379_v59  ;;  %4153 = vmatprep.subr.bf16.mxu1 %v7290_v4  ;;  %4576 = vrcp.f32 %v2887_v60  ;;  %v2888_v10 = vadd.f32 1.0, %v4571_v9  ;;  %v4573_v36 = vpop.eup %4572  ;;  %v7387_v9 = vld [vmem:[#allocation29_spill] sm:$0xff] }
 0x6af   :  { %v4575_v44 = vpop.eup %4574  ;;  %v2903_v33 = vadd.f32 1.0, %v4573_v36 }
 0x6b0   :  { %4578 = vrcp.f32 %v2888_v10  ;;  %v2904_v13 = vadd.f32 1.0, %v4575_v44  ;;  %v2913_v10 = vunpack.c.l.bf16 %v7387_v9 }
 0x6b1   :  { %3094 = vmatpush1.bf16.msra.mxu0 %v7380_v20  ;;  %4154 = vmatpush3.bf16.msra.mxu1 %v7381_v14  ;;  %4580 = vrcp.f32 %v2903_v33  ;;  %v2910_v14 = vadd.f32 %v7386_v11, %v2873_v29 }
 0x6b2   :  { %3095 = vmatprep.subr.bf16.mxu0 %v7382_v39  ;;  %4155 = vmatprep.subr.bf16.mxu1 %v7290_v4  ;;  %4582 = vrcp.f32 %v2904_v13 }
 0x6b5   :  { %3096 = vmatpush1.bf16.msra.mxu0 %v7383_v0  ;;  %4156 = vmatpush3.bf16.msra.mxu1 %v7384_v35  ;;  %v2914_v0 = vunpack.c.h.bf16 %v7387_v9 }
 0x6b6   :  { %3231 = vmatprep.subr.bf16.mxu0 %v7385_v22  ;;  %4161 = vmatprep.subr.bf16.mxu1 %v7290_v4 }
 0x6b8   :  { %v4577_v60 = vpop.eup %4576 }
 0x6b9   :  { %v2911_v39 = vmul.f32 %v4577_v60, %v2909_v45 }
 0x6ba   :  { %v4579_v20 = vpop.eup %4578 }
 0x6bb   :  { %v2915_v59 = vadd.f32 %v2913_v10, %v2911_v39  ;;  %v2912_v35 = vmul.f32 %v4579_v20, %v2910_v14  ;;  %v4581_v22 = vpop.eup %4580  ;;  %v7389_v14 = vld [vmem:[#allocation37_spill] sm:$0xff] }
 0x6bc   :  { %v4583_v56 = vpop.eup %4582  ;;  %v2919_v46 = vsub.f32 1.0, %v4581_v22  ;;  %v2923_v7 = vmul.f32 %v4581_v22, %v6786_v8  ;;  %v6976_v22 = vld [vmem:[%s7145_s5] ss:$0 sm:$0xff] }
 0x6bd   :  { %4584 = vtanh.f32 %v2915_v59  ;;  %v2916_v36 = vadd.f32 %v2914_v0, %v2912_v35  ;;  %v2920_v63 = vsub.f32 1.0, %v4583_v56  ;;  %v2924_v29 = vmul.f32 %v4583_v56, %v6791_v26 }
 0x6bf   :  { %4586 = vtanh.f32 %v2916_v36 }
 0x6c7   :  { %v4585_v44 = vpop.eup %4584 }
 0x6c8   :  { %v2921_v45 = vmul.f32 %v4585_v44, %v2919_v46 }
 0x6c9   :  { %v4587_v33 = vpop.eup %4586 }
 0x6ca   :  { %v2922_v11 = vmul.f32 %v4587_v33, %v2920_v63  ;;  %v2925_v60 = vadd.f32 %v2923_v7, %v2921_v45  ;;  %v7393_v33 = vld [vmem:[#allocation19_spill] sm:$0xff] }
 0x6cc   :  { %v2926_v9 = vadd.f32 %v2924_v29, %v2922_v11  ;;  %v2935_v20 = vsel %vm2049_vm11, %v2925_v60, 0.0  ;;  %v6920_v59 = vsel %vm2049_vm11, %v2925_v60, %v6786_v8  ;;  %v3063_v29 = vunpack.c.l.bf16 %v7393_v33 }
 0x6cd   :  { %3713 = vst [vmem:[%s7147_s8 + $0x48] sm:$0xff] %v2935_v20  ;;  %v3064_v20 = vunpack.c.h.bf16 %v7393_v33  ;;  %v7402_v33 = vld [vmem:[#allocation13_spill] sm:$0xff] }
 0x6ce   :  { %v6925_v0 = vsel %vm2050_vm12, %v2926_v9, %v6791_v26  ;;  %v2936_v63 = vsel %vm2050_vm12, %v2926_v9, 0.0 }
 0x6cf   :  { %3714 = vst [vmem:[%s7147_s8 + $0x58] sm:$0xff] %v2936_v63  ;;  %v3080_v7 = vpack.c.bf16 %v6925_v0, %v6920_v59 }
 0x6d1   :  { %3114 = vmatmul.mubr.bf16.vlgmr.msra.gmra.mrb[112].mxu0 %v3080_v7  ;;  %4158 = vmatmul.mubr.bf16.vlgmr.msra.gmra.mrb[88].mxu1 %v3080_v7 }
 0x6d2   :  { %3232 = vmatpush1.bf16.msra.mxu0 %v6428_v62  ;;  %4162 = vmatpush3.bf16.msra.mxu1 %v6434_v58  ;;  %v7390_v62 = vld [vmem:[#allocation39_spill] sm:$0xff]  ;;  %v7391_v58 = vld [vmem:[#allocation18_spill] sm:$0xff] }
 0x6d3   :  { %3233 = vmatprep.subr.bf16.mxu0 %v6440_v48  ;;  %4163 = vmatprep.subr.bf16.mxu1 %v7290_v4  ;;  %v3027_v48 = vunpack.c.l.bf16 %v7391_v58 }
 0x6d4   :  { %3263 = vmatprep.mubr.bf16.mxu0 %v7291_v51  ;;  %4177 = vmatprep.mubr.msk.bf16.mxu1 %vm4772_vm0, %v7290_v4 }
 0x6d6   :  { %3234 = vmatpush1.bf16.msra.mxu0 %v6450_v15  ;;  %4164 = vmatpush3.bf16.msra.mxu1 %v6456_v49 }
 0x6d7   :  { %3235 = vmatprep.subr.bf16.mxu0 %v6462_v52  ;;  %4165 = vmatprep.subr.bf16.mxu1 %v7290_v4  ;;  %v7392_v52 = vld [vmem:[#allocation20_spill] sm:$0xff] }
 0x6da   :  { %3236 = vmatpush1.bf16.msra.mxu0 %v6469_v47  ;;  %4166 = vmatpush3.bf16.msra.mxu1 %v6475_v57  ;;  %v3043_v47 = vunpack.c.l.bf16 %v7392_v52 }
 0x6db   :  { %3237 = vmatprep.subr.bf16.mxu0 %v6481_v53  ;;  %4167 = vmatprep.subr.bf16.mxu1 %v7290_v4 }
 0x6de   :  { %3238 = vmatpush1.bf16.msra.mxu0 %v6488_v2  ;;  %4168 = vmatpush3.bf16.msra.mxu1 %v6494_v30  ;;  %v3028_v30 = vunpack.c.h.bf16 %v7391_v58 }
 0x6df   :  { %3239 = vmatprep.subr.bf16.mxu0 %v6500_v55  ;;  %4169 = vmatprep.subr.bf16.mxu1 %v7290_v4 }
 0x6e2   :  { %3240 = vmatpush1.bf16.msra.mxu0 %v6507_v38  ;;  %4170 = vmatpush3.bf16.msra.mxu1 %v6513_v50 }
 0x6e3   :  { %3241 = vmatprep.subr.bf16.mxu0 %v6519_v24  ;;  %4171 = vmatprep.subr.bf16.mxu1 %v7290_v4  ;;  %v3044_v24 = vunpack.c.h.bf16 %v7392_v52 }
 0x6e6   :  { %3242 = vmatpush1.bf16.msra.mxu0 %v6526_v21  ;;  %4172 = vmatpush3.bf16.msra.mxu1 %v6532_v27 }
 0x6e7   :  { %3243 = vmatprep.subr.bf16.mxu0 %v6538_v16  ;;  %4173 = vmatprep.subr.bf16.mxu1 %v7290_v4 }
 0x6ea   :  { %3244 = vmatpush1.bf16.msra.mxu0 %v6545_v42  ;;  %4174 = vmatpush3.bf16.msra.mxu1 %v6551_v31 }
 0x6eb   :  { %3245 = vmatprep.subr.bf16.mxu0 %v6557_v6  ;;  %4175 = vmatprep.subr.bf16.mxu1 %v7290_v4 }
 0x6ee   :  { %3246 = vmatpush1.bf16.msra.mxu0 %v6564_v3  ;;  %4176 = vmatpush3.bf16.msra.mxu1 %v6570_v54 }
 0x6ef   :  { %3369 = vmatprep.subr.bf16.mxu0 %v7390_v62  ;;  %4181 = vmatprep.subr.bf16.mxu1 %v7290_v4 }
 0x76b   :  { %v2977_v15 = vpop.f32.mrb[108].mxu0  ;;  %v3020_v49 = vpop.f32.mrb[84].mxu1 }
 0x76c   :  { %v3029_v57 = vadd.f32 %v3027_v48, %v2977_v15  ;;  %v2979_v53 = vpop.f32.mrb[109].mxu0  ;;  %v4139_v2 = vpop.f32.mrb[85].mxu1  ;;  %v3059_v46 = vadd.f32 %v6976_v22, %v3020_v49 }
 0x76d   :  { %v3045_v55 = vadd.f32 %v3043_v47, %v2979_v53  ;;  %v2981_v38 = vpop.f32.mrb[110].mxu0  ;;  %v3023_v50 = vpop.f32.mrb[86].mxu1 }
 0x76e   :  { %v3715_v21 = vmul.f32 -1.442695, %v3029_v57  ;;  %v3030_v27 = vadd.f32 %v3028_v30, %v2981_v38  ;;  %v2983_v16 = vpop.f32.mrb[111].mxu0  ;;  %v4140_v42 = vpop.f32.mrb[87].mxu1  ;;  %v3060_v60 = vadd.f32 %v6976_v22, %v3023_v50 }
 0x76f   :  { %v3046_v31 = vadd.f32 %v3044_v24, %v2983_v16  ;;  %v3717_v3 = vmul.f32 -1.442695, %v3045_v55 }
 0x770   :  { %4588 = vpow2.f32 %v3715_v21  ;;  %v3716_v6 = vmul.f32 -1.442695, %v3030_v27 }
 0x771   :  { %v3718_v54 = vmul.f32 -1.442695, %v3046_v31 }
 0x772   :  { %4590 = vpow2.f32 %v3716_v6  ;;  %v7395_v6 = vld [vmem:[#allocation26_spill] sm:$0xff] }
 0x773   :  { %4592 = vpow2.f32 %v3717_v3  ;;  %v3181_v3 = vunpack.c.l.bf16 %v7395_v6 }
 0x774   :  { %4594 = vpow2.f32 %v3718_v54 }
 0x77a   :  { %v4589_v8 = vpop.eup %4588 }
 0x77b   :  { %v3037_v26 = vadd.f32 1.0, %v4589_v8 }
 0x77c   :  { %v4591_v56 = vpop.eup %4590 }
 0x77d   :  { %4596 = vrcp.f32 %v3037_v26  ;;  %v3038_v35 = vadd.f32 1.0, %v4591_v56  ;;  %v4593_v13 = vpop.eup %4592  ;;  %v3182_v56 = vunpack.c.h.bf16 %v7395_v6 }
 0x77e   :  { %v4595_v10 = vpop.eup %4594  ;;  %v3053_v36 = vadd.f32 1.0, %v4593_v13 }
 0x77f   :  { %4598 = vrcp.f32 %v3038_v35  ;;  %v3054_v44 = vadd.f32 1.0, %v4595_v10 }
 0x780   :  { %4600 = vrcp.f32 %v3053_v36 }
 0x781   :  { %4602 = vrcp.f32 %v3054_v44  ;;  %v7399_v44 = vld [vmem:[#allocation6_spill] sm:$0xff] }
 0x787   :  { %v4597_v45 = vpop.eup %4596 }
 0x788   :  { %v3061_v11 = vmul.f32 %v4597_v45, %v3059_v46  ;;  %v7401_v45 = vld [vmem:[#allocation7_spill] sm:$0xff] }
 0x789   :  { %v4599_v9 = vpop.eup %4598 }
 0x78a   :  { %v3065_v63 = vadd.f32 %v3063_v29, %v3061_v11  ;;  %v3062_v7 = vmul.f32 %v4599_v9, %v3060_v60  ;;  %v4601_v58 = vpop.eup %4600  ;;  %v7403_v60 = vld [vmem:[#allocation32_spill] sm:$0xff]  ;;  %v7404_v9 = vld [vmem:[#allocation45_spill] sm:$0xff] }
 0x78b   :  { %v4603_v48 = vpop.eup %4602  ;;  %v3069_v15 = vsub.f32 1.0, %v4601_v58  ;;  %v3073_v52 = vmul.f32 %v4601_v58, %v6853_v19 }
 0x78c   :  { %4604 = vtanh.f32 %v3065_v63  ;;  %v3066_v62 = vadd.f32 %v3064_v20, %v3062_v7  ;;  %v3070_v47 = vsub.f32 1.0, %v4603_v48  ;;  %v3074_v2 = vmul.f32 %v4603_v48, %v6858_v61  ;;  %v7046_v63 = vld [vmem:[%s7148_s7] ss:$0 sm:$0xff] }
 0x78d   :  { %v7405_v48 = vld [vmem:[#allocation27_spill] sm:$0xff] }
 0x78e   :  { %4606 = vtanh.f32 %v3066_v62 }
 0x796   :  { %v4605_v49 = vpop.eup %4604 }
 0x797   :  { %v3071_v57 = vmul.f32 %v4605_v49, %v3069_v15  ;;  %v3201_v15 = vunpack.c.l.bf16 %v7405_v48 }
 0x798   :  { %v4607_v53 = vpop.eup %4606 }
 0x799   :  { %v3072_v30 = vmul.f32 %v4607_v53, %v3070_v47  ;;  %v3075_v55 = vadd.f32 %v3073_v52, %v3071_v57  ;;  %v3202_v47 = vunpack.c.h.bf16 %v7405_v48  ;;  %v7408_v48 = vld [vmem:[#allocation22_spill] sm:$0xff] }
 0x79b   :  { %v3076_v38 = vadd.f32 %v3074_v2, %v3072_v30  ;;  %v3219_v50 = vsel %vm1755_vm9, %v3075_v55, 0.0  ;;  %v6992_v24 = vsel %vm1755_vm9, %v3075_v55, %v6853_v19  ;;  %v7394_v19 = vld [vmem:[#allocation4_spill] sm:$0xff] }
 0x79c   :  { %3723 = vst [vmem:[%s7147_s8 + $0xc0] sm:$0xff] %v3219_v50  ;;  %v3166_v54 = vunpack.c.h.bf16 %v7394_v19 }
 0x79d   :  { %v6997_v21 = vsel %vm1756_vm10, %v3076_v38, %v6858_v61  ;;  %v3220_v27 = vsel %vm1756_vm10, %v3076_v38, 0.0  ;;  %v3165_v61 = vunpack.c.l.bf16 %v7394_v19 }
 0x79e   :  { %3724 = vst [vmem:[%s7147_s8 + $0xd0] sm:$0xff] %v3220_v27  ;;  %v3230_v16 = vpack.c.bf16 %v6997_v21, %v6992_v24 }
 0x7a0   :  { %3264 = vmatmul.mubr.bf16.vlgmr.msra.gmra.mrb[116].mxu0 %v3230_v16  ;;  %4178 = vmatmul.mubr.bf16.vlgmr.msra.gmra.mrb[92].mxu1 %v3230_v16 }
 0x7a1   :  { %3370 = vmatpush1.bf16.msra.mxu0 %v6615_v40  ;;  %4182 = vmatpush3.bf16.msra.mxu1 %v6621_v41 }
 0x7a2   :  { %3371 = vmatprep.subr.bf16.mxu0 %v6627_v12  ;;  %4183 = vmatprep.subr.bf16.mxu1 %v7290_v4 }
 0x7a3   :  { %3401 = vmatprep.mubr.bf16.mxu0 %v7291_v51  ;;  %4197 = vmatprep.mubr.msk.bf16.mxu1 %vm4772_vm0, %v7290_v4  ;;  %vm7412_vm0 = vcmp.gt.s32.totalorder %v7389_v14, 0 }
 0x7a4   :  { %v3115_v42 = vpop.f32.mrb[112].mxu0  ;;  %v3158_v31 = vpop.f32.mrb[88].mxu1  ;;  %vm7413_vm2 = vmmov %vm7412_vm0 }
 0x7a5   :  { %3372 = vmatpush1.bf16.msra.mxu0 %v6641_v23  ;;  %4184 = vmatpush3.bf16.msra.mxu1 %v6647_v25  ;;  %v3167_v40 = vadd.f32 %v3165_v61, %v3115_v42  ;;  %v3117_v41 = vpop.f32.mrb[113].mxu0  ;;  %v4159_v12 = vpop.f32.mrb[89].mxu1  ;;  %v3197_v7 = vadd.f32 %v7046_v63, %v3158_v31 }
 0x7a6   :  { %3373 = vmatprep.subr.bf16.mxu0 %v6654_v34  ;;  %4185 = vmatprep.subr.bf16.mxu1 %v7290_v4  ;;  %v3183_v51 = vadd.f32 %v3181_v3, %v3117_v41  ;;  %v3119_v8 = vpop.f32.mrb[114].mxu0  ;;  %v3161_v26 = vpop.f32.mrb[90].mxu1 }
 0x7a7   :  { %v3719_v35 = vmul.f32 -1.442695, %v3167_v40  ;;  %v3168_v13 = vadd.f32 %v3166_v54, %v3119_v8  ;;  %v3121_v10 = vpop.f32.mrb[115].mxu0  ;;  %v4160_v23 = vpop.f32.mrb[91].mxu1  ;;  %v7406_v8 = vld [vmem:[#allocation21_spill] sm:$0xff] }
 0x7a8   :  { %v3184_v36 = vadd.f32 %v3182_v56, %v3121_v10  ;;  %v3721_v34 = vmul.f32 -1.442695, %v3183_v51 }
 0x7a9   :  { %3374 = vmatpush1.bf16.msra.mxu0 %v6664_v1  ;;  %4186 = vmatpush3.bf16.msra.mxu1 %v6670_v18  ;;  %4608 = vpow2.f32 %v3719_v35  ;;  %v3720_v25 = vmul.f32 -1.442695, %v3168_v13  ;;  %v7396_v1 = vld [vmem:[#allocation44_spill] sm:$0xff]  ;;  %v7407_v35 = vld [vmem:[#allocation23_spill] sm:$0xff] }
 0x7aa   :  { %3375 = vmatprep.subr.bf16.mxu0 %v6676_v5  ;;  %4187 = vmatprep.subr.bf16.mxu1 %v7290_v4  ;;  %v3722_v46 = vmul.f32 -1.442695, %v3184_v36  ;;  %v3331_v13 = vunpack.c.l.bf16 %v7407_v35  ;;  %v3316_v36 = vunpack.c.h.bf16 %v7406_v8 }
 0x7ab   :  { %4610 = vpow2.f32 %v3720_v25 }
 0x7ac   :  { %4612 = vpow2.f32 %v3721_v34 }
 0x7ad   :  { %3376 = vmatpush1.bf16.msra.mxu0 %v6683_v17  ;;  %4188 = vmatpush3.bf16.msra.mxu1 %v7372_v43  ;;  %4614 = vpow2.f32 %v3722_v46  ;;  %v7397_v17 = vld [vmem:[#allocation38_spill] sm:$0xff]  ;;  %v7398_v43 = vld [vmem:[#allocation35_spill] sm:$0xff] }
 0x7ae   :  { %3377 = vmatprep.subr.bf16.mxu0 %v7373_v37  ;;  %4189 = vmatprep.subr.bf16.mxu1 %v7290_v4 }
 0x7b1   :  { %3378 = vmatpush1.bf16.msra.mxu0 %v7374_v32  ;;  %4190 = vmatpush3.bf16.msra.mxu1 %v7375_v28  ;;  %v7400_v28 = vld [vmem:[#allocation8_spill] sm:$0xff] }
 0x7b2   :  { %3379 = vmatprep.subr.bf16.mxu0 %v7396_v1  ;;  %4191 = vmatprep.subr.bf16.mxu1 %v7290_v4  ;;  %v3332_v1 = vunpack.c.h.bf16 %v7407_v35 }
 0x7b3   :  { %v4609_v18 = vpop.eup %4608 }
 0x7b4   :  { %v3175_v5 = vadd.f32 1.0, %v4609_v18 }
 0x7b5   :  { %3380 = vmatpush1.bf16.msra.mxu0 %v7397_v17  ;;  %4192 = vmatpush3.bf16.msra.mxu1 %v7398_v43  ;;  %v4611_v37 = vpop.eup %4610 }
 0x7b6   :  { %3381 = vmatprep.subr.bf16.mxu0 %v7399_v44  ;;  %4193 = vmatprep.subr.bf16.mxu1 %v7290_v4  ;;  %4616 = vrcp.f32 %v3175_v5  ;;  %v3176_v32 = vadd.f32 1.0, %v4611_v37  ;;  %v4613_v29 = vpop.eup %4612 }
 0x7b7   :  { %v4615_v11 = vpop.eup %4614  ;;  %v3191_v20 = vadd.f32 1.0, %v4613_v29 }
 0x7b8   :  { %4618 = vrcp.f32 %v3176_v32  ;;  %v3192_v62 = vadd.f32 1.0, %v4615_v11 }
 0x7b9   :  { %3382 = vmatpush1.bf16.msra.mxu0 %v7400_v28  ;;  %4194 = vmatpush3.bf16.msra.mxu1 %v7401_v45  ;;  %4620 = vrcp.f32 %v3191_v20 }
 0x7ba   :  { %3383 = vmatprep.subr.bf16.mxu0 %v7402_v33  ;;  %4195 = vmatprep.subr.bf16.mxu1 %v7290_v4  ;;  %v3198_v4 = vadd.f32 %v7046_v63, %v3161_v26  ;;  %4622 = vrcp.f32 %v3192_v62 }
 0x7bd   :  { %3384 = vmatpush1.bf16.msra.mxu0 %v7403_v60  ;;  %4196 = vmatpush3.bf16.msra.mxu1 %v7404_v9 }
 0x7c0   :  { %v4617_v58 = vpop.eup %4616 }
 0x7c1   :  { %v3199_v49 = vmul.f32 %v4617_v58, %v3197_v7 }
 0x7c2   :  { %v4619_v52 = vpop.eup %4618 }
 0x7c3   :  { %v3203_v57 = vadd.f32 %v3201_v15, %v3199_v49  ;;  %v3200_v53 = vmul.f32 %v4619_v52, %v3198_v4  ;;  %v4621_v30 = vpop.eup %4620  ;;  %v3351_v15 = vunpack.c.l.bf16 %v7408_v48 }
 0x7c4   :  { %v4623_v55 = vpop.eup %4622  ;;  %v3207_v38 = vsub.f32 1.0, %v4621_v30  ;;  %v3211_v27 = vmul.f32 %v4621_v30, %v6920_v59 }
 0x7c5   :  { %4624 = vtanh.f32 %v3203_v57  ;;  %v3204_v2 = vadd.f32 %v3202_v47, %v3200_v53  ;;  %v3208_v16 = vsub.f32 1.0, %v4623_v55  ;;  %v3212_v42 = vmul.f32 %v4623_v55, %v6925_v0 }
 0x7c6   :  { %v3352_v47 = vunpack.c.h.bf16 %v7408_v48 }
 0x7c7   :  { %4626 = vtanh.f32 %v3204_v2 }
 0x7cf   :  { %v4625_v50 = vpop.eup %4624 }
 0x7d0   :  { %v3209_v19 = vmul.f32 %v4625_v50, %v3207_v38 }
 0x7d1   :  { %v4627_v61 = vpop.eup %4626 }
 0x7d2   :  { %v3210_v31 = vmul.f32 %v4627_v61, %v3208_v16  ;;  %v3213_v6 = vadd.f32 %v3211_v27, %v3209_v19 }
 0x7d4   :  { %v3214_v3 = vadd.f32 %v3212_v42, %v3210_v31  ;;  %v3223_v40 = vsel %vm1753_vm7, %v3213_v6, 0.0  ;;  %v7062_v41 = vsel %vm1753_vm7, %v3213_v6, %v6920_v59  ;;  %v3315_v59 = vunpack.c.l.bf16 %v7406_v8 }
 0x7d5   :  { %3725 = vst [vmem:[%s7147_s8 + $0x28] sm:$0xff] %v3223_v40 }
 0x7d6   :  { %v7067_v12 = vsel %vm1754_vm8, %v3214_v3, %v6925_v0  ;;  %v3224_v54 = vsel %vm1754_vm8, %v3214_v3, 0.0 }
 0x7d7   :  { %3726 = vst [vmem:[%s7147_s8 + $0x38] sm:$0xff] %v3224_v54  ;;  %v3368_v51 = vpack.c.bf16 %v7067_v12, %v7062_v41 }
 0x7d9   :  { %3402 = vmatmul.mubr.bf16.vlgmr.msra.gmra.mrb[120].mxu0 %v3368_v51  ;;  %4198 = vmatmul.mubr.bf16.vlgmr.msra.gmra.mrb[96].mxu1 %v3368_v51 }
 0x873   :  { %v3265_v26 = vpop.f32.mrb[116].mxu0  ;;  %v3308_v56 = vpop.f32.mrb[92].mxu1 }
 0x874   :  { %v3317_v0 = vadd.f32 %v3315_v59, %v3265_v26  ;;  %v3267_v10 = vpop.f32.mrb[117].mxu0  ;;  %v4179_v23 = vpop.f32.mrb[93].mxu1  ;;  %v3347_v7 = vadd.f32 %v6976_v22, %v3308_v56  ;;  %v7410_v56 = vld [vmem:[#allocation24_spill] sm:$0xff] }
 0x875   :  { %v3333_v25 = vadd.f32 %v3331_v13, %v3267_v10  ;;  %v3269_v34 = vpop.f32.mrb[118].mxu0  ;;  %v3311_v46 = vpop.f32.mrb[94].mxu1  ;;  %v3469_v35 = vunpack.c.l.bf16 %v7410_v56 }
 0x876   :  { %v3727_v18 = vmul.f32 -1.442695, %v3317_v0  ;;  %v3318_v5 = vadd.f32 %v3316_v36, %v3269_v34  ;;  %v3271_v17 = vpop.f32.mrb[119].mxu0  ;;  %v4180_v43 = vpop.f32.mrb[95].mxu1  ;;  %v3348_v4 = vadd.f32 %v6976_v22, %v3311_v46  ;;  %v3470_v34 = vunpack.c.h.bf16 %v7410_v56 }
 0x877   :  { %v3334_v37 = vadd.f32 %v3332_v1, %v3271_v17  ;;  %v3729_v32 = vmul.f32 -1.442695, %v3333_v25 }
 0x878   :  { %4628 = vpow2.f32 %v3727_v18  ;;  %v3728_v44 = vmul.f32 -1.442695, %v3318_v5 }
 0x879   :  { %v3730_v28 = vmul.f32 -1.442695, %v3334_v37 }
 0x87a   :  { %4630 = vpow2.f32 %v3728_v44 }
 0x87b   :  { %4632 = vpow2.f32 %v3729_v32 }
 0x87c   :  { %4634 = vpow2.f32 %v3730_v28 }
 0x882   :  { %v4629_v45 = vpop.eup %4628 }
 0x883   :  { %v3325_v33 = vadd.f32 1.0, %v4629_v45 }
 0x884   :  { %v4631_v29 = vpop.eup %4630 }
 0x885   :  { %4636 = vrcp.f32 %v3325_v33  ;;  %v3326_v11 = vadd.f32 1.0, %v4631_v29  ;;  %v4633_v60 = vpop.eup %4632 }
 0x886   :  { %v4635_v9 = vpop.eup %4634  ;;  %v3341_v20 = vadd.f32 1.0, %v4633_v60 }
 0x887   :  { %4638 = vrcp.f32 %v3326_v11  ;;  %v3342_v62 = vadd.f32 1.0, %v4635_v9 }
 0x888   :  { %4640 = vrcp.f32 %v3341_v20 }
 0x889   :  { %4642 = vrcp.f32 %v3342_v62  ;;  %v7411_v62 = vld [vmem:[#allocation25_spill] sm:$0xff] }
 0x88f   :  { %v4637_v58 = vpop.eup %4636 }
 0x890   :  { %v3349_v49 = vmul.f32 %v4637_v58, %v3347_v7  ;;  %v3489_v58 = vunpack.c.l.bf16 %v7411_v62 }
 0x891   :  { %v4639_v52 = vpop.eup %4638 }
 0x892   :  { %v3353_v57 = vadd.f32 %v3351_v15, %v3349_v49  ;;  %v3350_v53 = vmul.f32 %v4639_v52, %v3348_v4  ;;  %v4641_v30 = vpop.eup %4640  ;;  %v3490_v4 = vunpack.c.h.bf16 %v7411_v62 }
 0x893   :  { %v4643_v55 = vpop.eup %4642  ;;  %v3357_v38 = vsub.f32 1.0, %v4641_v30  ;;  %v3361_v16 = vmul.f32 %v4641_v30, %v6992_v24 }
 0x894   :  { %4644 = vtanh.f32 %v3353_v57  ;;  %v3354_v2 = vadd.f32 %v3352_v47, %v3350_v53  ;;  %v3358_v19 = vsub.f32 1.0, %v4643_v55  ;;  %v3362_v31 = vmul.f32 %v4643_v55, %v6997_v21 }
 0x896   :  { %4646 = vtanh.f32 %v3354_v2 }
 0x89e   :  { %v4645_v50 = vpop.eup %4644 }
 0x89f   :  { %v3359_v27 = vmul.f32 %v4645_v50, %v3357_v38 }
 0x8a0   :  { %v4647_v61 = vpop.eup %4646 }
 0x8a1   :  { %v3363_v42 = vadd.f32 %v3361_v16, %v3359_v27  ;;  %v3360_v22 = vmul.f32 %v4647_v61, %v3358_v19 }
 0x8a3   :  { %v3503_v6 = vsel %vm1464_vm4, %v3363_v42, %v6992_v24  ;;  %v3507_v3 = vsel %vm1464_vm4, %v3363_v42, 0.0  ;;  %v3364_v40 = vadd.f32 %v3362_v31, %v3360_v22  ;;  %v7409_v24 = vld [vmem:[#allocation3_spill] sm:$0xff] }
 0x8a4   :  { %3735 = vst [vmem:[%s7147_s8 + $0xe0] sm:$0xff] %v3507_v3  ;;  %3515 = vst [vmem:[%s7149_s9] sm:$0xff] %v3503_v6  ;;  %v3453_v8 = vunpack.c.l.bf16 %v7409_v24  ;;  %v3454_v10 = vunpack.c.h.bf16 %v7409_v24 }
 0x8a5   :  { %v3504_v54 = vsel %vm1465_vm5, %v3364_v40, %v6997_v21  ;;  %v3508_v51 = vsel %vm1465_vm5, %v3364_v40, 0.0 }
 0x8a6   :  { %3736 = vst [vmem:[%s7147_s8 + $0xf0] sm:$0xff] %v3508_v51  ;;  %3516 = vst [vmem:[%s7149_s9 + $0x10] sm:$0xff] %v3504_v54 }
 0x8ac   :  { %v3403_v59 = vpop.f32.mrb[120].mxu0  ;;  %v3446_v26 = vpop.f32.mrb[96].mxu1 }
 0x8ad   :  { %v3455_v13 = vadd.f32 %v3453_v8, %v3403_v59  ;;  %v3405_v0 = vpop.f32.mrb[121].mxu0  ;;  %v4199_v21 = vpop.f32.mrb[97].mxu1  ;;  %v3485_v9 = vadd.f32 %v7046_v63, %v3446_v26 }
 0x8ae   :  { %v3471_v23 = vadd.f32 %v3469_v35, %v3405_v0  ;;  %v3407_v36 = vpop.f32.mrb[122].mxu0  ;;  %v3449_v25 = vpop.f32.mrb[98].mxu1 }
 0x8af   :  { %v3731_v46 = vmul.f32 -1.442695, %v3455_v13  ;;  %v3456_v1 = vadd.f32 %v3454_v10, %v3407_v36  ;;  %v3409_v18 = vpop.f32.mrb[123].mxu0  ;;  %v4200_v5 = vpop.f32.mrb[99].mxu1  ;;  %v3486_v15 = vadd.f32 %v7046_v63, %v3449_v25 }
 0x8b0   :  { %v3472_v17 = vadd.f32 %v3470_v34, %v3409_v18  ;;  %v3733_v37 = vmul.f32 -1.442695, %v3471_v23 }
 0x8b1   :  { %4648 = vpow2.f32 %v3731_v46  ;;  %v3732_v43 = vmul.f32 -1.442695, %v3456_v1 }
 0x8b2   :  { %v3734_v44 = vmul.f32 -1.442695, %v3472_v17 }
 0x8b3   :  { %4650 = vpow2.f32 %v3732_v43 }
 0x8b4   :  { %4652 = vpow2.f32 %v3733_v37 }
 0x8b5   :  { %4654 = vpow2.f32 %v3734_v44 }
 0x8bb   :  { %v4649_v32 = vpop.eup %4648 }
 0x8bc   :  { %v3463_v28 = vadd.f32 1.0, %v4649_v32 }
 0x8bd   :  { %v4651_v45 = vpop.eup %4650 }
 0x8be   :  { %4656 = vrcp.f32 %v3463_v28  ;;  %v3464_v33 = vadd.f32 1.0, %v4651_v45  ;;  %v4653_v29 = vpop.eup %4652 }
 0x8bf   :  { %v4655_v11 = vpop.eup %4654  ;;  %v3479_v60 = vadd.f32 1.0, %v4653_v29 }
 0x8c0   :  { %4658 = vrcp.f32 %v3464_v33  ;;  %v3480_v20 = vadd.f32 1.0, %v4655_v11 }
 0x8c1   :  { %4660 = vrcp.f32 %v3479_v60 }
 0x8c2   :  { %4662 = vrcp.f32 %v3480_v20 }
 0x8c8   :  { %v4657_v7 = vpop.eup %4656 }
 0x8c9   :  { %v3487_v48 = vmul.f32 %v4657_v7, %v3485_v9 }
 0x8ca   :  { %v4659_v49 = vpop.eup %4658 }
 0x8cb   :  { %v3491_v52 = vadd.f32 %v3489_v58, %v3487_v48  ;;  %v3488_v47 = vmul.f32 %v4659_v49, %v3486_v15  ;;  %v4661_v53 = vpop.eup %4660 }
 0x8cc   :  { %v4663_v2 = vpop.eup %4662  ;;  %v3495_v30 = vsub.f32 1.0, %v4661_v53  ;;  %v3499_v50 = vmul.f32 %v4661_v53, %v7062_v41 }
 0x8cd   :  { %4664 = vtanh.f32 %v3491_v52  ;;  %v3492_v57 = vadd.f32 %v3490_v4, %v3488_v47  ;;  %v3496_v27 = vsub.f32 1.0, %v4663_v2  ;;  %v3500_v61 = vmul.f32 %v4663_v2, %v7067_v12 }
 0x8cf   :  { %4666 = vtanh.f32 %v3492_v57 }
 0x8d7   :  { %v4665_v55 = vpop.eup %4664 }
 0x8d8   :  { %v3497_v38 = vmul.f32 %v4665_v55, %v3495_v30 }
 0x8d9   :  { %v4667_v16 = vpop.eup %4666 }
 0x8da   :  { %v3501_v19 = vadd.f32 %v3499_v50, %v3497_v38  ;;  %v3498_v63 = vmul.f32 %v4667_v16, %v3496_v27 }
 0x8dc   :  { %v3505_v42 = vsel %vm1462_vm1, %v3501_v19, %v7062_v41  ;;  %v3511_v22 = vsel %vm1462_vm1, %v3501_v19, 0.0  ;;  %v3502_v31 = vadd.f32 %v3500_v61, %v3498_v63 }
 0x8dd   :  { %3513 = vst [vmem:[%s7147_s8 + $0x8] sm:$0xff] %v3511_v22  ;;  %3517 = vst [vmem:[%s7149_s9 + $0x8] sm:$0xff] %v3505_v42 }
 0x8de   :  { %v3506_v6 = vsel %vm7412_vm0, %v3502_v31, %v7067_v12  ;;  %v3512_v3 = vsel %vm7413_vm2, %v3502_v31, 0.0 }
 0x8df   :  { %3514 = vst [vmem:[%s7147_s8 + $0x18] sm:$0xff] %v3512_v3  ;;  %3518 = vst [vmem:[%s7149_s9 + $0x18] sm:$0xff] %v3506_v6 }

</bundles_post_ra>
